<compile_context>
chip_gen: v7x
topology: tpu7x:2x2x1
jax: 0.10.0
libtpu: 0.0.40
codegen_flags: <defaults>
</compile_context>

<pallas_src>
import jax
import jax.numpy as jnp
from jax.experimental import pallas as pl
from jax.experimental.pallas import tpu as pltpu


def _self_attention_kernel(xq_ref, xkv_ref, mqk_ref, kb_ref, wvt_ref, bv_ref,
                           gamma_ref, o_ref,
                           qe_ref, m_ref, l_ref, acc_ref, vcache_ref):
    qi = pl.program_id(1)
    ki = pl.program_id(2)
    c = o_ref.shape[0]                       # true (unpadded) channel count
    tk = xkv_ref.shape[1]                    # kv tile length (static)

    @pl.when(ki == 0)
    def _init():
        m_ref[...] = jnp.full_like(m_ref, -jnp.inf)
        l_ref[...] = jnp.zeros_like(l_ref)
        acc_ref[...] = jnp.zeros_like(acc_ref)
        # Fused "effective query" rows for this q tile (computed once per tile):
        #   qe = x_q^T (Wq^T Wk) + (Wk^T bq)^T                      (tq, C)
        qe_ref[...] = (
            jnp.dot(xq_ref[...].T, mqk_ref[...],
                    preferred_element_type=jnp.float32) + kb_ref[...])

    x_kv = xkv_ref[...]                                             # (C, tk)
    kv_start = pl.multiple_of(ki * tk, tk)

    # Value rows for this kv tile (channels zero-padded to CP lanes), computed
    # only on the first q-tile pass for this batch and cached in VMEM:
    #   v^T = x_kv^T Wv^T + bv                                      (tk, CP)
    @pl.when(qi == 0)
    def _fill_vcache():
        vcache_ref[pl.ds(kv_start, tk), :] = (
            jnp.dot(x_kv.T, wvt_ref[...],
                    preferred_element_type=jnp.float32) + bv_ref[...])

    v_t = vcache_ref[pl.ds(kv_start, tk), :]                        # (tk, CP)

    # Energy tile: contraction over the full channel dim C.         (tq, tk)
    s = jnp.dot(qe_ref[...], x_kv, preferred_element_type=jnp.float32)

    # Online softmax accumulation over the kv axis.
    m_prev = m_ref[...]
    m_new = jnp.maximum(m_prev, jnp.max(s, axis=-1, keepdims=True))  # (tq, 1)
    alpha = jnp.exp(m_prev - m_new)
    p = jnp.exp(s - m_new)                                           # (tq, tk)
    l_ref[...] = alpha * l_ref[...] + jnp.sum(p, axis=-1, keepdims=True)
    acc_ref[...] = alpha * acc_ref[...] + jnp.dot(
        p, v_t, preferred_element_type=jnp.float32)
    m_ref[...] = m_new

    @pl.when(ki == pl.num_programs(2) - 1)
    def _finalize():
        l = l_ref[...]
        r = pl.reciprocal(l, approx=True)        # EUP slot
        r = r * (2.0 - l * r)                    # one Newton step -> ~f32
        out_t = acc_ref[...] * r                 # (tq, CP)
        out_ct = out_t.T                         # (CP, tq), (8,128)-aligned
        o_ref[...] = gamma_ref[0] * out_ct[:c, :] + xq_ref[...]


def _pick_tile(n, preferred):
    for t in (preferred, 256, 128):
        if t <= n and n % t == 0:
            return t
    return n


def self_attention_pallas(x_nchw, wq, bq, wk, bk, wv, bv, gamma, *,
                          q_tile=512, kv_tile=512):
    B, C, H, W = x_nchw.shape
    N = H * W
    C8 = wq.shape[0]
    assert wq.shape == (C8, C) and wk.shape == (C8, C)
    assert wv.shape == (C, C) and bv.shape == (C,)

    f32 = jnp.float32
    x_flat = x_nchw.reshape(B, C, N).astype(f32)

    hp = jax.lax.Precision.HIGHEST
    # Fused QK projection: energy[n, m] = x_n^T M x_m + w . x_m (+ per-row
    # constants that cancel in the softmax), with M = Wq^T Wk and w = Wk^T bq.
    mqk = jnp.dot(wq.T.astype(f32), wk.astype(f32), precision=hp)      # (C, C)
    kb = jnp.dot(wk.T.astype(f32), bq.astype(f32),
                 precision=hp).reshape(1, C)                           # (1, C)

    # Value weights transposed and zero-padded to a full 128-lane channel dim.
    CP = ((C + 127) // 128) * 128
    wvt = jnp.zeros((C, CP), f32).at[:, :C].set(wv.T.astype(f32))      # (C, CP)
    bvp = jnp.zeros((1, CP), f32).at[0, :C].set(bv.astype(f32))        # (1, CP)

    gamma_s = gamma.reshape(-1)[:1].astype(f32)                        # (1,) in SMEM

    tq = _pick_tile(N, q_tile)
    tk = _pick_tile(N, kv_tile)
    grid = (B, N // tq, N // tk)

    out_flat = pl.pallas_call(
        _self_attention_kernel,
        out_shape=jax.ShapeDtypeStruct((B, C, N), f32),
        grid_spec=pltpu.PrefetchScalarGridSpec(
            num_scalar_prefetch=0,
            grid=grid,
            in_specs=[
                pl.BlockSpec((None, C, tq), lambda b, qi, ki: (b, 0, qi)),  # x (q tile)
                pl.BlockSpec((None, C, tk), lambda b, qi, ki: (b, 0, ki)),  # x (kv tile)
                pl.BlockSpec((C, C), lambda b, qi, ki: (0, 0)),             # Wq^T Wk
                pl.BlockSpec((1, C), lambda b, qi, ki: (0, 0)),             # Wk^T bq
                pl.BlockSpec((C, CP), lambda b, qi, ki: (0, 0)),            # Wv^T (padded)
                pl.BlockSpec((1, CP), lambda b, qi, ki: (0, 0)),            # bv (padded)
                pl.BlockSpec(memory_space=pltpu.MemorySpace.SMEM),          # gamma
            ],
            out_specs=pl.BlockSpec((None, C, tq), lambda b, qi, ki: (b, 0, qi)),
            scratch_shapes=[
                pltpu.VMEM((tq, C), f32),    # fused query rows (per q tile)
                pltpu.VMEM((tq, 1), f32),    # running max
                pltpu.VMEM((tq, 1), f32),    # running sum
                pltpu.VMEM((tq, CP), f32),   # output accumulator (padded lanes)
                pltpu.VMEM((N, CP), f32),    # per-batch cached value rows
            ],
        ),
        compiler_params=pltpu.CompilerParams(
            # q-tile axis is "arbitrary" (not core-sharded) so the per-batch
            # value cache, filled on qi == 0, is always valid on the core that
            # consumes it; batch stays "parallel" for megacore.
            dimension_semantics=("parallel", "arbitrary", "arbitrary"),
            vmem_limit_bytes=32 * 1024 * 1024,
        ),
    )(x_flat, x_flat, mqk, kb, wvt, bvp, gamma_s)

    return out_flat.reshape(B, C, H, W)


def self_attention_reference(x_nchw, wq, bq, wk, bk, wv, bv, gamma):
    """Pure-JAX reference replicating the PyTorch forward exactly."""
    B, C, H, W = x_nchw.shape
    N = H * W
    x = x_nchw.reshape(B, C, N)
    hp = jax.lax.Precision.HIGHEST
    q = jnp.einsum('oc,bcn->bon', wq, x, precision=hp) + bq[None, :, None]
    k = jnp.einsum('oc,bcn->bon', wk, x, precision=hp) + bk[None, :, None]
    v = jnp.einsum('oc,bcn->bon', wv, x, precision=hp) + bv[None, :, None]
    energy = jnp.einsum('bcn,bcm->bnm', q, k, precision=hp)            # (B, N, N)
    attn = jax.nn.softmax(energy, axis=-1)
    out = jnp.einsum('bcm,bnm->bcn', v, attn, precision=hp)            # (B, C, N)
    out = gamma[0] * out + x
    return out.reshape(B, C, H, W)


if __name__ == "__main__":
    # Shapes consistent with the module: in_dim must be >= 8 (uses C // 8).
    B, C, H, W = 2, 16, 16, 16
    C8 = C // 8

    key = jax.random.PRNGKey(0)
    kx, kq, kbq, kk, kbk, kv, kbv = jax.random.split(key, 7)

    x = jax.random.normal(kx, (B, C, H, W), dtype=jnp.float32)

    # Conv2d(k=1) weights are (out, in, 1, 1); represented here as (out, in).
    wq = jax.random.normal(kq, (C8, C), dtype=jnp.float32) * 0.1
    bq = jax.random.normal(kbq, (C8,), dtype=jnp.float32) * 0.1
    wk = jax.random.normal(kk, (C8, C), dtype=jnp.float32) * 0.1
    bk = jax.random.normal(kbk, (C8,), dtype=jnp.float32) * 0.1
    wv = jax.random.normal(kv, (C, C), dtype=jnp.float32) * 0.1
    bv = jax.random.normal(kbv, (C,), dtype=jnp.float32) * 0.1
    # PyTorch initializes gamma = zeros(1); use a non-zero value so the
    # attention path actually contributes to the output.
    gamma = jnp.array([0.5], dtype=jnp.float32)

    out = self_attention_pallas(x, wq, bq, wk, bk, wv, bv, gamma)
    out = jax.block_until_ready(out)

    ref = self_attention_reference(x, wq, bq, wk, bk, wv, bv, gamma)
    assert out.shape == (B, C, H, W)
    assert jnp.allclose(out, ref, rtol=1e-4, atol=1e-4), (
        f"max abs err = {jnp.max(jnp.abs(out - ref))}")

    print("KERNEL_OK")
</pallas_src>

<mosaic_0001>
module attributes {stable_mosaic.version = 11 : i64} {
  func.func @_self_attention_kernel(%arg0: i32, %arg1: i32, %arg2: i32, %arg3: memref<1x16x256xf32, #tpu.memory_space<vmem>>, %arg4: memref<1x16x256xf32, #tpu.memory_space<vmem>>, %arg5: memref<16x16xf32, #tpu.memory_space<vmem>>, %arg6: memref<1x16xf32, #tpu.memory_space<vmem>>, %arg7: memref<16x128xf32, #tpu.memory_space<vmem>>, %arg8: memref<1x128xf32, #tpu.memory_space<vmem>>, %arg9: memref<1xf32, #tpu.memory_space<smem>>, %arg10: memref<1x16x256xf32, #tpu.memory_space<vmem>>, %arg11: memref<256x16xf32, #tpu.memory_space<vmem>>, %arg12: memref<256x1xf32, #tpu.memory_space<vmem>>, %arg13: memref<256x1xf32, #tpu.memory_space<vmem>>, %arg14: memref<256x128xf32, #tpu.memory_space<vmem>>, %arg15: memref<256x128xf32, #tpu.memory_space<vmem>>) attributes {dimension_semantics = [#tpu.dimension_semantics<parallel>, #tpu.dimension_semantics<arbitrary>, #tpu.dimension_semantics<arbitrary>], iteration_bounds = array<i64: 2, 1, 1>, scalar_prefetch = 0 : i64, scratch_operands = 5 : i64, tpu.core_type = #tpu.core_type<tc>, window_params = [{transform_indices = @transform_0, window_bounds = array<i64: 1, 16, 256>}, {transform_indices = @transform_1, window_bounds = array<i64: 1, 16, 256>}, {pipeline_mode = #tpu.pipeline_mode<synchronous>, transform_indices = @transform_2, window_bounds = array<i64: 16, 16>}, {pipeline_mode = #tpu.pipeline_mode<synchronous>, transform_indices = @transform_3, window_bounds = array<i64: 1, 16>}, {pipeline_mode = #tpu.pipeline_mode<synchronous>, transform_indices = @transform_4, window_bounds = array<i64: 16, 128>}, {pipeline_mode = #tpu.pipeline_mode<synchronous>, transform_indices = @transform_5, window_bounds = array<i64: 1, 128>}, {transform_indices = @transform_6, window_bounds = array<i64: 1>}, {transform_indices = @transform_7, window_bounds = array<i64: 1, 16, 256>}]} {
    %c0_i32 = arith.constant 0 : i32
    %0 = arith.cmpi eq, %arg2, %c0_i32 : i32
    %1 = arith.extui %0 : i1 to i32
    %c0_i32_0 = arith.constant 0 : i32
    %2 = arith.cmpi ne, %1, %c0_i32_0 : i32
    scf.if %2 {
      %cst_25 = arith.constant 0xFF800000 : f32
      %39 = vector.broadcast %cst_25 : f32 to vector<256x1xf32>
      %c0_26 = arith.constant 0 : index
      %c0_27 = arith.constant 0 : index
      %40 = vector.load %arg12[%c0_26, %c0_27] : memref<256x1xf32, #tpu.memory_space<vmem>>, vector<256x1xf32>
      tpu.vector_store %arg12[%c0_26, %c0_27], %39 {strides = array<i32>} : memref<256x1xf32, #tpu.memory_space<vmem>>, vector<256x1xf32>,
      %cst_28 = arith.constant 0.000000e+00 : f32
      %41 = vector.broadcast %cst_28 : f32 to vector<256x1xf32>
      %c0_29 = arith.constant 0 : index
      %c0_30 = arith.constant 0 : index
      %42 = vector.load %arg13[%c0_29, %c0_30] : memref<256x1xf32, #tpu.memory_space<vmem>>, vector<256x1xf32>
      tpu.vector_store %arg13[%c0_29, %c0_30], %41 {strides = array<i32>} : memref<256x1xf32, #tpu.memory_space<vmem>>, vector<256x1xf32>,
      %cst_31 = arith.constant 0.000000e+00 : f32
      %43 = vector.broadcast %cst_31 : f32 to vector<256x128xf32>
      %c0_32 = arith.constant 0 : index
      %c0_33 = arith.constant 0 : index
      %44 = vector.load %arg14[%c0_32, %c0_33] : memref<256x128xf32, #tpu.memory_space<vmem>>, vector<256x128xf32>
      tpu.vector_store %arg14[%c0_32, %c0_33], %43 {strides = array<i32>} : memref<256x128xf32, #tpu.memory_space<vmem>>, vector<256x128xf32>,
      %c0_34 = arith.constant 0 : index
      %c0_35 = arith.constant 0 : index
      %c0_36 = arith.constant 0 : index
      %45 = vector.load %arg3[%c0_34, %c0_35, %c0_36] : memref<1x16x256xf32, #tpu.memory_space<vmem>>, vector<1x16x256xf32>
      %46 = vector.shape_cast %45 : vector<1x16x256xf32> to vector<16x256xf32>
      %47 = tpu.transpose %46, [1, 0] : vector<16x256xf32> -> vector<256x16xf32>
      %c0_37 = arith.constant 0 : index
      %c0_38 = arith.constant 0 : index
      %48 = vector.load %arg5[%c0_37, %c0_38] : memref<16x16xf32, #tpu.memory_space<vmem>>, vector<16x16xf32>
      %cst_39 = arith.constant dense<0.000000e+00> : vector<256x16xf32>
      %49 = tpu.matmul %47, %48, %cst_39 {dimension_numbers = #tpu.dot_dimension_numbers<[1], [0], [0], [1], [0, 0, 1, 1], [], []>} : vector<256x16xf32>, vector<16x16xf32>, vector<256x16xf32> -> vector<256x16xf32>
      %c0_40 = arith.constant 0 : index
      %c0_41 = arith.constant 0 : index
      %50 = vector.load %arg6[%c0_40, %c0_41] : memref<1x16xf32, #tpu.memory_space<vmem>>, vector<1x16xf32>
      %51 = vector.broadcast %50 : vector<1x16xf32> to vector<256x16xf32>
      %52 = arith.addf %49, %51 : vector<256x16xf32>
      %c0_42 = arith.constant 0 : index
      %c0_43 = arith.constant 0 : index
      %53 = vector.load %arg11[%c0_42, %c0_43] : memref<256x16xf32, #tpu.memory_space<vmem>>, vector<256x16xf32>
      tpu.vector_store %arg11[%c0_42, %c0_43], %52 {strides = array<i32>} : memref<256x16xf32, #tpu.memory_space<vmem>>, vector<256x16xf32>,
    } else {
    }
    %c0 = arith.constant 0 : index
    %c0_1 = arith.constant 0 : index
    %c0_2 = arith.constant 0 : index
    %3 = vector.load %arg4[%c0, %c0_1, %c0_2] : memref<1x16x256xf32, #tpu.memory_space<vmem>>, vector<1x16x256xf32>
    %4 = vector.shape_cast %3 : vector<1x16x256xf32> to vector<16x256xf32>
    %c256_i32 = arith.constant 256 : i32
    %5 = arith.muli %arg2, %c256_i32 : i32
    %6 = tpu.assume_multiple %5, 256 : i32
    %c0_i32_3 = arith.constant 0 : i32
    %7 = arith.cmpi eq, %arg1, %c0_i32_3 : i32
    %8 = arith.extui %7 : i1 to i32
    %c0_i32_4 = arith.constant 0 : i32
    %9 = arith.cmpi ne, %8, %c0_i32_4 : i32
    scf.if %9 {
      %39 = tpu.transpose %4, [1, 0] : vector<16x256xf32> -> vector<256x16xf32>
      %c0_25 = arith.constant 0 : index
      %c0_26 = arith.constant 0 : index
      %40 = vector.load %arg7[%c0_25, %c0_26] : memref<16x128xf32, #tpu.memory_space<vmem>>, vector<16x128xf32>
      %cst_27 = arith.constant dense<0.000000e+00> : vector<256x128xf32>
      %41 = tpu.matmul %39, %40, %cst_27 {dimension_numbers = #tpu.dot_dimension_numbers<[1], [0], [0], [1], [0, 0, 1, 1], [], []>} : vector<256x16xf32>, vector<16x128xf32>, vector<256x128xf32> -> vector<256x128xf32>
      %c0_28 = arith.constant 0 : index
      %c0_29 = arith.constant 0 : index
      %42 = vector.load %arg8[%c0_28, %c0_29] : memref<1x128xf32, #tpu.memory_space<vmem>>, vector<1x128xf32>
      %43 = vector.broadcast %42 : vector<1x128xf32> to vector<256x128xf32>
      %44 = arith.addf %41, %43 : vector<256x128xf32>
      %45 = arith.index_cast %6 : i32 to index
      %c0_30 = arith.constant 0 : index
      %46 = vector.load %arg15[%45, %c0_30] : memref<256x128xf32, #tpu.memory_space<vmem>>, vector<256x128xf32>
      tpu.vector_store %arg15[%45, %c0_30], %44 {strides = array<i32>} : memref<256x128xf32, #tpu.memory_space<vmem>>, vector<256x128xf32>,
    } else {
    }
    %10 = arith.index_cast %6 : i32 to index
    %c0_5 = arith.constant 0 : index
    %11 = vector.load %arg15[%10, %c0_5] : memref<256x128xf32, #tpu.memory_space<vmem>>, vector<256x128xf32>
    %c0_6 = arith.constant 0 : index
    %c0_7 = arith.constant 0 : index
    %12 = vector.load %arg11[%c0_6, %c0_7] : memref<256x16xf32, #tpu.memory_space<vmem>>, vector<256x16xf32>
    %cst = arith.constant dense<0.000000e+00> : vector<256x256xf32>
    %13 = tpu.matmul %12, %4, %cst {dimension_numbers = #tpu.dot_dimension_numbers<[1], [0], [0], [1], [0, 0, 1, 1], [], []>} : vector<256x16xf32>, vector<16x256xf32>, vector<256x256xf32> -> vector<256x256xf32>
    %c0_8 = arith.constant 0 : index
    %c0_9 = arith.constant 0 : index
    %14 = vector.load %arg12[%c0_8, %c0_9] : memref<256x1xf32, #tpu.memory_space<vmem>>, vector<256x1xf32>
    %cst_10 = arith.constant dense<0xFF800000> : vector<256xf32>
    %15 = vector.multi_reduction <maximumf>, %13, %cst_10 [1] : vector<256x256xf32> to vector<256xf32>
    %16 = vector.shape_cast %15 : vector<256xf32> to vector<256x1xf32>
    %17 = arith.maximumf %14, %16 : vector<256x1xf32>
    %18 = arith.subf %14, %17 : vector<256x1xf32>
    %19 = math.exp %18 : vector<256x1xf32>
    %20 = vector.broadcast %17 : vector<256x1xf32> to vector<256x256xf32>
    %21 = arith.subf %13, %20 : vector<256x256xf32>
    %22 = math.exp %21 : vector<256x256xf32>
    %c0_11 = arith.constant 0 : index
    %c0_12 = arith.constant 0 : index
    %23 = vector.load %arg13[%c0_11, %c0_12] : memref<256x1xf32, #tpu.memory_space<vmem>>, vector<256x1xf32>
    %24 = arith.mulf %19, %23 : vector<256x1xf32>
    %cst_13 = arith.constant dense<0.000000e+00> : vector<256xf32>
    %25 = vector.multi_reduction <add>, %22, %cst_13 [1] : vector<256x256xf32> to vector<256xf32>
    %26 = vector.shape_cast %25 : vector<256xf32> to vector<256x1xf32>
    %27 = arith.addf %24, %26 : vector<256x1xf32>
    %c0_14 = arith.constant 0 : index
    %c0_15 = arith.constant 0 : index
    %28 = vector.load %arg13[%c0_14, %c0_15] : memref<256x1xf32, #tpu.memory_space<vmem>>, vector<256x1xf32>
    tpu.vector_store %arg13[%c0_14, %c0_15], %27 {strides = array<i32>} : memref<256x1xf32, #tpu.memory_space<vmem>>, vector<256x1xf32>,
    %c0_16 = arith.constant 0 : index
    %c0_17 = arith.constant 0 : index
    %29 = vector.load %arg14[%c0_16, %c0_17] : memref<256x128xf32, #tpu.memory_space<vmem>>, vector<256x128xf32>
    %30 = vector.broadcast %19 : vector<256x1xf32> to vector<256x128xf32>
    %31 = arith.mulf %30, %29 : vector<256x128xf32>
    %cst_18 = arith.constant dense<0.000000e+00> : vector<256x128xf32>
    %32 = tpu.matmul %22, %11, %cst_18 {dimension_numbers = #tpu.dot_dimension_numbers<[1], [0], [0], [1], [0, 0, 1, 1], [], []>} : vector<256x256xf32>, vector<256x128xf32>, vector<256x128xf32> -> vector<256x128xf32>
    %33 = arith.addf %31, %32 : vector<256x128xf32>
    %c0_19 = arith.constant 0 : index
    %c0_20 = arith.constant 0 : index
    %34 = vector.load %arg14[%c0_19, %c0_20] : memref<256x128xf32, #tpu.memory_space<vmem>>, vector<256x128xf32>
    tpu.vector_store %arg14[%c0_19, %c0_20], %33 {strides = array<i32>} : memref<256x128xf32, #tpu.memory_space<vmem>>, vector<256x128xf32>,
    %c0_21 = arith.constant 0 : index
    %c0_22 = arith.constant 0 : index
    %35 = vector.load %arg12[%c0_21, %c0_22] : memref<256x1xf32, #tpu.memory_space<vmem>>, vector<256x1xf32>
    tpu.vector_store %arg12[%c0_21, %c0_22], %17 {strides = array<i32>} : memref<256x1xf32, #tpu.memory_space<vmem>>, vector<256x1xf32>,
    %c0_i32_23 = arith.constant 0 : i32
    %36 = arith.cmpi eq, %arg2, %c0_i32_23 : i32
    %37 = arith.extui %36 : i1 to i32
    %c0_i32_24 = arith.constant 0 : i32
    %38 = arith.cmpi ne, %37, %c0_i32_24 : i32
    scf.if %38 {
      %c0_25 = arith.constant 0 : index
      %c0_26 = arith.constant 0 : index
      %39 = vector.load %arg13[%c0_25, %c0_26] : memref<256x1xf32, #tpu.memory_space<vmem>>, vector<256x1xf32>
      %40 = tpu.reciprocal %39 {approx = true} : vector<256x1xf32> -> vector<256x1xf32>
      %41 = arith.mulf %39, %40 : vector<256x1xf32>
      %cst_27 = arith.constant 2.000000e+00 : f32
      %42 = vector.broadcast %cst_27 : f32 to vector<256x1xf32>
      %43 = arith.subf %42, %41 : vector<256x1xf32>
      %44 = arith.mulf %40, %43 : vector<256x1xf32>
      %c0_28 = arith.constant 0 : index
      %c0_29 = arith.constant 0 : index
      %45 = vector.load %arg14[%c0_28, %c0_29] : memref<256x128xf32, #tpu.memory_space<vmem>>, vector<256x128xf32>
      %46 = vector.broadcast %44 : vector<256x1xf32> to vector<256x128xf32>
      %47 = arith.mulf %45, %46 : vector<256x128xf32>
      %48 = tpu.transpose %47, [1, 0] : vector<256x128xf32> -> vector<128x256xf32>
      %c0_30 = arith.constant 0 : index
      %49 = memref.load %arg9[%c0_30] : memref<1xf32, #tpu.memory_space<smem>>
      %50 = vector.extract_strided_slice %48 {offsets = [0, 0], sizes = [16, 256], strides = [1, 1]} : vector<128x256xf32> to vector<16x256xf32>
      %51 = vector.broadcast %49 : f32 to vector<16x256xf32>
      %52 = arith.mulf %51, %50 : vector<16x256xf32>
      %c0_31 = arith.constant 0 : index
      %c0_32 = arith.constant 0 : index
      %c0_33 = arith.constant 0 : index
      %53 = vector.load %arg3[%c0_31, %c0_32, %c0_33] : memref<1x16x256xf32, #tpu.memory_space<vmem>>, vector<1x16x256xf32>
      %54 = vector.shape_cast %53 : vector<1x16x256xf32> to vector<16x256xf32>
      %55 = arith.addf %52, %54 : vector<16x256xf32>
      %c0_34 = arith.constant 0 : index
      %c0_35 = arith.constant 0 : index
      %c0_36 = arith.constant 0 : index
      %56 = vector.load %arg10[%c0_34, %c0_35, %c0_36] : memref<1x16x256xf32, #tpu.memory_space<vmem>>, vector<1x16x256xf32>
      %57 = vector.shape_cast %56 : vector<1x16x256xf32> to vector<16x256xf32>
      %58 = vector.shape_cast %55 : vector<16x256xf32> to vector<1x16x256xf32>
      tpu.vector_store %arg10[%c0_34, %c0_35, %c0_36], %58 {strides = array<i32>} : memref<1x16x256xf32, #tpu.memory_space<vmem>>, vector<1x16x256xf32>,
    } else {
    }
    return
  }
  func.func @transform_0(%arg0: i32, %arg1: i32, %arg2: i32) -> (i32, i32, i32) {
    %c0_i32 = arith.constant 0 : i32
    %c0_i32_0 = arith.constant 0 : i32
    return %arg0, %c0_i32, %arg1 : i32, i32, i32
  }
  func.func @transform_1(%arg0: i32, %arg1: i32, %arg2: i32) -> (i32, i32, i32) {
    %c0_i32 = arith.constant 0 : i32
    %c0_i32_0 = arith.constant 0 : i32
    return %arg0, %c0_i32, %arg2 : i32, i32, i32
  }
  func.func @transform_2(%arg0: i32, %arg1: i32, %arg2: i32) -> (i32, i32) {
    %c0_i32 = arith.constant 0 : i32
    %c0_i32_0 = arith.constant 0 : i32
    %c0_i32_1 = arith.constant 0 : i32
    return %c0_i32, %c0_i32_0 : i32, i32
  }
  func.func @transform_3(%arg0: i32, %arg1: i32, %arg2: i32) -> (i32, i32) {
    %c0_i32 = arith.constant 0 : i32
    %c0_i32_0 = arith.constant 0 : i32
    %c0_i32_1 = arith.constant 0 : i32
    return %c0_i32, %c0_i32_0 : i32, i32
  }
  func.func @transform_4(%arg0: i32, %arg1: i32, %arg2: i32) -> (i32, i32) {
    %c0_i32 = arith.constant 0 : i32
    %c0_i32_0 = arith.constant 0 : i32
    %c0_i32_1 = arith.constant 0 : i32
    return %c0_i32, %c0_i32_0 : i32, i32
  }
  func.func @transform_5(%arg0: i32, %arg1: i32, %arg2: i32) -> (i32, i32) {
    %c0_i32 = arith.constant 0 : i32
    %c0_i32_0 = arith.constant 0 : i32
    %c0_i32_1 = arith.constant 0 : i32
    return %c0_i32, %c0_i32_0 : i32, i32
  }
  func.func @transform_6(%arg0: i32, %arg1: i32, %arg2: i32) -> i32 {
    %c0_i32 = arith.constant 0 : i32
    %c0_i32_0 = arith.constant 0 : i32
    return %c0_i32 : i32
  }
  func.func @transform_7(%arg0: i32, %arg1: i32, %arg2: i32) -> (i32, i32, i32) {
    %c0_i32 = arith.constant 0 : i32
    %c0_i32_0 = arith.constant 0 : i32
    return %arg0, %c0_i32, %arg1 : i32, i32, i32
  }
}

</mosaic_0001>

<bundles_post_ra>
// kernel: tpu_custom_call.1
= control target key start
LH: loop header
LB: loop body
LE: loop exit
PB: predicated region body
PF: predicated region fallthrough
CT: control target
= control target key end

     0   :  { %s6356_s0 = inlined_call_operand.hbm [shape: f32[2,16,256], index: 0, kind: input, shape index: {}]   ;;  %s6357_s1 = inlined_call_operand.hbm [shape: f32[2,16,256], index: 1, kind: input, shape index: {}]   ;;  %s6358_s2 = inlined_call_operand.hbm [shape: f32[16,16], index: 2, kind: input, shape index: {}]   ;;  %s6359_s3 = inlined_call_operand.vmem [shape: f32[1,16], index: 3, kind: input, shape index: {}]   ;;  %s6360_s4 = inlined_call_operand.vmem [shape: f32[16,128], index: 4, kind: input, shape index: {}]   ;;  %s6361_s5 = inlined_call_operand.vmem [shape: f32[1,128], index: 5, kind: input, shape index: {}]   ;;  %s6362_s6 = inlined_call_operand.<no memory space> [shape: f32[1], index: 6, kind: input, shape index: {}]   ;;  %s6363_s7 = inlined_call_operand.hbm [shape: f32[2,16,256], index: 7, kind: output, shape index: {}]  }
   0x1   :  { %6418 = sst [smem:[#allocation69_spill]] %s6356_s0 }
   0x2   :  { %6419 = sst [smem:[#allocation70_spill]] %s6358_s2 }
   0x3   :  { %12 = sst [smem:[#allocation7]] %s6362_s6 }
   0x4   :  { %13 = vsyncpa [#allocation9], 0 }
   0x5   :  { %15 = vsyncpa [#allocation9 + $0x1], 0 }
   0x6   :  { %16 = vsyncpa [#allocation12], 0 }
   0x7   :  { %18 = vsyncpa [#allocation12 + $0x1], 0 }
   0x8   :  { %19 = vsyncpa [#allocation10], 0 }
   0x9   :  { %21 = vsyncpa [#allocation10 + $0x1], 0  ;;  %s4701_s26 = smov 0   ;;  %s4703_s27 = smov 0  }
   0xa   :  { %s4705_s28 = smov 0   ;;  %s4707_s29 = smov 0  }
   0xb   :  { %s4709_s30 = smov 0   ;;  %s4711_s8 = smov 0  }
   0xc LB: > { %6420 = sst [smem:[#allocation19_spill]] %s4630_s28  ;;  %s4732_s6 = sadd.s32 4294967295, %s4642_s8   ;;  %s4642_s8 = sphi %s4711_s8, %s27_s8   ;;  %s4638_s30 = sphi %s4709_s30, %s6571_s30   ;;  %s4634_s29 = sphi %s4707_s29, %s6570_s29   ;;  %s4630_s28 = sphi %s4705_s28, %s6566_s28   ;;  %s4626_s27 = sphi %s4703_s27, %s6569_s27   ;;  %s4622_s26 = sphi %s4701_s26, %s6568_s26  }
   0xd   : > { %s3765_s9 = sadd.s32 4294967294, %s4642_s8   ;;  %p68_p0 = scmp.ne.s32.totalorder %s4626_s27, %s4622_s26 }
   0xe   : > { %p6364_p1 = scmp.eq.s32.totalorder %s4732_s6, 0  ;;  %p233_p3 = scmp.eq.s32.totalorder %s3765_s9, 1 }
   0xf   : > { %p3766_p5 = scmp.ge.s32.totalorder %s4642_s8, 1  ;;  %p240_p7 = scmp.lt.s32.totalorder %s4642_s8, 3 }
  0x10   : > { %p4741_p4 = por %p6364_p1, %p68_p0  ;;  %p4746_p6 = por %p233_p3, %p68_p0 }
  0x11   : > { %p4751_p8 = pnand %p3766_p5, %p240_p7  ;;  %s4644_s13 = smov [#allocation13]  }
  0x12   : > { %s6421_s10 = scalar_select %p4741_p4, 1, 0 }
  0x13   : > { %s6422_s11 = scalar_select %p4746_p6, 1, 0 }
  0x14   : > { %s6423_s12 = scalar_select %p4751_p8, 1, 0 }
  0x15   : > { %s252_s14 = sshll.u32 %s4644_s13, 4  ;;  %p4128_p9 = pneg %p4751_p8  ;;  %s253_s14 = int_to_ptr.vmem [resolvable:$true] %s252_s14 }
  0x16   : > { %s46_s16 = sadd.s32 1, %s4638_s30  ;;  %s6425_s2 = sld [smem:[#allocation70_spill]] }
  0x17   : > { %p4760_p11 = pnand %p4128_p9, %p6364_p1 }
  0x19   : > { %p4466_p13 = pneg %p4760_p11 }
  0x1c   : > { %s4464_s19 = scalar_lea.hbm %s6425_s2, 256 }
  0x1d   : > { %p4465_p12 = scmp.ne.s32.totalorder %s6425_s2, %s4464_s19  ;;  %p4471_p5 = scmp.lt.u32.totalorder %s4464_s19, %s6425_s2 }
  0x1f   : > { %p4467_p0 = pnand %p4466_p13, %p4465_p12 }
  0x21   : > { %p4468_p3 = pneg %p4467_p0 }
  0x23   : > { %p4473_p7 = pnand %p4471_p5, %p4468_p3 }
  0x25   : > { %4476 = shalt.err (!%p4473_p7)
}
  0x26   : > { %s4477_s24 = scalar_lea.vmem %s253_s14, 256  ;;  %p4485_p2 = scmp.lt.s32.totalorder %s253_s14, %s253_s14 }
  0x27   : > { %p4478_p9 = scmp.ne.s32.totalorder %s253_s14, %s4477_s24  ;;  %p4486_p6 = scmp.lt.s32.totalorder %s4477_s24, %s4477_s24 }
  0x29   : > { %p4480_p10 = pnand %p4478_p9, %p4466_p13  ;;  %p4487_p4 = por %p4486_p6, %p4485_p2 }
  0x2b   : > { %p4481_p1 = pneg %p4480_p10 }
  0x2d   : > { %p4488_p8 = pnand %p4487_p4, %p4481_p1 }
  0x2f   : > { %4491 = shalt.err (!%p4488_p8)
}
  0x30   : > { %s4645_s25 = smov 128   ;;  %s4646_s9 = smov 8  }
  0x31   : > { %4131 = dma.hbm_to_vmem [thread:$0]  (!%p4760_p11), %s6425_s2, 256, %s253_s14, [#allocation12], %s4645_s25, %s4645_s25, %s4646_s9  }
  0x32   : > { %p48_p1 = scmp.ge.s32.totalorder %s46_s16, 2  ;;  %s55_s18 = sadd.s32 1, %s4630_s28 }
  0x33   : > { %p62_p2 = scmp.ne.s32.totalorder %s4630_s28, %s4626_s27  ;;  %p63_p4 = scmp.eq.s32.totalorder %s4642_s8, 0 }
  0x34   : > { %s6573_s16 = smov (%p48_p1, %s46_s16), 0  ;;  %p6428_p8 = scmp.eq.s32.totalorder %s4732_s6, 1 }
  0x35   : > { %6426 = sst [smem:[#allocation20_spill]] %s6573_s16  ;;  %p4787_p6 = por %p63_p4, %p62_p2 }
  0x36   : > { %p4793_p10 = por %p6428_p8, %p62_p2  ;;  %s50_s20 = ssub.s32 %s4638_s30, %s6573_s16 }
  0x37   : > { %p4144_p12 = scmp.lt.s32.totalorder %s4642_s8, 2  ;;  %p53_p11 = scmp.eq.s32.totalorder %s50_s20, 0 }
  0x38   : > { %s278_s14 = sand.u32 1, %s4630_s28   ;;  %s6367_s23 = sshll.u32 %s4638_s30, 9 }
  0x39   : > { %s4801_s21 = sshll.u32 %s278_s14, 5  ;;  %s6431_s0 = sld [smem:[#allocation69_spill]] }
  0x3a   : > { %s4804_s22 = scalar_select %p53_p11, %s4630_s28, %s55_s18  }
  0x3b   : > { %s282_s13 = scalar_lea.vmem [#allocation8], %s4801_s21  ;;  %p4819_p13 = pnand %p4144_p12, %p4787_p6 }
  0x3c   : > { %6430 = sst [smem:[#allocation21_spill]] %s4804_s22  ;;  %s291_s17 = sshll.u32 %s282_s13, 4  ;;  %s4815_s17 = int_to_ptr.vmem [resolvable:$true] %s291_s17 }
  0x3d   : > { %s4823_s18 = scalar_lea.sflag [#allocation9], %s278_s14  ;;  %p4494_p3 = pneg %p4819_p13 }
  0x3f   : > { %s4812_s9 = scalar_lea.hbm %s6431_s0, %s6367_s23  ;;  %s4497_s19 = scalar_lea.hbm %s6431_s0, 1024 }
  0x40   : > { %s4492_s24 = scalar_lea.hbm %s4812_s9, 512  ;;  %p4498_p9 = scmp.lt.u32.totalorder %s4812_s9, %s6431_s0 }
  0x41   : > { %p4493_p0 = scmp.ne.s32.totalorder %s4812_s9, %s4492_s24  ;;  %p4499_p1 = scmp.lt.u32.totalorder %s4497_s19, %s4492_s24 }
  0x42   : > { %p4501_p4 = scmp.lt.u32.totalorder %s4492_s24, %s4812_s9 }
  0x43   : > { %p4495_p5 = pnand %p4494_p3, %p4493_p0  ;;  %p4500_p2 = por %p4499_p1, %p4498_p9 }
  0x45   : > { %p4496_p7 = pneg %p4495_p5  ;;  %p4502_p6 = por %p4501_p4, %p4500_p2 }
  0x47   : > { %p4503_p8 = pnand %p4502_p6, %p4496_p7 }
  0x49   : > { %4506 = shalt.err (!%p4503_p8)
}
  0x4a   : > { %s4507_s14 = scalar_lea.vmem %s4815_s17, 512  ;;  %s4647_s25 = smov [#allocation8]  }
  0x4b   : > { %p4508_p12 = scmp.ne.s32.totalorder %s4815_s17, %s4507_s14  ;;  %s4512_s13 = sshll.u32 %s4647_s25, 4  ;;  %s4513_s13 = int_to_ptr.vmem [resolvable:$false] %s4512_s13 }
  0x4c   : > { %s4514_s2 = scalar_lea.vmem %s4513_s13, 1024  ;;  %p4515_p5 = scmp.lt.s32.totalorder %s4815_s17, %s4513_s13 }
  0x4d   : > { %p4510_p11 = pnand %p4508_p12, %p4494_p3  ;;  %p4516_p9 = scmp.lt.s32.totalorder %s4514_s2, %s4507_s14 }
  0x4f   : > { %p4511_p0 = pneg %p4510_p11  ;;  %p4517_p1 = por %p4516_p9, %p4515_p5 }
  0x51   : > { %p4518_p2 = pnand %p4517_p1, %p4511_p0 }
  0x53   : > { %4521 = shalt.err (!%p4518_p2)
}
  0x54   : > { %s4648_s23 = smov 256   ;;  %s4649_s24 = smov 16  }
  0x55   : > { %4135 = dma.hbm_to_vmem [thread:$0]  (!%p4819_p13), %s4812_s9, 512, %s4815_s17, %s4823_s18, %s4648_s23, %s4648_s23, %s4649_s24  }
  0x56   : > { %s6433_s19 = sshll.u32 %s4638_s30, 9  ;;  %s305_s2 = scalar_lea.vmem [#allocation11], %s4801_s21 }
  0x57   : > { %s4859_s13 = scalar_lea.hbm %s6357_s1, %s6433_s19  ;;  %s314_s0 = sshll.u32 %s305_s2, 4  ;;  %s4862_s0 = int_to_ptr.vmem [resolvable:$true] %s314_s0 }
  0x58   : > { %s301_s16 = sand.u32 1, %s4642_s8   ;;  %s4522_s28 = scalar_lea.hbm %s4859_s13, 512 }
  0x59   : > { %s4865_s22 = scalar_lea.sflag [#allocation12], %s301_s16  ;;  %p4523_p7 = scmp.ne.s32.totalorder %s4859_s13, %s4522_s28 }
  0x5a   : > { %s4527_s18 = scalar_lea.hbm %s6357_s1, 1024  ;;  %p4528_p8 = scmp.lt.u32.totalorder %s4859_s13, %s6357_s1 }
  0x5b   : > { %p4525_p4 = pnand %p4523_p7, %p4494_p3  ;;  %p4529_p12 = scmp.lt.u32.totalorder %s4527_s18, %s4522_s28 }
  0x5c   : > { %p4531_p0 = scmp.lt.u32.totalorder %s4522_s28, %s4859_s13 }
  0x5d   : > { %p4526_p6 = pneg %p4525_p4  ;;  %p4530_p11 = por %p4529_p12, %p4528_p8 }
  0x5f   : > { %p4532_p5 = por %p4531_p0, %p4530_p11 }
  0x61   : > { %p4533_p9 = pnand %p4532_p5, %p4526_p6 }
  0x63   : > { %4536 = shalt.err (!%p4533_p9)
}
  0x64   : > { %s4537_s16 = scalar_lea.vmem %s4862_s0, 512  ;;  %s4650_s21 = smov [#allocation11]  }
  0x65   : > { %p4538_p1 = scmp.ne.s32.totalorder %s4862_s0, %s4537_s16  ;;  %s4542_s25 = sshll.u32 %s4650_s21, 4  ;;  %s4543_s25 = int_to_ptr.vmem [resolvable:$false] %s4542_s25 }
  0x66   : > { %s4544_s2 = scalar_lea.vmem %s4543_s25, 1024  ;;  %p4545_p4 = scmp.lt.s32.totalorder %s4862_s0, %s4543_s25 }
  0x67   : > { %p4540_p2 = pnand %p4538_p1, %p4494_p3  ;;  %p4546_p8 = scmp.lt.s32.totalorder %s4544_s2, %s4537_s16 }
  0x69   : > { %p4541_p7 = pneg %p4540_p2  ;;  %p4547_p12 = por %p4546_p8, %p4545_p4 }
  0x6b   : > { %p4548_p11 = pnand %p4547_p12, %p4541_p7 }
  0x6d   : > { %4551 = shalt.err (!%p4548_p11)
}
  0x6e   : > { %4138 = dma.hbm_to_vmem [thread:$0]  (!%p4819_p13), %s4859_s13, 512, %s4862_s0, %s4865_s22, %s4648_s23, %s4648_s23, %s4649_s24  }
  0x6f   : > { %p6434_p3 = scmp.ne.s32.totalorder %s6423_s12, 0 }
  0x71   : > { %326 = sbr.rel (%p6434_p3) target bundleno = 1522 (0x5f2), region = 48 }
  0x78   : > { %s4897_s28 = sand.u32 1, %s4626_s27   ;;  %p6435_p6 = scmp.ne.s32.totalorder %s6421_s10, 0 }
  0x79   : > { %s4900_s9 = sshll.u32 %s4897_s28, 5  ;;  %s329_s20 = scalar_lea.sflag [#allocation9], %s4897_s28 }
  0x7a   : > { %s4904_s17 = scalar_lea.vmem [#allocation8], %s4900_s9 }
  0x7b   : > { %4605 = dma.done.wait (%p6435_p6), %s329_s20, 512  }
  0x7c   : > { %4607 = vsyncadd (%p6435_p6), %s329_s20, 4294966784  ;;  %s337_s0 = sand.u32 1, %s4732_s6   ;;  %s341_s22 = scalar_lea.vmem [#allocation11], %s4900_s9 }
  0x7d   : > { %s338_s12 = scalar_lea.sflag [#allocation12], %s337_s0 }
  0x7e   : > { %4609 = dma.done.wait (%p6435_p6), %s338_s12, 512  }
  0x7f   : > { %4611 = vsyncadd (%p6435_p6), %s338_s12, 4294966784  ;;  %p6436_p13 = scmp.eq.s32.totalorder %s4732_s6, 0 }
  0x81   : > { %4613 = dma.done.wait (%p6436_p13), [#allocation12], 256   ;;  %p6437_p0 = pmov %p6436_p13 }
  0x82   : > { %v485_v0 = vld [vmem:[%s4904_s17] sm:$0xff]  ;;  %v486_v1 = vld [vmem:[%s4904_s17 + $0x8] sm:$0xff]  ;;  %v487_v4 = vld [vmem:[%s4904_s17 + $0x10] sm:$0xff]  ;;  %vm562_vm0 = vcmask 130048   ;;  %v4651_v45 = vmov 0.0   ;;  %vm388_vm1 = vcmask 7168  }
  0x83   : > { %4615 = vsyncadd (%p6437_p0), [#allocation12], 4294967040  ;;  %489 = vxpose.xlu0.b32.start [1/2] (short) %v485_v0, 128  ;;  %521 = vxpose.xlu1.b32.start [1/2] (short) %v486_v1, 128  ;;  %v553_v2 = vld [vmem:[#allocation13] sm:$0xff]  ;;  %v554_v3 = vld [vmem:[#allocation13 + $0x8] sm:$0xff]  ;;  %421 = vst.msk [vmem:[#allocation4] sm:$0xff] %vm388_vm1, %v4651_v45  ;;  %s3601_s16 = sld [smem:[#allocation7]] }
  0x84   : > { %v488_v5 = vld [vmem:[%s4904_s17 + $0x18] sm:$0xff]  ;;  %v4058_v6 = vpack.c.bf16 %v554_v3, %v553_v2  ;;  %v917_v7 = vld [vmem:[%s341_s22 + $0x8] sm:$0xff]  ;;  %v916_v9 = vld [vmem:[%s341_s22] sm:$0xff]  ;;  %422 = vst.msk [vmem:[#allocation4 + $0x8] sm:$0xff] %vm388_vm1, %v4651_v45  ;;  %s380_s21 = scalar_lea.vmem [#allocation14], %s4900_s9  ;;  %s3885_s2 = sshll.u32 %s4634_s29, 9 }
  0x85   : > { %v919_v8 = vld [vmem:[%s341_s22 + $0x18] sm:$0xff]  ;;  %v918_v11 = vld [vmem:[%s341_s22 + $0x10] sm:$0xff]  ;;  %v4960_v46 = vld [vmem:[%s6359_s3] ss:$0 sm:$0xff]  ;;  %423 = vst.msk [vmem:[#allocation4 + $0x10] sm:$0xff] %vm388_vm1, %v4651_v45  ;;  %s3635_s25 = sshll.u32 %s380_s21, 4  ;;  %s6307_s0 = scalar_lea.hbm %s6363_s7, %s3885_s2  ;;  %s6302_s25 = int_to_ptr.vmem [resolvable:$true] %s3635_s25 }
  0x86   : > { %4059 = vmatprep.subr.bf16.mxu0 %v4058_v6  ;;  %v4066_v10 = vpack.c.bf16 %v919_v8, %v917_v7  ;;  %v4068_v14 = vpack.c.bf16 %v918_v11, %v916_v9  ;;  %424 = vst.msk [vmem:[#allocation4 + $0x18] sm:$0xff] %vm388_vm1, %v4651_v45  ;;  %425 = vst.msk [vmem:[#allocation4 + $0x20] sm:$0xff] %vm388_vm1, %v4651_v45  ;;  %s3620_s12 = scalar_lea.sflag [#allocation10], %s4897_s28  ;;  %s4552_s22 = scalar_lea.vmem %s6302_s25, 512 }
  0x87   : > { %490 = vxpose.xlu0.b32.end [2/2] (short) %v487_v4, 128  ;;  %522 = vxpose.xlu1.b32.end [2/2] (short) %v488_v5, 128  ;;  %426 = vst.msk [vmem:[#allocation4 + $0x28] sm:$0xff] %vm388_vm1, %v4651_v45  ;;  %427 = vst.msk [vmem:[#allocation4 + $0x30] sm:$0xff] %vm388_vm1, %v4651_v45  ;;  %p4553_p5 = scmp.ne.s32.totalorder %s6302_s25, %s4552_s22  ;;  %s4655_s29 = smov [#allocation14]  }
  0x88   : > { %4061 = vmatpush3.bf16.msra.mxu0 %v4058_v6  ;;  %428 = vst.msk [vmem:[#allocation4 + $0x38] sm:$0xff] %vm388_vm1, %v4651_v45  ;;  %429 = vst.msk [vmem:[#allocation4 + $0x40] sm:$0xff] %vm388_vm1, %v4651_v45 }
  0x89   : > { %4067 = vmatprep.subr.bf16.mxu0 %v4066_v10  ;;  %430 = vst.msk [vmem:[#allocation4 + $0x48] sm:$0xff] %vm388_vm1, %v4651_v45  ;;  %431 = vst.msk [vmem:[#allocation4 + $0x50] sm:$0xff] %vm388_vm1, %v4651_v45  ;;  %p4554_p9 = pnand %p4553_p5, %p4793_p10 }
  0x8a   : > { %432 = vst.msk [vmem:[#allocation4 + $0x58] sm:$0xff] %vm388_vm1, %v4651_v45  ;;  %433 = vst.msk [vmem:[#allocation4 + $0x60] sm:$0xff] %vm388_vm1, %v4651_v45 }
  0x8b   : > { %434 = vst.msk [vmem:[#allocation4 + $0x68] sm:$0xff] %vm388_vm1, %v4651_v45  ;;  %435 = vst.msk [vmem:[#allocation4 + $0x70] sm:$0xff] %vm388_vm1, %v4651_v45  ;;  %p4555_p1 = pneg %p4554_p9 }
  0x8c   : > { %436 = vst.msk [vmem:[#allocation4 + $0x78] sm:$0xff] %vm388_vm1, %v4651_v45  ;;  %437 = vst.msk [vmem:[#allocation4 + $0x80] sm:$0xff] %vm388_vm1, %v4651_v45 }
  0x8d   : > { %438 = vst.msk [vmem:[#allocation4 + $0x88] sm:$0xff] %vm388_vm1, %v4651_v45  ;;  %439 = vst.msk [vmem:[#allocation4 + $0x90] sm:$0xff] %vm388_vm1, %v4651_v45 }
  0x8e   : > { %440 = vst.msk [vmem:[#allocation4 + $0x98] sm:$0xff] %vm388_vm1, %v4651_v45  ;;  %441 = vst.msk [vmem:[#allocation4 + $0xa0] sm:$0xff] %vm388_vm1, %v4651_v45 }
  0x8f   : > { %442 = vst.msk [vmem:[#allocation4 + $0xa8] sm:$0xff] %vm388_vm1, %v4651_v45  ;;  %443 = vst.msk [vmem:[#allocation4 + $0xb0] sm:$0xff] %vm388_vm1, %v4651_v45 }
  0x90   : > { %444 = vst.msk [vmem:[#allocation4 + $0xb8] sm:$0xff] %vm388_vm1, %v4651_v45  ;;  %445 = vst.msk [vmem:[#allocation4 + $0xc0] sm:$0xff] %vm388_vm1, %v4651_v45 }
  0x91   : > { %446 = vst.msk [vmem:[#allocation4 + $0xc8] sm:$0xff] %vm388_vm1, %v4651_v45  ;;  %447 = vst.msk [vmem:[#allocation4 + $0xd0] sm:$0xff] %vm388_vm1, %v4651_v45 }
  0x92   : > { %448 = vst.msk [vmem:[#allocation4 + $0xd8] sm:$0xff] %vm388_vm1, %v4651_v45  ;;  %449 = vst.msk [vmem:[#allocation4 + $0xe0] sm:$0xff] %vm388_vm1, %v4651_v45 }
  0x93   : > { %450 = vst.msk [vmem:[#allocation4 + $0xe8] sm:$0xff] %vm388_vm1, %v4651_v45  ;;  %451 = vst.msk [vmem:[#allocation4 + $0xf0] sm:$0xff] %vm388_vm1, %v4651_v45 }
  0x94   : > { %452 = vst.msk [vmem:[#allocation4 + $0xf8] sm:$0xff] %vm388_vm1, %v4651_v45 }
  0xc0   : > { %925 = vxpose.xlu0.b32.start [1/2] (short) %v916_v9, 128  ;;  %957 = vxpose.xlu1.b32.start [1/2] (short) %v917_v7, 128 }
  0xc4   : > { %926 = vxpose.xlu0.b32.end [2/2] (short) %v918_v11, 128  ;;  %958 = vxpose.xlu1.b32.end [2/2] (short) %v919_v8, 128 }
 0x103   : > { %v505_v12 = vpop.trf.xlu0  ;;  %v537_v13 = vpop.trf.xlu1 }
 0x104   : > { %3958 = vmatprep.mubr.msk.f32.mxu0 %vm562_vm0, %v505_v12 }
 0x107   : > { %v506_v15 = vpop.trf.xlu0  ;;  %v538_v16 = vpop.trf.xlu1 }
 0x108   : > { %3959 = vmatmul.mubr.msk.f32.vlgmr.msra.gmra.mrb[0].mxu0 %vm562_vm0, %v506_v15 }
 0x109   : > { %4069 = vmatpush1.bf16.msra.mxu0 %v4068_v14 }
 0x10b   : > { %v507_v17 = vpop.trf.xlu0  ;;  %v539_v19 = vpop.trf.xlu1 }
 0x10c   : > { %3961 = vmatprep.mubr.msk.f32.mxu0 %vm562_vm0, %v507_v17 }
 0x10f   : > { %v508_v18 = vpop.trf.xlu0  ;;  %v540_v21 = vpop.trf.xlu1 }
 0x110   : > { %3962 = vmatmul.mubr.msk.f32.gmra.mrb[2].mxu0 %vm562_vm0, %v508_v18 }
 0x113   : > { %v509_v20 = vpop.trf.xlu0  ;;  %v541_v24 = vpop.trf.xlu1 }
 0x114   : > { %3964 = vmatprep.mubr.msk.f32.mxu0 %vm562_vm0, %v509_v20 }
 0x117   : > { %v510_v22 = vpop.trf.xlu0  ;;  %v542_v26 = vpop.trf.xlu1 }
 0x118   : > { %3965 = vmatmul.mubr.msk.f32.gmra.mrb[4].mxu0 %vm562_vm0, %v510_v22 }
 0x11b   : > { %v511_v23 = vpop.trf.xlu0  ;;  %v543_v29 = vpop.trf.xlu1 }
 0x11c   : > { %3967 = vmatprep.mubr.msk.f32.mxu0 %vm562_vm0, %v511_v23 }
 0x11f   : > { %v512_v25 = vpop.trf.xlu0  ;;  %v544_v31 = vpop.trf.xlu1 }
 0x120   : > { %3968 = vmatmul.mubr.msk.f32.gmra.mrb[6].mxu0 %vm562_vm0, %v512_v25 }
 0x123   : > { %v513_v27 = vpop.trf.xlu0  ;;  %v545_v34 = vpop.trf.xlu1 }
 0x124   : > { %3970 = vmatprep.mubr.msk.f32.mxu0 %vm562_vm0, %v513_v27 }
 0x127   : > { %v514_v28 = vpop.trf.xlu0  ;;  %v546_v36 = vpop.trf.xlu1 }
 0x128   : > { %3971 = vmatmul.mubr.msk.f32.gmra.mrb[8].mxu0 %vm562_vm0, %v514_v28 }
 0x12b   : > { %v515_v30 = vpop.trf.xlu0  ;;  %v547_v39 = vpop.trf.xlu1 }
 0x12c   : > { %3973 = vmatprep.mubr.msk.f32.mxu0 %vm562_vm0, %v515_v30 }
 0x12f   : > { %v516_v32 = vpop.trf.xlu0  ;;  %v548_v40 = vpop.trf.xlu1 }
 0x130   : > { %3974 = vmatmul.mubr.msk.f32.gmra.mrb[10].mxu0 %vm562_vm0, %v516_v32 }
 0x133   : > { %v517_v33 = vpop.trf.xlu0  ;;  %v549_v41 = vpop.trf.xlu1 }
 0x134   : > { %3976 = vmatprep.mubr.msk.f32.mxu0 %vm562_vm0, %v517_v33 }
 0x137   : > { %v518_v35 = vpop.trf.xlu0  ;;  %v550_v42 = vpop.trf.xlu1 }
 0x138   : > { %3977 = vmatmul.mubr.msk.f32.gmra.mrb[12].mxu0 %vm562_vm0, %v518_v35 }
 0x13b   : > { %v519_v37 = vpop.trf.xlu0  ;;  %v551_v43 = vpop.trf.xlu1 }
 0x13c   : > { %3979 = vmatprep.mubr.msk.f32.mxu0 %vm562_vm0, %v519_v37 }
 0x13f   : > { %v520_v38 = vpop.trf.xlu0  ;;  %v552_v44 = vpop.trf.xlu1 }
 0x140   : > { %3980 = vmatmul.mubr.msk.f32.gmra.mrb[14].mxu0 %vm562_vm0, %v520_v38 }
 0x141   : > { %3982 = vmatprep.mubr.msk.f32.mxu0 %vm562_vm0, %v537_v13 }
 0x143   : > { %v941_v52 = vpop.trf.xlu0 }
 0x144   : > { %3983 = vmatmul.mubr.msk.f32.gmra.mrb[16].mxu0 %vm562_vm0, %v538_v16  ;;  %4010 = vmatprep.mubr.msk.f32.mxu1 %vm562_vm0, %v941_v52 }
 0x145   : > { %3985 = vmatprep.mubr.msk.f32.mxu0 %vm562_vm0, %v539_v19 }
 0x147   : > { %v5029_v38 = vpop.trf.xlu0 }
 0x148   : > { %3986 = vmatmul.mubr.msk.f32.gmra.mrb[18].mxu0 %vm562_vm0, %v540_v21 }
 0x149   : > { %3988 = vmatprep.mubr.msk.f32.mxu0 %vm562_vm0, %v541_v24 }
 0x14c   : > { %3989 = vmatmul.mubr.msk.f32.gmra.mrb[20].mxu0 %vm562_vm0, %v542_v26 }
 0x14d   : > { %3991 = vmatprep.mubr.msk.f32.mxu0 %vm562_vm0, %v543_v29 }
 0x150   : > { %3992 = vmatmul.mubr.msk.f32.gmra.mrb[22].mxu0 %vm562_vm0, %v544_v31 }
 0x151   : > { %3994 = vmatprep.mubr.msk.f32.mxu0 %vm562_vm0, %v545_v34 }
 0x154   : > { %3995 = vmatmul.mubr.msk.f32.gmra.mrb[24].mxu0 %vm562_vm0, %v546_v36 }
 0x155   : > { %3997 = vmatprep.mubr.msk.f32.mxu0 %vm562_vm0, %v547_v39 }
 0x158   : > { %3998 = vmatmul.mubr.msk.f32.gmra.mrb[26].mxu0 %vm562_vm0, %v548_v40 }
 0x159   : > { %4000 = vmatprep.mubr.msk.f32.mxu0 %vm562_vm0, %v549_v41 }
 0x15c   : > { %4001 = vmatmul.mubr.msk.f32.gmra.mrb[28].mxu0 %vm562_vm0, %v550_v42 }
 0x15d   : > { %4003 = vmatprep.mubr.msk.f32.mxu0 %vm562_vm0, %v551_v43 }
 0x160   : > { %4004 = vmatmul.mubr.msk.f32.gmra.mrb[30].mxu0 %vm562_vm0, %v552_v44 }
 0x161   : > { %1579 = vmatprep.mubr.f32.mxu0 %v4651_v45 }
 0x1db   : > { %v3960_v47 = vpop.f32.mrb[0].mxu0 }
 0x1dc   : > { %v731_v48 = vadd.f32 %v3960_v47, %v4960_v46  ;;  %v725_v49 = vpop.f32.mrb[1].mxu0 }
 0x1dd   : > { %v726_v50 = vadd.f32 %v4960_v46, %v725_v49 }
 0x1de   : > { %885 = vst.msk [vmem:[#allocation2 + $0x8] sm:$0xff] %vm562_vm0, %v731_v48  ;;  %v5040_v48 = vpop.trf.xlu0 }
 0x1df   : > { %884 = vst.msk [vmem:[#allocation2] sm:$0xff] %vm562_vm0, %v726_v50 }
 0x1e3   : > { %v3963_v51 = vpop.f32.mrb[2].mxu0 }
 0x1e4   : > { %v741_v53 = vadd.f32 %v3963_v51, %v4960_v46  ;;  %v735_v54 = vpop.f32.mrb[3].mxu0 }
 0x1e5   : > { %v736_v55 = vadd.f32 %v4960_v46, %v735_v54  ;;  %v1387_v57 = vld [vmem:[#allocation2 + $0x8] sm:$0xff] }
 0x1e6   : > { %887 = vst.msk [vmem:[#allocation2 + $0x18] sm:$0xff] %vm562_vm0, %v741_v53  ;;  %v1386_v56 = vld [vmem:[#allocation2] sm:$0xff] }
 0x1e7   : > { %886 = vst.msk [vmem:[#allocation2 + $0x10] sm:$0xff] %vm562_vm0, %v736_v55  ;;  %3846 = vmatmul.mubr.msk.f32.vlgmr.msra.gmra.mrb[32].mxu0 %vm562_vm0, %v1386_v56 }
 0x1e8   : > { %1585 = vmatprep.mubr.f32.mxu0 %v4651_v45 }
 0x1eb   : > { %v3966_v58 = vpop.f32.mrb[4].mxu0  ;;  %3847 = vmatmul.mubr.msk.f32.gmra.mrb[34].mxu0 %vm562_vm0, %v1387_v57  ;;  %v944_v57 = vpop.trf.xlu0 }
 0x1ec   : > { %v751_v59 = vadd.f32 %v3966_v58, %v4960_v46  ;;  %v745_v60 = vpop.f32.mrb[5].mxu0  ;;  %1591 = vmatprep.mubr.f32.mxu0 %v4651_v45 }
 0x1ed   : > { %v746_v61 = vadd.f32 %v4960_v46, %v745_v60  ;;  %v1389_v63 = vld [vmem:[#allocation2 + $0x18] sm:$0xff] }
 0x1ee   : > { %889 = vst.msk [vmem:[#allocation2 + $0x28] sm:$0xff] %vm562_vm0, %v751_v59  ;;  %v1388_v62 = vld [vmem:[#allocation2 + $0x10] sm:$0xff] }
 0x1ef   : > { %888 = vst.msk [vmem:[#allocation2 + $0x20] sm:$0xff] %vm562_vm0, %v746_v61  ;;  %3848 = vmatmul.mubr.msk.f32.gmra.mrb[36].mxu0 %vm562_vm0, %v1388_v62 }
 0x1f0   : > { %1597 = vmatprep.mubr.f32.mxu0 %v4651_v45 }
 0x1f3   : > { %v3969_v0 = vpop.f32.mrb[6].mxu0  ;;  %3849 = vmatmul.mubr.msk.f32.gmra.mrb[38].mxu0 %vm562_vm0, %v1389_v63 }
 0x1f4   : > { %v761_v1 = vadd.f32 %v3969_v0, %v4960_v46  ;;  %v755_v2 = vpop.f32.mrb[7].mxu0  ;;  %1603 = vmatprep.mubr.f32.mxu0 %v4651_v45 }
 0x1f5   : > { %v756_v3 = vadd.f32 %v4960_v46, %v755_v2  ;;  %v1391_v5 = vld [vmem:[#allocation2 + $0x28] sm:$0xff] }
 0x1f6   : > { %891 = vst.msk [vmem:[#allocation2 + $0x38] sm:$0xff] %vm562_vm0, %v761_v1  ;;  %v1390_v4 = vld [vmem:[#allocation2 + $0x20] sm:$0xff]  ;;  %v945_v1 = vpop.trf.xlu0 }
 0x1f7   : > { %890 = vst.msk [vmem:[#allocation2 + $0x30] sm:$0xff] %vm562_vm0, %v756_v3  ;;  %3850 = vmatmul.mubr.msk.f32.gmra.mrb[40].mxu0 %vm562_vm0, %v1390_v4 }
 0x1f8   : > { %1609 = vmatprep.mubr.f32.mxu0 %v4651_v45 }
 0x1fb   : > { %v3972_v6 = vpop.f32.mrb[8].mxu0  ;;  %3851 = vmatmul.mubr.msk.f32.gmra.mrb[42].mxu0 %vm562_vm0, %v1391_v5 }
 0x1fc   : > { %v771_v7 = vadd.f32 %v3972_v6, %v4960_v46  ;;  %v765_v8 = vpop.f32.mrb[9].mxu0  ;;  %1615 = vmatprep.mubr.f32.mxu0 %v4651_v45 }
 0x1fd   : > { %v766_v9 = vadd.f32 %v4960_v46, %v765_v8  ;;  %v1393_v11 = vld [vmem:[#allocation2 + $0x38] sm:$0xff] }
 0x1fe   : > { %893 = vst.msk [vmem:[#allocation2 + $0x48] sm:$0xff] %vm562_vm0, %v771_v7  ;;  %v1392_v10 = vld [vmem:[#allocation2 + $0x30] sm:$0xff] }
 0x1ff   : > { %892 = vst.msk [vmem:[#allocation2 + $0x40] sm:$0xff] %vm562_vm0, %v766_v9  ;;  %3852 = vmatmul.mubr.msk.f32.gmra.mrb[44].mxu0 %vm562_vm0, %v1392_v10 }
 0x200   : > { %1621 = vmatprep.mubr.f32.mxu0 %v4651_v45 }
 0x203   : > { %v3975_v12 = vpop.f32.mrb[10].mxu0  ;;  %3853 = vmatmul.mubr.msk.f32.gmra.mrb[46].mxu0 %vm562_vm0, %v1393_v11  ;;  %v946_v11 = vpop.trf.xlu0 }
 0x204   : > { %v781_v13 = vadd.f32 %v3975_v12, %v4960_v46  ;;  %v775_v14 = vpop.f32.mrb[11].mxu0  ;;  %1627 = vmatprep.mubr.f32.mxu0 %v4651_v45 }
 0x205   : > { %v776_v15 = vadd.f32 %v4960_v46, %v775_v14  ;;  %v1395_v17 = vld [vmem:[#allocation2 + $0x48] sm:$0xff] }
 0x206   : > { %895 = vst.msk [vmem:[#allocation2 + $0x58] sm:$0xff] %vm562_vm0, %v781_v13  ;;  %v1394_v16 = vld [vmem:[#allocation2 + $0x40] sm:$0xff] }
 0x207   : > { %894 = vst.msk [vmem:[#allocation2 + $0x50] sm:$0xff] %vm562_vm0, %v776_v15  ;;  %3854 = vmatmul.mubr.msk.f32.gmra.mrb[48].mxu0 %vm562_vm0, %v1394_v16  ;;  %v947_v13 = vpop.trf.xlu0  ;;  %v990_v16 = vld [vmem:[%s6360_s4 + $0x8] sm:$0xff] }
 0x208   : > { %1633 = vmatprep.mubr.f32.mxu0 %v4651_v45 }
 0x20b   : > { %v3978_v18 = vpop.f32.mrb[12].mxu0  ;;  %3855 = vmatmul.mubr.msk.f32.gmra.mrb[50].mxu0 %vm562_vm0, %v1395_v17  ;;  %v948_v15 = vpop.trf.xlu0 }
 0x20c   : > { %v791_v19 = vadd.f32 %v3978_v18, %v4960_v46  ;;  %v785_v20 = vpop.f32.mrb[13].mxu0  ;;  %1639 = vmatprep.mubr.f32.mxu0 %v4651_v45 }
 0x20d   : > { %v786_v21 = vadd.f32 %v4960_v46, %v785_v20  ;;  %v1397_v23 = vld [vmem:[#allocation2 + $0x58] sm:$0xff] }
 0x20e   : > { %897 = vst.msk [vmem:[#allocation2 + $0x68] sm:$0xff] %vm562_vm0, %v791_v19  ;;  %v1396_v22 = vld [vmem:[#allocation2 + $0x50] sm:$0xff]  ;;  %v973_v19 = vpop.trf.xlu1 }
 0x20f   : > { %896 = vst.msk [vmem:[#allocation2 + $0x60] sm:$0xff] %vm562_vm0, %v786_v21  ;;  %3856 = vmatmul.mubr.msk.f32.gmra.mrb[52].mxu0 %vm562_vm0, %v1396_v22  ;;  %v949_v20 = vpop.trf.xlu0 }
 0x210   : > { %1645 = vmatprep.mubr.f32.mxu0 %v4651_v45 }
 0x212   : > { %v974_v22 = vpop.trf.xlu1 }
 0x213   : > { %v3981_v24 = vpop.f32.mrb[14].mxu0  ;;  %3857 = vmatmul.mubr.msk.f32.gmra.mrb[54].mxu0 %vm562_vm0, %v1397_v23  ;;  %v950_v23 = vpop.trf.xlu0 }
 0x214   : > { %v801_v25 = vadd.f32 %v3981_v24, %v4960_v46  ;;  %v795_v26 = vpop.f32.mrb[15].mxu0  ;;  %1651 = vmatprep.mubr.f32.mxu0 %v4651_v45 }
 0x215   : > { %v796_v27 = vadd.f32 %v4960_v46, %v795_v26  ;;  %v1399_v33 = vld [vmem:[#allocation2 + $0x68] sm:$0xff] }
 0x216   : > { %899 = vst.msk [vmem:[#allocation2 + $0x78] sm:$0xff] %vm562_vm0, %v801_v25  ;;  %v1398_v28 = vld [vmem:[#allocation2 + $0x60] sm:$0xff]  ;;  %v975_v25 = vpop.trf.xlu1 }
 0x217   : > { %898 = vst.msk [vmem:[#allocation2 + $0x70] sm:$0xff] %vm562_vm0, %v796_v27  ;;  %3858 = vmatmul.mubr.msk.f32.gmra.mrb[56].mxu0 %vm562_vm0, %v1398_v28  ;;  %v3984_v29 = vpop.f32.mrb[16].mxu0  ;;  %v951_v26 = vpop.trf.xlu0 }
 0x218   : > { %v811_v30 = vadd.f32 %v3984_v29, %v4960_v46  ;;  %1657 = vmatprep.mubr.f32.mxu0 %v4651_v45  ;;  %v805_v31 = vpop.f32.mrb[17].mxu0 }
 0x219   : > { %v806_v32 = vadd.f32 %v4960_v46, %v805_v31 }
 0x21a   : > { %901 = vst.msk [vmem:[#allocation2 + $0x88] sm:$0xff] %vm562_vm0, %v811_v30  ;;  %v976_v28 = vpop.trf.xlu1 }
 0x21b   : > { %900 = vst.msk [vmem:[#allocation2 + $0x80] sm:$0xff] %vm562_vm0, %v806_v32  ;;  %3859 = vmatmul.mubr.msk.f32.gmra.mrb[58].mxu0 %vm562_vm0, %v1399_v33  ;;  %v3987_v34 = vpop.f32.mrb[18].mxu0  ;;  %v952_v29 = vpop.trf.xlu0 }
 0x21c   : > { %1663 = vmatprep.mubr.f32.mxu0 %v4651_v45  ;;  %v821_v35 = vadd.f32 %v3987_v34, %v4960_v46  ;;  %v815_v36 = vpop.f32.mrb[19].mxu0 }
 0x21d   : > { %v816_v37 = vadd.f32 %v4960_v46, %v815_v36  ;;  %v1401_v44 = vld [vmem:[#allocation2 + $0x78] sm:$0xff] }
 0x21e   : > { %v1400_v39 = vld [vmem:[#allocation2 + $0x70] sm:$0xff]  ;;  %903 = vst.msk [vmem:[#allocation2 + $0x98] sm:$0xff] %vm562_vm0, %v821_v35  ;;  %v977_v31 = vpop.trf.xlu1 }
 0x21f   : > { %3860 = vmatmul.mubr.msk.f32.gmra.mrb[60].mxu0 %vm562_vm0, %v1400_v39  ;;  %902 = vst.msk [vmem:[#allocation2 + $0x90] sm:$0xff] %vm562_vm0, %v816_v37  ;;  %v3990_v40 = vpop.f32.mrb[20].mxu0  ;;  %v953_v32 = vpop.trf.xlu0 }
 0x220   : > { %1669 = vmatprep.mubr.f32.mxu0 %v4651_v45  ;;  %v831_v41 = vadd.f32 %v3990_v40, %v4960_v46  ;;  %v825_v42 = vpop.f32.mrb[21].mxu0 }
 0x221   : > { %v826_v43 = vadd.f32 %v4960_v46, %v825_v42  ;;  %v1403_v58 = vld [vmem:[#allocation2 + $0x88] sm:$0xff] }
 0x222   : > { %905 = vst.msk [vmem:[#allocation2 + $0xa8] sm:$0xff] %vm562_vm0, %v831_v41  ;;  %v1402_v49 = vld [vmem:[#allocation2 + $0x80] sm:$0xff]  ;;  %v978_v34 = vpop.trf.xlu1 }
 0x223   : > { %3861 = vmatmul.mubr.msk.f32.gmra.mrb[62].mxu0 %vm562_vm0, %v1401_v44  ;;  %904 = vst.msk [vmem:[#allocation2 + $0xa0] sm:$0xff] %vm562_vm0, %v826_v43  ;;  %v3993_v47 = vpop.f32.mrb[22].mxu0  ;;  %v954_v35 = vpop.trf.xlu0 }
 0x224   : > { %1675 = vmatprep.mubr.f32.mxu0 %v4651_v45  ;;  %v841_v50 = vadd.f32 %v3993_v47, %v4960_v46  ;;  %v835_v51 = vpop.f32.mrb[23].mxu0 }
 0x225   : > { %v836_v52 = vadd.f32 %v4960_v46, %v835_v51  ;;  %v1405_v2 = vld [vmem:[#allocation2 + $0x98] sm:$0xff] }
 0x226   : > { %907 = vst.msk [vmem:[#allocation2 + $0xb8] sm:$0xff] %vm562_vm0, %v841_v50  ;;  %v1404_v60 = vld [vmem:[#allocation2 + $0x90] sm:$0xff]  ;;  %v979_v37 = vpop.trf.xlu1 }
 0x227   : > { %3862 = vmatmul.mubr.msk.f32.gmra.mrb[64].mxu0 %vm562_vm0, %v1402_v49  ;;  %906 = vst.msk [vmem:[#allocation2 + $0xb0] sm:$0xff] %vm562_vm0, %v836_v52  ;;  %v3996_v53 = vpop.f32.mrb[24].mxu0 }
 0x228   : > { %1681 = vmatprep.mubr.f32.mxu0 %v4651_v45  ;;  %v851_v54 = vadd.f32 %v3996_v53, %v4960_v46  ;;  %v845_v55 = vpop.f32.mrb[25].mxu0 }
 0x229   : > { %v846_v56 = vadd.f32 %v4960_v46, %v845_v55  ;;  %v1407_v12 = vld [vmem:[#allocation2 + $0xa8] sm:$0xff]  ;;  %v4652_v55 = vmov -inf  }
 0x22a   : > { %909 = vst.msk [vmem:[#allocation2 + $0xc8] sm:$0xff] %vm562_vm0, %v851_v54  ;;  %v1406_v7 = vld [vmem:[#allocation2 + $0xa0] sm:$0xff]  ;;  %v980_v40 = vpop.trf.xlu1 }
 0x22b   : > { %3863 = vmatmul.mubr.msk.f32.gmra.mrb[66].mxu0 %vm562_vm0, %v1403_v58  ;;  %908 = vst.msk [vmem:[#allocation2 + $0xc0] sm:$0xff] %vm562_vm0, %v846_v56  ;;  %v3999_v59 = vpop.f32.mrb[26].mxu0 }
 0x22c   : > { %1687 = vmatprep.mubr.f32.mxu0 %v4651_v45  ;;  %v861_v61 = vadd.f32 %v3999_v59, %v4960_v46  ;;  %v855_v62 = vpop.f32.mrb[27].mxu0  ;;  %389 = vst.msk [vmem:[#allocation3] sm:$0xff] %vm388_vm1, %v4652_v55  ;;  %390 = vst.msk [vmem:[#allocation3 + $0x8] sm:$0xff] %vm388_vm1, %v4652_v55 }
 0x22d   : > { %v856_v63 = vadd.f32 %v4960_v46, %v855_v62  ;;  %v1409_v17 = vld [vmem:[#allocation2 + $0xb8] sm:$0xff]  ;;  %391 = vst.msk [vmem:[#allocation3 + $0x10] sm:$0xff] %vm388_vm1, %v4652_v55  ;;  %392 = vst.msk [vmem:[#allocation3 + $0x18] sm:$0xff] %vm388_vm1, %v4652_v55 }
 0x22e   : > { %911 = vst.msk [vmem:[#allocation2 + $0xd8] sm:$0xff] %vm562_vm0, %v861_v61  ;;  %v1408_v14 = vld [vmem:[#allocation2 + $0xb0] sm:$0xff]  ;;  %v981_v43 = vpop.trf.xlu1 }
 0x22f   : > { %3864 = vmatmul.mubr.msk.f32.gmra.mrb[68].mxu0 %vm562_vm0, %v1404_v60  ;;  %910 = vst.msk [vmem:[#allocation2 + $0xd0] sm:$0xff] %vm562_vm0, %v856_v63  ;;  %v4002_v0 = vpop.f32.mrb[28].mxu0 }
 0x230   : > { %1693 = vmatprep.mubr.f32.mxu0 %v4651_v45  ;;  %v871_v3 = vadd.f32 %v4002_v0, %v4960_v46  ;;  %v865_v4 = vpop.f32.mrb[29].mxu0  ;;  %393 = vst.msk [vmem:[#allocation3 + $0x20] sm:$0xff] %vm388_vm1, %v4652_v55  ;;  %394 = vst.msk [vmem:[#allocation3 + $0x28] sm:$0xff] %vm388_vm1, %v4652_v55 }
 0x231   : > { %v866_v5 = vadd.f32 %v4960_v46, %v865_v4  ;;  %v1411_v24 = vld [vmem:[#allocation2 + $0xc8] sm:$0xff]  ;;  %395 = vst.msk [vmem:[#allocation3 + $0x30] sm:$0xff] %vm388_vm1, %v4652_v55  ;;  %396 = vst.msk [vmem:[#allocation3 + $0x38] sm:$0xff] %vm388_vm1, %v4652_v55  ;;  %v4653_v4 = vmov 0  }
 0x232   : > { %913 = vst.msk [vmem:[#allocation2 + $0xe8] sm:$0xff] %vm562_vm0, %v871_v3  ;;  %v1410_v21 = vld [vmem:[#allocation2 + $0xc0] sm:$0xff]  ;;  %v982_v44 = vpop.trf.xlu1  ;;  %4206 = vset.pattern.permute.xlu0 %v4653_v4  ;;  %4207 = vset.pattern.permute.xlu1 %v4653_v4 }
 0x233   : > { %3865 = vmatmul.mubr.msk.f32.gmra.mrb[70].mxu0 %vm562_vm0, %v1405_v2  ;;  %912 = vst.msk [vmem:[#allocation2 + $0xe0] sm:$0xff] %vm562_vm0, %v866_v5  ;;  %v4005_v6 = vpop.f32.mrb[30].mxu0 }
 0x234   : > { %1699 = vmatprep.mubr.f32.mxu0 %v4651_v45  ;;  %v881_v8 = vadd.f32 %v4005_v6, %v4960_v46  ;;  %v875_v9 = vpop.f32.mrb[31].mxu0  ;;  %397 = vst.msk [vmem:[#allocation3 + $0x40] sm:$0xff] %vm388_vm1, %v4652_v55  ;;  %398 = vst.msk [vmem:[#allocation3 + $0x48] sm:$0xff] %vm388_vm1, %v4652_v55 }
 0x235   : > { %v876_v10 = vadd.f32 %v4960_v46, %v875_v9  ;;  %v989_v46 = vld [vmem:[%s6360_s4] sm:$0xff]  ;;  %v1413_v30 = vld [vmem:[#allocation2 + $0xd8] sm:$0xff]  ;;  %399 = vst.msk [vmem:[#allocation3 + $0x50] sm:$0xff] %vm388_vm1, %v4652_v55  ;;  %400 = vst.msk [vmem:[#allocation3 + $0x58] sm:$0xff] %vm388_vm1, %v4652_v55 }
 0x236   : > { %915 = vst.msk [vmem:[#allocation2 + $0xf8] sm:$0xff] %vm562_vm0, %v881_v8  ;;  %v4062_v18 = vpack.c.bf16 %v990_v16, %v989_v46  ;;  %v1412_v27 = vld [vmem:[#allocation2 + $0xd0] sm:$0xff]  ;;  %v983_v47 = vpop.trf.xlu1 }
 0x237   : > { %3866 = vmatmul.mubr.msk.f32.gmra.mrb[72].mxu0 %vm562_vm0, %v1406_v7  ;;  %914 = vst.msk [vmem:[#allocation2 + $0xf0] sm:$0xff] %vm562_vm0, %v876_v10 }
 0x238   : > { %1705 = vmatprep.mubr.f32.mxu0 %v4651_v45  ;;  %4063 = vmatprep.subr.bf16.mxu1 %v4062_v18  ;;  %401 = vst.msk [vmem:[#allocation3 + $0x60] sm:$0xff] %vm388_vm1, %v4652_v55  ;;  %402 = vst.msk [vmem:[#allocation3 + $0x68] sm:$0xff] %vm388_vm1, %v4652_v55 }
 0x239   : > { %4065 = vmatpush3.bf16.msra.mxu1 %v4062_v18  ;;  %v1415_v36 = vld [vmem:[#allocation2 + $0xe8] sm:$0xff]  ;;  %403 = vst.msk [vmem:[#allocation3 + $0x70] sm:$0xff] %vm388_vm1, %v4652_v55  ;;  %404 = vst.msk [vmem:[#allocation3 + $0x78] sm:$0xff] %vm388_vm1, %v4652_v55 }
 0x23a   : > { %v1414_v33 = vld [vmem:[#allocation2 + $0xe0] sm:$0xff]  ;;  %405 = vst.msk [vmem:[#allocation3 + $0x80] sm:$0xff] %vm388_vm1, %v4652_v55  ;;  %406 = vst.msk [vmem:[#allocation3 + $0x88] sm:$0xff] %vm388_vm1, %v4652_v55 }
 0x23b   : > { %3867 = vmatmul.mubr.msk.f32.gmra.mrb[74].mxu0 %vm562_vm0, %v1407_v12  ;;  %407 = vst.msk [vmem:[#allocation3 + $0x90] sm:$0xff] %vm388_vm1, %v4652_v55  ;;  %408 = vst.msk [vmem:[#allocation3 + $0x98] sm:$0xff] %vm388_vm1, %v4652_v55 }
 0x23c   : > { %1711 = vmatprep.mubr.f32.mxu0 %v4651_v45  ;;  %4011 = vmatmul.mubr.msk.f32.vlgmr.msra.gmra.mrb[0].mxu1 %vm562_vm0, %v5029_v38  ;;  %v955_v38 = vpop.trf.xlu0  ;;  %409 = vst.msk [vmem:[#allocation3 + $0xa0] sm:$0xff] %vm388_vm1, %v4652_v55  ;;  %410 = vst.msk [vmem:[#allocation3 + $0xa8] sm:$0xff] %vm388_vm1, %v4652_v55 }
 0x23d   : > { %4013 = vmatprep.mubr.msk.f32.mxu1 %vm562_vm0, %v5040_v48  ;;  %v1417_v42 = vld [vmem:[#allocation2 + $0xf8] sm:$0xff]  ;;  %v984_v48 = vpop.trf.xlu1  ;;  %411 = vst.msk [vmem:[#allocation3 + $0xb0] sm:$0xff] %vm388_vm1, %v4652_v55  ;;  %412 = vst.msk [vmem:[#allocation3 + $0xb8] sm:$0xff] %vm388_vm1, %v4652_v55 }
 0x23e   : > { %v1416_v39 = vld [vmem:[#allocation2 + $0xf0] sm:$0xff]  ;;  %413 = vst.msk [vmem:[#allocation3 + $0xc0] sm:$0xff] %vm388_vm1, %v4652_v55  ;;  %414 = vst.msk [vmem:[#allocation3 + $0xc8] sm:$0xff] %vm388_vm1, %v4652_v55 }
 0x23f   : > { %3868 = vmatmul.mubr.msk.f32.gmra.mrb[76].mxu0 %vm562_vm0, %v1408_v14  ;;  %415 = vst.msk [vmem:[#allocation3 + $0xd0] sm:$0xff] %vm388_vm1, %v4652_v55  ;;  %416 = vst.msk [vmem:[#allocation3 + $0xd8] sm:$0xff] %vm388_vm1, %v4652_v55 }
 0x240   : > { %1717 = vmatprep.mubr.f32.mxu0 %v4651_v45  ;;  %4014 = vmatmul.mubr.msk.f32.gmra.mrb[2].mxu1 %vm562_vm0, %v944_v57  ;;  %v956_v41 = vpop.trf.xlu0  ;;  %417 = vst.msk [vmem:[#allocation3 + $0xe0] sm:$0xff] %vm388_vm1, %v4652_v55  ;;  %418 = vst.msk [vmem:[#allocation3 + $0xe8] sm:$0xff] %vm388_vm1, %v4652_v55 }
 0x241   : > { %4016 = vmatprep.mubr.msk.f32.mxu1 %vm562_vm0, %v945_v1  ;;  %v985_v49 = vpop.trf.xlu1  ;;  %419 = vst.msk [vmem:[#allocation3 + $0xf0] sm:$0xff] %vm388_vm1, %v4652_v55  ;;  %420 = vst.msk [vmem:[#allocation3 + $0xf8] sm:$0xff] %vm388_vm1, %v4652_v55 }
 0x243   : > { %3869 = vmatmul.mubr.msk.f32.gmra.mrb[78].mxu0 %vm562_vm0, %v1409_v17 }
 0x244   : > { %1723 = vmatprep.mubr.f32.mxu0 %v4651_v45  ;;  %4017 = vmatmul.mubr.msk.f32.gmra.mrb[4].mxu1 %vm562_vm0, %v946_v11 }
 0x245   : > { %4019 = vmatprep.mubr.msk.f32.mxu1 %vm562_vm0, %v947_v13  ;;  %v986_v50 = vpop.trf.xlu1 }
 0x247   : > { %3870 = vmatmul.mubr.msk.f32.gmra.mrb[80].mxu0 %vm562_vm0, %v1410_v21 }
 0x248   : > { %1729 = vmatprep.mubr.f32.mxu0 %v4651_v45  ;;  %4020 = vmatmul.mubr.msk.f32.gmra.mrb[6].mxu1 %vm562_vm0, %v948_v15 }
 0x249   : > { %4022 = vmatprep.mubr.msk.f32.mxu1 %vm562_vm0, %v949_v20  ;;  %v987_v51 = vpop.trf.xlu1 }
 0x24b   : > { %3871 = vmatmul.mubr.msk.f32.gmra.mrb[82].mxu0 %vm562_vm0, %v1411_v24 }
 0x24c   : > { %1735 = vmatprep.mubr.f32.mxu0 %v4651_v45  ;;  %4023 = vmatmul.mubr.msk.f32.gmra.mrb[8].mxu1 %vm562_vm0, %v950_v23 }
 0x24d   : > { %4025 = vmatprep.mubr.msk.f32.mxu1 %vm562_vm0, %v951_v26  ;;  %v988_v52 = vpop.trf.xlu1 }
 0x24f   : > { %3872 = vmatmul.mubr.msk.f32.gmra.mrb[84].mxu0 %vm562_vm0, %v1412_v27 }
 0x250   : > { %1741 = vmatprep.mubr.f32.mxu0 %v4651_v45  ;;  %4026 = vmatmul.mubr.msk.f32.gmra.mrb[10].mxu1 %vm562_vm0, %v952_v29 }
 0x251   : > { %4028 = vmatprep.mubr.msk.f32.mxu1 %vm562_vm0, %v953_v32 }
 0x253   : > { %3873 = vmatmul.mubr.msk.f32.gmra.mrb[86].mxu0 %vm562_vm0, %v1413_v30 }
 0x254   : > { %1747 = vmatprep.mubr.f32.mxu0 %v4651_v45  ;;  %4029 = vmatmul.mubr.msk.f32.gmra.mrb[12].mxu1 %vm562_vm0, %v954_v35 }
 0x255   : > { %4031 = vmatprep.mubr.msk.f32.mxu1 %vm562_vm0, %v955_v38 }
 0x257   : > { %3874 = vmatmul.mubr.msk.f32.gmra.mrb[88].mxu0 %vm562_vm0, %v1414_v33 }
 0x258   : > { %1753 = vmatprep.mubr.f32.mxu0 %v4651_v45  ;;  %4032 = vmatmul.mubr.msk.f32.gmra.mrb[14].mxu1 %vm562_vm0, %v956_v41 }
 0x259   : > { %4034 = vmatprep.mubr.msk.f32.mxu1 %vm562_vm0, %v973_v19 }
 0x25b   : > { %3875 = vmatmul.mubr.msk.f32.gmra.mrb[90].mxu0 %vm562_vm0, %v1415_v36 }
 0x25c   : > { %1759 = vmatprep.mubr.f32.mxu0 %v4651_v45  ;;  %4035 = vmatmul.mubr.msk.f32.gmra.mrb[16].mxu1 %vm562_vm0, %v974_v22 }
 0x25d   : > { %4037 = vmatprep.mubr.msk.f32.mxu1 %vm562_vm0, %v975_v25 }
 0x25f   : > { %3876 = vmatmul.mubr.msk.f32.gmra.mrb[92].mxu0 %vm562_vm0, %v1416_v39 }
 0x260   : > { %1765 = vmatprep.mubr.f32.mxu0 %v4651_v45  ;;  %4038 = vmatmul.mubr.msk.f32.gmra.mrb[18].mxu1 %vm562_vm0, %v976_v28 }
 0x261   : > { %4040 = vmatprep.mubr.msk.f32.mxu1 %vm562_vm0, %v977_v31 }
 0x263   : > { %3877 = vmatmul.mubr.msk.f32.gmra.mrb[94].mxu0 %vm562_vm0, %v1417_v42 }
 0x264   : > { %4041 = vmatmul.mubr.msk.f32.gmra.mrb[20].mxu1 %vm562_vm0, %v978_v34 }
 0x265   : > { %4043 = vmatprep.mubr.msk.f32.mxu1 %vm562_vm0, %v979_v37 }
 0x268   : > { %4044 = vmatmul.mubr.msk.f32.gmra.mrb[22].mxu1 %vm562_vm0, %v980_v40 }
 0x269   : > { %4046 = vmatprep.mubr.msk.f32.mxu1 %vm562_vm0, %v981_v43 }
 0x26c   : > { %4047 = vmatmul.mubr.msk.f32.gmra.mrb[24].mxu1 %vm562_vm0, %v982_v44 }
 0x26d   : > { %4049 = vmatprep.mubr.msk.f32.mxu1 %vm562_vm0, %v983_v47 }
 0x270   : > { %4050 = vmatmul.mubr.msk.f32.gmra.mrb[26].mxu1 %vm562_vm0, %v984_v48 }
 0x271   : > { %4052 = vmatprep.mubr.msk.f32.mxu1 %vm562_vm0, %v985_v49 }
 0x274   : > { %4053 = vmatmul.mubr.msk.f32.gmra.mrb[28].mxu1 %vm562_vm0, %v986_v50 }
 0x275   : > { %4055 = vmatprep.mubr.msk.f32.mxu1 %vm562_vm0, %v987_v51 }
 0x278   : > { %4056 = vmatmul.mubr.msk.f32.gmra.mrb[30].mxu1 %vm562_vm0, %v988_v52 }
 0x2ba   : > { %v5133_v53 = vpop.f32.mrb[32].mxu0 }
 0x2bb   : > { %v5135_v54 = vpop.f32.mrb[33].mxu0 }
 0x2bc   : > { %v1804_v56 = vmax.f32 %v5133_v53, %v5135_v54 }
 0x2be   : > { %1805 = vmax.xlane.f32.xlu0 %v1804_v56  ;;  %v5235_v57 = vpop.f32.mrb[34].mxu0 }
 0x2bf   : > { %v5237_v58 = vpop.f32.mrb[35].mxu0 }
 0x2c0   : > { %v1807_v59 = vmax.f32 %v5235_v57, %v5237_v58 }
 0x2c2   : > { %1808 = vmax.xlane.f32.xlu1 %v1807_v59  ;;  %v5241_v60 = vpop.f32.mrb[36].mxu0 }
 0x2c3   : > { %v5243_v61 = vpop.f32.mrb[37].mxu0 }
 0x2c4   : > { %v1810_v62 = vmax.f32 %v5241_v60, %v5243_v61 }
 0x2c6   : > { %1811 = vmax.xlane.f32.xlu1 %v1810_v62  ;;  %v5247_v45 = vpop.f32.mrb[38].mxu0 }
 0x2c7   : > { %v5249_v63 = vpop.f32.mrb[39].mxu0 }
 0x2c8   : > { %v1813_v0 = vmax.f32 %v5247_v45, %v5249_v63 }
 0x2ca   : > { %1814 = vmax.xlane.f32.xlu1 %v1813_v0  ;;  %v5253_v1 = vpop.f32.mrb[40].mxu0 }
 0x2cb   : > { %v5255_v2 = vpop.f32.mrb[41].mxu0 }
 0x2cc   : > { %v1816_v3 = vmax.f32 %v5253_v1, %v5255_v2 }
 0x2ce   : > { %1817 = vmax.xlane.f32.xlu0 %v1816_v3  ;;  %v5259_v5 = vpop.f32.mrb[42].mxu0 }
 0x2cf   : > { %v5261_v6 = vpop.f32.mrb[43].mxu0 }
 0x2d0   : > { %v1819_v7 = vmax.f32 %v5259_v5, %v5261_v6 }
 0x2d2   : > { %1820 = vmax.xlane.f32.xlu1 %v1819_v7  ;;  %v5265_v8 = vpop.f32.mrb[44].mxu0 }
 0x2d3   : > { %v5267_v9 = vpop.f32.mrb[45].mxu0 }
 0x2d4   : > { %v1822_v10 = vmax.f32 %v5265_v8, %v5267_v9 }
 0x2d6   : > { %1823 = vmax.xlane.f32.xlu0 %v1822_v10  ;;  %v5271_v11 = vpop.f32.mrb[46].mxu0 }
 0x2d7   : > { %v5273_v12 = vpop.f32.mrb[47].mxu0 }
 0x2d8   : > { %v1825_v13 = vmax.f32 %v5271_v11, %v5273_v12 }
 0x2da   : > { %1826 = vmax.xlane.f32.xlu1 %v1825_v13  ;;  %v5277_v14 = vpop.f32.mrb[48].mxu0 }
 0x2db   : > { %v5279_v15 = vpop.f32.mrb[49].mxu0 }
 0x2dc   : > { %v1828_v46 = vmax.f32 %v5277_v14, %v5279_v15 }
 0x2de   : > { %1829 = vmax.xlane.f32.xlu0 %v1828_v46  ;;  %v5283_v16 = vpop.f32.mrb[50].mxu0 }
 0x2df   : > { %v5285_v17 = vpop.f32.mrb[51].mxu0 }
 0x2e0   : > { %v1831_v18 = vmax.f32 %v5283_v16, %v5285_v17 }
 0x2e2   : > { %1832 = vmax.xlane.f32.xlu1 %v1831_v18  ;;  %v5289_v19 = vpop.f32.mrb[52].mxu0 }
 0x2e3   : > { %v5291_v20 = vpop.f32.mrb[53].mxu0 }
 0x2e4   : > { %v1834_v21 = vmax.f32 %v5289_v19, %v5291_v20 }
 0x2e6   : > { %1835 = vmax.xlane.f32.xlu0 %v1834_v21  ;;  %v5295_v22 = vpop.f32.mrb[54].mxu0  ;;  %v5378_v21 = vld [vmem:[%s6361_s5] ss:$0 sm:$0xff] }
 0x2e7   : > { %v5297_v23 = vpop.f32.mrb[55].mxu0 }
 0x2e8   : > { %v1837_v24 = vmax.f32 %v5295_v22, %v5297_v23 }
 0x2ea   : > { %1838 = vmax.xlane.f32.xlu1 %v1837_v24  ;;  %v5301_v25 = vpop.f32.mrb[56].mxu0 }
 0x2eb   : > { %v5303_v26 = vpop.f32.mrb[57].mxu0 }
 0x2ec   : > { %v1840_v27 = vmax.f32 %v5301_v25, %v5303_v26 }
 0x2ee   : > { %1841 = vmax.xlane.f32.xlu0 %v1840_v27  ;;  %v5307_v28 = vpop.f32.mrb[58].mxu0 }
 0x2ef   : > { %v5309_v29 = vpop.f32.mrb[59].mxu0 }
 0x2f0   : > { %v1843_v30 = vmax.f32 %v5307_v28, %v5309_v29 }
 0x2f2   : > { %1844 = vmax.xlane.f32.xlu1 %v1843_v30  ;;  %v5313_v31 = vpop.f32.mrb[60].mxu0 }
 0x2f3   : > { %v5315_v32 = vpop.f32.mrb[61].mxu0 }
 0x2f4   : > { %v1846_v33 = vmax.f32 %v5313_v31, %v5315_v32 }
 0x2f6   : > { %1847 = vmax.xlane.f32.xlu0 %v1846_v33  ;;  %v5319_v34 = vpop.f32.mrb[62].mxu0 }
 0x2f7   : > { %6438 = vst [vmem:[#allocation22_spill] sm:$0xff] %v5319_v34  ;;  %v5321_v35 = vpop.f32.mrb[63].mxu0 }
 0x2f8   : > { %6439 = vst [vmem:[#allocation23_spill] sm:$0xff] %v5321_v35  ;;  %v1849_v36 = vmax.f32 %v5319_v34, %v5321_v35 }
 0x2fa   : > { %1850 = vmax.xlane.f32.xlu1 %v1849_v36  ;;  %v5325_v37 = vpop.f32.mrb[64].mxu0 }
 0x2fb   : > { %6440 = vst [vmem:[#allocation24_spill] sm:$0xff] %v5325_v37  ;;  %v5327_v38 = vpop.f32.mrb[65].mxu0 }
 0x2fc   : > { %6441 = vst [vmem:[#allocation25_spill] sm:$0xff] %v5327_v38  ;;  %v1852_v39 = vmax.f32 %v5325_v37, %v5327_v38  ;;  %v5577_v38 = vld [vmem:[#allocation3 + $0x68] sm:$0xff] }
 0x2fe   : > { %1853 = vmax.xlane.f32.xlu0 %v1852_v39  ;;  %v5331_v40 = vpop.f32.mrb[66].mxu0 }
 0x2ff   : > { %6442 = vst [vmem:[#allocation26_spill] sm:$0xff] %v5331_v40  ;;  %v5333_v41 = vpop.f32.mrb[67].mxu0 }
 0x300   : > { %6443 = vst [vmem:[#allocation27_spill] sm:$0xff] %v5333_v41  ;;  %v1855_v42 = vmax.f32 %v5331_v40, %v5333_v41 }
 0x302   : > { %1856 = vmax.xlane.f32.xlu1 %v1855_v42  ;;  %v5337_v43 = vpop.f32.mrb[68].mxu0 }
 0x303   : > { %6444 = vst [vmem:[#allocation28_spill] sm:$0xff] %v5337_v43  ;;  %v5339_v44 = vpop.f32.mrb[69].mxu0 }
 0x304   : > { %6445 = vst [vmem:[#allocation29_spill] sm:$0xff] %v5339_v44  ;;  %v1858_v47 = vmax.f32 %v5337_v43, %v5339_v44  ;;  %v5559_v44 = vld [vmem:[#allocation3 + $0x58] sm:$0xff] }
 0x306   : > { %v5343_v48 = vpop.f32.mrb[70].mxu0  ;;  %1859 = vmax.xlane.f32.xlu0 %v1858_v47 }
 0x307   : > { %6446 = vst [vmem:[#allocation30_spill] sm:$0xff] %v5343_v48  ;;  %v5345_v49 = vpop.f32.mrb[71].mxu0 }
 0x308   : > { %6447 = vst [vmem:[#allocation31_spill] sm:$0xff] %v5345_v49  ;;  %v1861_v50 = vmax.f32 %v5343_v48, %v5345_v49  ;;  %v5569_v48 = vld [vmem:[#allocation3 + $0x60] sm:$0xff] }
 0x30a   : > { %1862 = vmax.xlane.f32.xlu1 %v1861_v50  ;;  %v5349_v51 = vpop.f32.mrb[72].mxu0 }
 0x30b   : > { %6448 = vst [vmem:[#allocation32_spill] sm:$0xff] %v5349_v51  ;;  %v5351_v52 = vpop.f32.mrb[73].mxu0 }
 0x30c   : > { %6449 = vst [vmem:[#allocation33_spill] sm:$0xff] %v5351_v52  ;;  %v1864_v55 = vmax.f32 %v5349_v51, %v5351_v52  ;;  %v5543_v52 = vld [vmem:[#allocation3 + $0x48] sm:$0xff] }
 0x30e   : > { %v5355_v56 = vpop.f32.mrb[74].mxu0  ;;  %1865 = vmax.xlane.f32.xlu0 %v1864_v55 }
 0x30f   : > { %6450 = vst [vmem:[#allocation34_spill] sm:$0xff] %v5355_v56  ;;  %v5357_v59 = vpop.f32.mrb[75].mxu0  ;;  %v4012_v46 = vpop.f32.mrb[0].mxu1 }
 0x310   : > { %6451 = vst [vmem:[#allocation35_spill] sm:$0xff] %v5357_v59  ;;  %v1867_v62 = vmax.f32 %v5355_v56, %v5357_v59  ;;  %v1161_v24 = vpop.f32.mrb[1].mxu1  ;;  %v1167_v30 = vadd.f32 %v4012_v46, %v5378_v21  ;;  %v5551_v59 = vld [vmem:[#allocation3 + $0x50] sm:$0xff] }
 0x311   : > { %v1162_v33 = vadd.f32 %v5378_v21, %v1161_v24 }
 0x312   : > { %1868 = vmax.xlane.f32.xlu1 %v1867_v62  ;;  %v5361_v0 = vpop.f32.mrb[76].mxu0  ;;  %v6386_v62 = vmov 0.0|0.0  }
 0x313   : > { %6452 = vst [vmem:[#allocation36_spill] sm:$0xff] %v5361_v0  ;;  %v5363_v3 = vpop.f32.mrb[77].mxu0  ;;  %v4071_v39 = vpack.c.bf16 %v1167_v30, %v1162_v33  ;;  %v4015_v42 = vpop.f32.mrb[2].mxu1  ;;  %4070 = vmatprep.subr.bf16.mxu1 %v6386_v62 }
 0x314   : > { %6453 = vst [vmem:[#allocation37_spill] sm:$0xff] %v5363_v3  ;;  %v1870_v4 = vmax.f32 %v5361_v0, %v5363_v3  ;;  %v1177_v50 = vadd.f32 %v4015_v42, %v5378_v21  ;;  %v1171_v55 = vpop.f32.mrb[3].mxu1  ;;  %v6472_v3 = vmov 0.0|0.0  }
 0x315   : > { %4072 = vmatpush1.bf16.msra.mxu1 %v4071_v39 }
 0x316   : > { %v5367_v7 = vpop.f32.mrb[78].mxu0  ;;  %1871 = vmax.xlane.f32.xlu0 %v1870_v4  ;;  %4073 = vmatprep.subr.bf16.mxu1 %v6386_v62 }
 0x317   : > { %6454 = vst [vmem:[#allocation38_spill] sm:$0xff] %v5367_v7  ;;  %v5369_v10 = vpop.f32.mrb[79].mxu0  ;;  %v4018_v30 = vpop.f32.mrb[4].mxu1 }
 0x318   : > { %6455 = vst [vmem:[#allocation39_spill] sm:$0xff] %v5369_v10  ;;  %v1873_v13 = vmax.f32 %v5367_v7, %v5369_v10 }
 0x31a   : > { %1874 = vmax.xlane.f32.xlu1 %v1873_v13  ;;  %v5373_v18 = vpop.f32.mrb[80].mxu0  ;;  %v1172_v13 = vadd.f32 %v5378_v21, %v1171_v55 }
 0x31b   : > { %6456 = vst [vmem:[#allocation40_spill] sm:$0xff] %v5373_v18  ;;  %v5380_v27 = vpop.f32.mrb[81].mxu0 }
 0x31c   : > { %6457 = vst [vmem:[#allocation41_spill] sm:$0xff] %v5380_v27  ;;  %v1876_v36 = vmax.f32 %v5373_v18, %v5380_v27  ;;  %v4074_v24 = vpack.c.bf16 %v1177_v50, %v1172_v13  ;;  %v1187_v27 = vadd.f32 %v4018_v30, %v5378_v21 }
 0x31e   : > { %v5386_v47 = vpop.f32.mrb[82].mxu0  ;;  %1877 = vmax.xlane.f32.xlu0 %v1876_v36  ;;  %v1181_v36 = vpop.f32.mrb[5].mxu1  ;;  %4075 = vmatpush1.bf16.msra.mxu1 %v4074_v24 }
 0x31f   : > { %6458 = vst [vmem:[#allocation42_spill] sm:$0xff] %v5386_v47  ;;  %v5390_v4 = vpop.f32.mrb[83].mxu0  ;;  %v1182_v18 = vadd.f32 %v5378_v21, %v1181_v36  ;;  %4076 = vmatprep.subr.bf16.mxu1 %v6386_v62 }
 0x320   : > { %6459 = vst [vmem:[#allocation43_spill] sm:$0xff] %v5390_v4  ;;  %v1879_v46 = vmax.f32 %v5386_v47, %v5390_v4  ;;  %v4021_v4 = vpop.f32.mrb[6].mxu1 }
 0x321   : > { %v4077_v55 = vpack.c.bf16 %v1187_v27, %v1182_v18  ;;  %v1197_v13 = vadd.f32 %v4021_v4, %v5378_v21 }
 0x322   : > { %1880 = vmax.xlane.f32.xlu1 %v1879_v46  ;;  %v5396_v33 = vpop.f32.mrb[84].mxu0  ;;  %v1191_v46 = vpop.f32.mrb[7].mxu1 }
 0x323   : > { %6460 = vst [vmem:[#allocation44_spill] sm:$0xff] %v5396_v33  ;;  %v5398_v42 = vpop.f32.mrb[85].mxu0  ;;  %v1192_v30 = vadd.f32 %v5378_v21, %v1191_v46  ;;  %4078 = vmatpush1.bf16.msra.mxu1 %v4077_v55 }
 0x324   : > { %6461 = vst [vmem:[#allocation45_spill] sm:$0xff] %v5398_v42  ;;  %v1882_v39 = vmax.f32 %v5396_v33, %v5398_v42  ;;  %4079 = vmatprep.subr.bf16.mxu1 %v6386_v62  ;;  %v4024_v42 = vpop.f32.mrb[8].mxu1 }
 0x325   : > { %v4080_v36 = vpack.c.bf16 %v1197_v13, %v1192_v30  ;;  %v1201_v27 = vpop.f32.mrb[9].mxu1  ;;  %v1207_v4 = vadd.f32 %v4024_v42, %v5378_v21 }
 0x326   : > { %v5405_v50 = vpop.f32.mrb[86].mxu0  ;;  %1883 = vmax.xlane.f32.xlu0 %v1882_v39  ;;  %v1202_v33 = vadd.f32 %v5378_v21, %v1201_v27 }
 0x327   : > { %6462 = vst [vmem:[#allocation46_spill] sm:$0xff] %v5405_v50  ;;  %v5408_v47 = vpop.f32.mrb[87].mxu0  ;;  %4081 = vmatpush1.bf16.msra.mxu1 %v4080_v36 }
 0x328   : > { %6463 = vst [vmem:[#allocation47_spill] sm:$0xff] %v5408_v47  ;;  %v1885_v24 = vmax.f32 %v5405_v50, %v5408_v47  ;;  %4082 = vmatprep.subr.bf16.mxu1 %v6386_v62  ;;  %v4083_v46 = vpack.c.bf16 %v1207_v4, %v1202_v33  ;;  %v4027_v47 = vpop.f32.mrb[10].mxu1 }
 0x329   : > { %v1217_v30 = vadd.f32 %v4027_v47, %v5378_v21 }
 0x32a   : > { %1886 = vmax.xlane.f32.xlu1 %v1885_v24  ;;  %v5414_v18 = vpop.f32.mrb[88].mxu0  ;;  %v1211_v24 = vpop.f32.mrb[11].mxu1 }
 0x32b   : > { %6464 = vst [vmem:[#allocation48_spill] sm:$0xff] %v5414_v18  ;;  %v5416_v39 = vpop.f32.mrb[89].mxu0  ;;  %v1212_v42 = vadd.f32 %v5378_v21, %v1211_v24  ;;  %4084 = vmatpush1.bf16.msra.mxu1 %v4083_v46 }
 0x32c   : > { %6465 = vst [vmem:[#allocation49_spill] sm:$0xff] %v5416_v39  ;;  %v1888_v55 = vmax.f32 %v5414_v18, %v5416_v39  ;;  %4085 = vmatprep.subr.bf16.mxu1 %v6386_v62  ;;  %v4030_v39 = vpop.f32.mrb[12].mxu1 }
 0x32d   : > { %v4086_v27 = vpack.c.bf16 %v1217_v30, %v1212_v42  ;;  %v1221_v4 = vpop.f32.mrb[13].mxu1  ;;  %v1227_v47 = vadd.f32 %v4030_v39, %v5378_v21 }
 0x32e   : > { %v5423_v13 = vpop.f32.mrb[90].mxu0  ;;  %1889 = vmax.xlane.f32.xlu0 %v1888_v55  ;;  %v1222_v18 = vadd.f32 %v5378_v21, %v1221_v4 }
 0x32f   : > { %6466 = vst [vmem:[#allocation50_spill] sm:$0xff] %v5423_v13  ;;  %v5426_v50 = vpop.f32.mrb[91].mxu0  ;;  %4087 = vmatpush1.bf16.msra.mxu1 %v4086_v27 }
 0x330   : > { %6467 = vst [vmem:[#allocation51_spill] sm:$0xff] %v5426_v50  ;;  %v1891_v36 = vmax.f32 %v5423_v13, %v5426_v50  ;;  %4088 = vmatprep.subr.bf16.mxu1 %v6386_v62  ;;  %v4089_v24 = vpack.c.bf16 %v1227_v47, %v1222_v18  ;;  %v4033_v50 = vpop.f32.mrb[14].mxu1 }
 0x331   : > { %v1237_v42 = vadd.f32 %v4033_v50, %v5378_v21 }
 0x332   : > { %1892 = vmax.xlane.f32.xlu1 %v1891_v36  ;;  %v5432_v33 = vpop.f32.mrb[92].mxu0  ;;  %v1231_v36 = vpop.f32.mrb[15].mxu1 }
 0x333   : > { %6468 = vst [vmem:[#allocation52_spill] sm:$0xff] %v5432_v33  ;;  %v5434_v55 = vpop.f32.mrb[93].mxu0  ;;  %v1232_v39 = vadd.f32 %v5378_v21, %v1231_v36  ;;  %4090 = vmatpush1.bf16.msra.mxu1 %v4089_v24 }
 0x334   : > { %6469 = vst [vmem:[#allocation53_spill] sm:$0xff] %v5434_v55  ;;  %v1894_v46 = vmax.f32 %v5432_v33, %v5434_v55  ;;  %4091 = vmatprep.subr.bf16.mxu1 %v6386_v62  ;;  %v4036_v55 = vpop.f32.mrb[16].mxu1 }
 0x335   : > { %v4092_v4 = vpack.c.bf16 %v1237_v42, %v1232_v39  ;;  %v1241_v18 = vpop.f32.mrb[17].mxu1  ;;  %v1247_v47 = vadd.f32 %v4036_v55, %v5378_v21 }
 0x336   : > { %v5441_v30 = vpop.f32.mrb[94].mxu0  ;;  %1895 = vmax.xlane.f32.xlu0 %v1894_v46  ;;  %v1242_v46 = vadd.f32 %v5378_v21, %v1241_v18  ;;  %v4039_v33 = vpop.f32.mrb[18].mxu1 }
 0x337   : > { %6470 = vst [vmem:[#allocation54_spill] sm:$0xff] %v5441_v30  ;;  %v5444_v13 = vpop.f32.mrb[95].mxu0  ;;  %4093 = vmatpush1.bf16.msra.mxu1 %v4092_v4  ;;  %v1257_v24 = vadd.f32 %v4039_v33, %v5378_v21  ;;  %v1251_v36 = vpop.f32.mrb[19].mxu1 }
 0x338   : > { %6471 = vst [vmem:[#allocation55_spill] sm:$0xff] %v5444_v13  ;;  %v1897_v27 = vmax.f32 %v5441_v30, %v5444_v13  ;;  %4094 = vmatprep.subr.bf16.mxu1 %v6386_v62  ;;  %v4095_v50 = vpack.c.bf16 %v1247_v47, %v1242_v46  ;;  %v1252_v13 = vadd.f32 %v5378_v21, %v1251_v36  ;;  %v4042_v39 = vpop.f32.mrb[20].mxu1 }
 0x339   : > { %v1267_v55 = vadd.f32 %v4042_v39, %v5378_v21 }
 0x33a   : > { %1898 = vmax.xlane.f32.xlu1 %v1897_v27  ;;  %v4098_v42 = vpack.c.bf16 %v1257_v24, %v1252_v13  ;;  %v1261_v27 = vpop.f32.mrb[21].mxu1  ;;  %v5462_v13 = vld [vmem:[#allocation3] sm:$0xff] }
 0x33b   : > { %4096 = vmatpush1.bf16.msra.mxu1 %v4095_v50  ;;  %v1262_v18 = vadd.f32 %v5378_v21, %v1261_v27  ;;  %v4045_v47 = vpop.f32.mrb[22].mxu1 }
 0x33c   : > { %4097 = vmatprep.subr.bf16.mxu1 %v6386_v62  ;;  %v1277_v33 = vadd.f32 %v4045_v47, %v5378_v21  ;;  %v1271_v46 = vpop.f32.mrb[23].mxu1 }
 0x33d   : > { %v4101_v4 = vpack.c.bf16 %v1267_v55, %v1262_v18  ;;  %v1272_v36 = vadd.f32 %v5378_v21, %v1271_v46  ;;  %v5470_v18 = vld [vmem:[#allocation3 + $0x8] sm:$0xff] }
 0x33f   : > { %4099 = vmatpush1.bf16.msra.mxu1 %v4098_v42  ;;  %v4104_v50 = vpack.c.bf16 %v1277_v33, %v1272_v36  ;;  %v4048_v24 = vpop.f32.mrb[24].mxu1 }
 0x340   : > { %4100 = vmatprep.subr.bf16.mxu1 %v6386_v62  ;;  %v1281_v39 = vpop.f32.mrb[25].mxu1  ;;  %v1287_v42 = vadd.f32 %v4048_v24, %v5378_v21  ;;  %v5481_v24 = vld [vmem:[#allocation3 + $0x10] sm:$0xff] }
 0x341   : > { %v1282_v27 = vadd.f32 %v5378_v21, %v1281_v39 }
 0x343   : > { %4102 = vmatpush1.bf16.msra.mxu1 %v4101_v4  ;;  %v4107_v4 = vpack.c.bf16 %v1287_v42, %v1282_v27  ;;  %v4051_v47 = vpop.f32.mrb[26].mxu1 }
 0x344   : > { %4103 = vmatprep.subr.bf16.mxu1 %v6386_v62  ;;  %v1297_v33 = vadd.f32 %v4051_v47, %v5378_v21  ;;  %v1291_v36 = vpop.f32.mrb[27].mxu1 }
 0x347   : > { %4105 = vmatpush1.bf16.msra.mxu1 %v4104_v50  ;;  %v4054_v42 = vpop.f32.mrb[28].mxu1 }
 0x348   : > { %4106 = vmatprep.subr.bf16.mxu1 %v6386_v62  ;;  %v1307_v47 = vadd.f32 %v4054_v42, %v5378_v21 }
 0x34b   : > { %v1806_v30 = vpop.xlane.xlu0 %1805  ;;  %4108 = vmatpush1.bf16.msra.mxu1 %v4107_v4  ;;  %v1301_v4 = vpop.f32.mrb[29].mxu1 }
 0x34c   : > { %v5467_v55 = vmax.f32 %v5462_v13, %v1806_v30  ;;  %v1292_v30 = vadd.f32 %v5378_v21, %v1291_v36  ;;  %4109 = vmatprep.subr.bf16.mxu1 %v6386_v62  ;;  %v1302_v36 = vadd.f32 %v5378_v21, %v1301_v4  ;;  %v5491_v62 = vld [vmem:[#allocation3 + $0x18] sm:$0xff]  ;;  %v5502_v4 = vld [vmem:[#allocation3 + $0x20] sm:$0xff] }
 0x34e   : > { %3118 = vst.msk [vmem:[#allocation3] sm:$0xff] %vm388_vm1, %v5467_v55  ;;  %2030 = vperm.xlu0 %4206, %v5467_v55   ;;  %v4110_v39 = vpack.c.bf16 %v1297_v33, %v1292_v30  ;;  %v4113_v33 = vpack.c.bf16 %v1307_v47, %v1302_v36  ;;  %v4057_v30 = vpop.f32.mrb[30].mxu1 }
 0x34f   : > { %v1809_v46 = vpop.xlane.xlu1 %1808  ;;  %v1317_v42 = vadd.f32 %v4057_v30, %v5378_v21  ;;  %v1311_v10 = vpop.f32.mrb[31].mxu1 }
 0x350   : > { %v5477_v50 = vmax.f32 %v5470_v18, %v1809_v46  ;;  %4111 = vmatpush1.bf16.msra.mxu1 %v4110_v39  ;;  %v1312_v39 = vadd.f32 %v5378_v21, %v1311_v10  ;;  %v5519_v21 = vld [vmem:[#allocation3 + $0x30] sm:$0xff] }
 0x351   : > { %4112 = vmatprep.subr.bf16.mxu1 %v6472_v3 }
 0x352   : > { %3119 = vst.msk [vmem:[#allocation3 + $0x8] sm:$0xff] %vm388_vm1, %v5477_v50  ;;  %2035 = vperm.xlu1 %4207, %v5477_v50   ;;  %v4116_v47 = vpack.c.bf16 %v1317_v42, %v1312_v39  ;;  %v5527_v39 = vld [vmem:[#allocation3 + $0x38] sm:$0xff] }
 0x353   : > { %v1812_v27 = vpop.xlane.xlu1 %1811 }
 0x354   : > { %v5488_v46 = vmax.f32 %v5481_v24, %v1812_v27  ;;  %4114 = vmatpush1.bf16.msra.mxu1 %v4113_v33 }
 0x355   : > { %4115 = vmatprep.subr.bf16.mxu1 %v6472_v3 }
 0x356   : > { %3120 = vst.msk [vmem:[#allocation3 + $0x10] sm:$0xff] %vm388_vm1, %v5488_v46  ;;  %2040 = vperm.xlu1 %4207, %v5488_v46  }
 0x357   : > { %v1815_v0 = vpop.xlane.xlu1 %1814 }
 0x358   : > { %v5499_v27 = vmax.f32 %v5491_v62, %v1815_v0  ;;  %4117 = vmatpush1.bf16.msra.mxu1 %v4116_v47  ;;  %v5511_v0 = vld [vmem:[#allocation3 + $0x28] sm:$0xff] }
 0x35a   : > { %3121 = vst.msk [vmem:[#allocation3 + $0x18] sm:$0xff] %vm388_vm1, %v5499_v27  ;;  %2045 = vperm.xlu1 %4207, %v5499_v27  }
 0x35b   : > { %v1818_v36 = vpop.xlane.xlu0 %1817 }
 0x35c   : > { %v5509_v30 = vmax.f32 %v5502_v4, %v1818_v36 }
 0x35e   : > { %3122 = vst.msk [vmem:[#allocation3 + $0x20] sm:$0xff] %vm388_vm1, %v5509_v30  ;;  %2050 = vperm.xlu1 %4207, %v5509_v30  }
 0x35f   : > { %v1821_v10 = vpop.xlane.xlu1 %1820 }
 0x360   : > { %v5517_v3 = vmax.f32 %v5511_v0, %v1821_v10  ;;  %v5535_v10 = vld [vmem:[#allocation3 + $0x40] sm:$0xff] }
 0x362   : > { %3123 = vst.msk [vmem:[#allocation3 + $0x28] sm:$0xff] %vm388_vm1, %v5517_v3  ;;  %2055 = vperm.xlu1 %4207, %v5517_v3  }
 0x363   : > { %v1824_v33 = vpop.xlane.xlu0 %1823 }
 0x364   : > { %v5525_v42 = vmax.f32 %v5519_v21, %v1824_v33 }
 0x366   : > { %3124 = vst.msk [vmem:[#allocation3 + $0x30] sm:$0xff] %vm388_vm1, %v5525_v42  ;;  %2060 = vperm.xlu1 %4207, %v5525_v42  }
 0x367   : > { %v1827_v47 = vpop.xlane.xlu1 %1826 }
 0x368   : > { %v5533_v36 = vmax.f32 %v5527_v39, %v1827_v47 }
 0x36a   : > { %3125 = vst.msk [vmem:[#allocation3 + $0x38] sm:$0xff] %vm388_vm1, %v5533_v36  ;;  %2065 = vperm.xlu1 %4207, %v5533_v36  }
 0x36b   : > { %v1830_v33 = vpop.xlane.xlu0 %1829 }
 0x36c   : > { %v5541_v7 = vmax.f32 %v5535_v10, %v1830_v33 }
 0x36e   : > { %3126 = vst.msk [vmem:[#allocation3 + $0x40] sm:$0xff] %vm388_vm1, %v5541_v7  ;;  %2070 = vperm.xlu1 %4207, %v5541_v7  }
 0x36f   : > { %v1833_v47 = vpop.xlane.xlu1 %1832 }
 0x370   : > { %v5549_v51 = vmax.f32 %v5543_v52, %v1833_v47  ;;  %v1932_v47 = vsub.f32 %v5462_v13, %v5467_v55 }
 0x372   : > { %3127 = vst.msk [vmem:[#allocation3 + $0x48] sm:$0xff] %vm388_vm1, %v5549_v51  ;;  %2075 = vperm.xlu0 %4206, %v5549_v51  }
 0x373   : > { %v1836_v33 = vpop.xlane.xlu0 %1835 }
 0x374   : > { %v5557_v56 = vmax.f32 %v5551_v59, %v1836_v33  ;;  %v1964_v33 = vmul.f32 1.442695, %v1932_v47  ;;  %v5587_v47 = vld [vmem:[#allocation3 + $0x70] sm:$0xff] }
 0x376   : > { %3128 = vst.msk [vmem:[#allocation3 + $0x50] sm:$0xff] %vm388_vm1, %v5557_v56  ;;  %2080 = vperm.xlu1 %4207, %v5557_v56   ;;  %4208 = vpow2.f32 %v1964_v33  ;;  %v1935_v33 = vsub.f32 %v5491_v62, %v5499_v27  ;;  %v5609_v62 = vld [vmem:[#allocation3 + $0x80] sm:$0xff] }
 0x377   : > { %v1839_v43 = vpop.xlane.xlu1 %1838 }
 0x378   : > { %v5567_v49 = vmax.f32 %v5559_v44, %v1839_v43  ;;  %v1934_v43 = vsub.f32 %v5481_v24, %v5488_v46  ;;  %v5599_v46 = vld [vmem:[#allocation3 + $0x78] sm:$0xff] }
 0x37a   : > { %3129 = vst.msk [vmem:[#allocation3 + $0x58] sm:$0xff] %vm388_vm1, %v5567_v49  ;;  %2085 = vperm.xlu0 %4206, %v5567_v49   ;;  %v1968_v37 = vmul.f32 1.442695, %v1934_v43 }
 0x37b   : > { %v1842_v41 = vpop.xlane.xlu0 %1841 }
 0x37c   : > { %v5575_v40 = vmax.f32 %v5569_v48, %v1842_v41  ;;  %v1933_v41 = vsub.f32 %v5470_v18, %v5477_v50  ;;  %4210 = vpow2.f32 %v1968_v37  ;;  %v1970_v18 = vmul.f32 1.442695, %v1935_v33  ;;  %v5622_v33 = vld [vmem:[#allocation3 + $0x88] sm:$0xff] }
 0x37d   : > { %v1937_v37 = vsub.f32 %v5511_v0, %v5517_v3  ;;  %v5632_v0 = vld [vmem:[#allocation3 + $0x90] sm:$0xff]  ;;  %v1938_v3 = vsub.f32 %v5519_v21, %v5525_v42  ;;  %v5649_v21 = vld [vmem:[#allocation3 + $0x98] sm:$0xff] }
 0x37e   : > { %3130 = vst.msk [vmem:[#allocation3 + $0x60] sm:$0xff] %vm388_vm1, %v5575_v40  ;;  %2090 = vperm.xlu1 %4207, %v5575_v40  }
 0x37f   : > { %v1845_v13 = vpop.xlane.xlu1 %1844  ;;  %v1976_v42 = vmul.f32 1.442695, %v1938_v3  ;;  %v1941_v3 = vsub.f32 %v5543_v52, %v5549_v51 }
 0x380   : > { %v5585_v55 = vmax.f32 %v5577_v38, %v1845_v13  ;;  %v1966_v13 = vmul.f32 1.442695, %v1933_v41  ;;  %v5607_v34 = vpop.eup %4208 }
 0x381   : > { %6473 = vst [vmem:[#allocation56_spill] sm:$0xff] %v5607_v34 }
 0x382   : > { %3131 = vst.msk [vmem:[#allocation3 + $0x68] sm:$0xff] %vm388_vm1, %v5585_v55  ;;  %2095 = vperm.xlu0 %4206, %v5585_v55   ;;  %4212 = vpow2.f32 %v1966_v13 }
 0x383   : > { %v1848_v35 = vpop.xlane.xlu0 %1847  ;;  %4214 = vpow2.f32 %v1970_v18 }
 0x384   : > { %v5597_v24 = vmax.f32 %v5587_v47, %v1848_v35  ;;  %v1936_v35 = vsub.f32 %v5502_v4, %v5509_v30  ;;  %v1974_v4 = vmul.f32 1.442695, %v1937_v37 }
 0x386   : > { %3132 = vst.msk [vmem:[#allocation3 + $0x70] sm:$0xff] %vm388_vm1, %v5597_v24  ;;  %2100 = vperm.xlu1 %4207, %v5597_v24   ;;  %v1972_v13 = vmul.f32 1.442695, %v1936_v35  ;;  %v5630_v18 = vpop.eup %4210  ;;  %v1939_v35 = vsub.f32 %v5527_v39, %v5533_v36 }
 0x387   : > { %v1851_v50 = vpop.xlane.xlu1 %1850  ;;  %6474 = vst [vmem:[#allocation57_spill] sm:$0xff] %v5630_v18 }
 0x388   : > { %v5605_v43 = vmax.f32 %v5599_v46, %v1851_v50  ;;  %4216 = vpow2.f32 %v1972_v13 }
 0x389   : > { %4218 = vpow2.f32 %v1974_v4  ;;  %v1978_v4 = vmul.f32 1.442695, %v1939_v35 }
 0x38a   : > { %3133 = vst.msk [vmem:[#allocation3 + $0x78] sm:$0xff] %vm388_vm1, %v5605_v43  ;;  %2105 = vperm.xlu0 %4206, %v5605_v43   ;;  %2639 = vperm.xlu1 %4207, %v5607_v34   ;;  %v5658_v34 = vld [vmem:[#allocation3 + $0xa0] sm:$0xff]  ;;  %4220 = vpow2.f32 %v1976_v42 }
 0x38b   : > { %v1854_v27 = vpop.xlane.xlu0 %1853  ;;  %4222 = vpow2.f32 %v1978_v4  ;;  %v1982_v4 = vmul.f32 1.442695, %v1941_v3 }
 0x38c   : > { %v5620_v41 = vmax.f32 %v5609_v62, %v1854_v27  ;;  %v5642_v27 = vpop.eup %4212 }
 0x38d   : > { %6475 = vst [vmem:[#allocation58_spill] sm:$0xff] %v5642_v27  ;;  %v5647_v13 = vpop.eup %4214 }
 0x38e   : > { %3134 = vst.msk [vmem:[#allocation3 + $0x80] sm:$0xff] %vm388_vm1, %v5620_v41  ;;  %2110 = vperm.xlu1 %4207, %v5620_v41   ;;  %6476 = vst [vmem:[#allocation59_spill] sm:$0xff] %v5647_v13 }
 0x38f   : > { %v1857_v30 = vpop.xlane.xlu1 %1856 }
 0x390   : > { %v5628_v50 = vmax.f32 %v5622_v33, %v1857_v30 }
 0x392   : > { %3135 = vst.msk [vmem:[#allocation3 + $0x88] sm:$0xff] %vm388_vm1, %v5628_v50  ;;  %2115 = vperm.xlu0 %4206, %v5628_v50   ;;  %2649 = vperm.xlu1 %4207, %v5630_v18   ;;  %v5684_v18 = vld [vmem:[#allocation3 + $0xb0] sm:$0xff] }
 0x393   : > { %v1860_v37 = vpop.xlane.xlu0 %1859 }
 0x394   : > { %v5645_v30 = vmax.f32 %v5632_v0, %v1860_v37  ;;  %v1940_v37 = vsub.f32 %v5535_v10, %v5541_v7  ;;  %v5675_v7 = vld [vmem:[#allocation3 + $0xa8] sm:$0xff] }
 0x396   : > { %3136 = vst.msk [vmem:[#allocation3 + $0x90] sm:$0xff] %vm388_vm1, %v5645_v30  ;;  %2644 = vperm.xlu0 %4206, %v5642_v27   ;;  %2654 = vperm.xlu1 %4207, %v5647_v13   ;;  %v1980_v10 = vmul.f32 1.442695, %v1940_v37  ;;  %v1943_v37 = vsub.f32 %v5559_v44, %v5567_v49  ;;  %v5792_v27 = vld [vmem:[#allocation3 + $0xf0] sm:$0xff] }
 0x397   : > { %v1863_v39 = vpop.xlane.xlu1 %1862 }
 0x398   : > { %v5656_v36 = vmax.f32 %v5649_v21, %v1863_v39  ;;  %v5668_v39 = vpop.eup %4216  ;;  %4224 = vpow2.f32 %v1980_v10 }
 0x399   : > { %6477 = vst [vmem:[#allocation60_spill] sm:$0xff] %v5668_v39  ;;  %v5673_v42 = vpop.eup %4218  ;;  %4226 = vpow2.f32 %v1982_v4  ;;  %v1986_v4 = vmul.f32 1.442695, %v1943_v37 }
 0x39a   : > { %3137 = vst.msk [vmem:[#allocation3 + $0x98] sm:$0xff] %vm388_vm1, %v5656_v36  ;;  %2125 = vperm.xlu0 %4206, %v5656_v36   ;;  %2120 = vperm.xlu1 %4207, %v5645_v30   ;;  %6478 = vst [vmem:[#allocation61_spill] sm:$0xff] %v5673_v42 }
 0x39b   : > { %v1866_v35 = vpop.xlane.xlu0 %1865 }
 0x39c   : > { %v5671_v13 = vmax.f32 %v5658_v34, %v1866_v35  ;;  %v1942_v35 = vsub.f32 %v5551_v59, %v5557_v56  ;;  %v5701_v56 = vld [vmem:[#allocation3 + $0xb8] sm:$0xff] }
 0x39e   : > { %3138 = vst.msk [vmem:[#allocation3 + $0xa0] sm:$0xff] %vm388_vm1, %v5671_v13  ;;  %2664 = vperm.xlu0 %4206, %v5673_v42   ;;  %2659 = vperm.xlu1 %4207, %v5668_v39   ;;  %v1984_v59 = vmul.f32 1.442695, %v1942_v35  ;;  %v5710_v39 = vld [vmem:[#allocation3 + $0xc0] sm:$0xff]  ;;  %v1945_v35 = vsub.f32 %v5577_v38, %v5585_v55 }
 0x39f   : > { %v1869_v51 = vpop.xlane.xlu1 %1868 }
 0x3a0   : > { %v5682_v52 = vmax.f32 %v5675_v7, %v1869_v51  ;;  %v5694_v51 = vpop.eup %4220  ;;  %4228 = vpow2.f32 %v1984_v59 }
 0x3a1   : > { %6479 = vst [vmem:[#allocation62_spill] sm:$0xff] %v5694_v51  ;;  %v5699_v10 = vpop.eup %4222  ;;  %4230 = vpow2.f32 %v1986_v4  ;;  %v1990_v4 = vmul.f32 1.442695, %v1945_v35 }
 0x3a2   : > { %3139 = vst.msk [vmem:[#allocation3 + $0xa8] sm:$0xff] %vm388_vm1, %v5682_v52  ;;  %2135 = vperm.xlu0 %4206, %v5682_v52   ;;  %2130 = vperm.xlu1 %4207, %v5671_v13   ;;  %6480 = vst [vmem:[#allocation63_spill] sm:$0xff] %v5699_v10 }
 0x3a3   : > { %v1872_v3 = vpop.xlane.xlu0 %1871 }
 0x3a4   : > { %v5697_v42 = vmax.f32 %v5684_v18, %v1872_v3  ;;  %v1944_v3 = vsub.f32 %v5569_v48, %v5575_v40  ;;  %v5727_v40 = vld [vmem:[#allocation3 + $0xc8] sm:$0xff] }
 0x3a6   : > { %3140 = vst.msk [vmem:[#allocation3 + $0xb0] sm:$0xff] %vm388_vm1, %v5697_v42  ;;  %2674 = vperm.xlu0 %4206, %v5699_v10   ;;  %2669 = vperm.xlu1 %4207, %v5694_v51   ;;  %v1988_v48 = vmul.f32 1.442695, %v1944_v3  ;;  %v5736_v51 = vld [vmem:[#allocation3 + $0xd0] sm:$0xff]  ;;  %v1947_v3 = vsub.f32 %v5599_v46, %v5605_v43 }
 0x3a7   : > { %v1875_v44 = vpop.xlane.xlu1 %1874 }
 0x3a8   : > { %v5708_v49 = vmax.f32 %v5701_v56, %v1875_v44  ;;  %v5720_v44 = vpop.eup %4224  ;;  %4232 = vpow2.f32 %v1988_v48 }
 0x3a9   : > { %6481 = vst [vmem:[#allocation64_spill] sm:$0xff] %v5720_v44  ;;  %v5725_v59 = vpop.eup %4226  ;;  %4234 = vpow2.f32 %v1990_v4  ;;  %v1994_v4 = vmul.f32 1.442695, %v1947_v3 }
 0x3aa   : > { %3141 = vst.msk [vmem:[#allocation3 + $0xb8] sm:$0xff] %vm388_vm1, %v5708_v49  ;;  %2145 = vperm.xlu0 %4206, %v5708_v49   ;;  %2140 = vperm.xlu1 %4207, %v5697_v42   ;;  %6482 = vst [vmem:[#allocation65_spill] sm:$0xff] %v5725_v59 }
 0x3ab   : > { %v1878_v37 = vpop.xlane.xlu0 %1877 }
 0x3ac   : > { %v5723_v10 = vmax.f32 %v5710_v39, %v1878_v37  ;;  %v1946_v37 = vsub.f32 %v5587_v47, %v5597_v24  ;;  %v5753_v47 = vld [vmem:[#allocation3 + $0xd8] sm:$0xff] }
 0x3ae   : > { %3142 = vst.msk [vmem:[#allocation3 + $0xc0] sm:$0xff] %vm388_vm1, %v5723_v10  ;;  %2684 = vperm.xlu0 %4206, %v5725_v59   ;;  %2679 = vperm.xlu1 %4207, %v5720_v44   ;;  %v1992_v24 = vmul.f32 1.442695, %v1946_v37  ;;  %v5762_v44 = vld [vmem:[#allocation3 + $0xe0] sm:$0xff]  ;;  %v1949_v37 = vsub.f32 %v5622_v33, %v5628_v50  ;;  %v1951_v50 = vsub.f32 %v5649_v21, %v5656_v36 }
 0x3af   : > { %v1881_v38 = vpop.xlane.xlu1 %1880  ;;  %v1953_v21 = vsub.f32 %v5675_v7, %v5682_v52  ;;  %v1955_v52 = vsub.f32 %v5701_v56, %v5708_v49 }
 0x3b0   : > { %v5734_v55 = vmax.f32 %v5727_v40, %v1881_v38  ;;  %v5746_v38 = vpop.eup %4228  ;;  %4236 = vpow2.f32 %v1992_v24  ;;  %v1998_v33 = vmul.f32 1.442695, %v1949_v37 }
 0x3b1   : > { %6483 = vst [vmem:[#allocation66_spill] sm:$0xff] %v5746_v38  ;;  %v5751_v48 = vpop.eup %4230  ;;  %4238 = vpow2.f32 %v1994_v4  ;;  %v2006_v7 = vmul.f32 1.442695, %v1953_v21 }
 0x3b2   : > { %3143 = vst.msk [vmem:[#allocation3 + $0xc8] sm:$0xff] %vm388_vm1, %v5734_v55  ;;  %2155 = vperm.xlu0 %4206, %v5734_v55   ;;  %2150 = vperm.xlu1 %4207, %v5723_v10   ;;  %6484 = vst [vmem:[#allocation67_spill] sm:$0xff] %v5751_v48 }
 0x3b3   : > { %v1884_v35 = vpop.xlane.xlu0 %1883 }
 0x3b4   : > { %v5749_v59 = vmax.f32 %v5736_v51, %v1884_v35  ;;  %v1948_v35 = vsub.f32 %v5609_v62, %v5620_v41  ;;  %v5779_v62 = vld [vmem:[#allocation3 + $0xe8] sm:$0xff] }
 0x3b6   : > { %3144 = vst.msk [vmem:[#allocation3 + $0xd0] sm:$0xff] %vm388_vm1, %v5749_v59  ;;  %2694 = vperm.xlu0 %4206, %v5751_v48   ;;  %2689 = vperm.xlu1 %4207, %v5746_v38   ;;  %v1996_v41 = vmul.f32 1.442695, %v1948_v35  ;;  %v1950_v38 = vsub.f32 %v5632_v0, %v5645_v30  ;;  %v1952_v0 = vsub.f32 %v5658_v34, %v5671_v13  ;;  %v2002_v30 = vmul.f32 1.442695, %v1951_v50  ;;  %v5809_v34 = vld [vmem:[#allocation3 + $0xf8] sm:$0xff] }
 0x3b7   : > { %v1887_v46 = vpop.xlane.xlu1 %1886  ;;  %v1956_v50 = vsub.f32 %v5710_v39, %v5723_v10  ;;  %v1958_v39 = vsub.f32 %v5736_v51, %v5749_v59 }
 0x3b8   : > { %v5760_v43 = vmax.f32 %v5753_v47, %v1887_v46  ;;  %v5772_v46 = vpop.eup %4232  ;;  %4240 = vpow2.f32 %v1996_v41  ;;  %v2000_v35 = vmul.f32 1.442695, %v1950_v38  ;;  %v2004_v13 = vmul.f32 1.442695, %v1952_v0 }
 0x3b9   : > { %v5777_v24 = vpop.eup %4234  ;;  %4242 = vpow2.f32 %v1998_v33  ;;  %v2010_v0 = vmul.f32 1.442695, %v1955_v52  ;;  %v2012_v56 = vmul.f32 1.442695, %v1956_v50  ;;  %v2016_v51 = vmul.f32 1.442695, %v1958_v39 }
 0x3ba   : > { %3145 = vst.msk [vmem:[#allocation3 + $0xd8] sm:$0xff] %vm388_vm1, %v5760_v43  ;;  %2165 = vperm.xlu0 %4206, %v5760_v43   ;;  %2160 = vperm.xlu1 %4207, %v5749_v59   ;;  %v5802_v37 = vpop.eup %4236  ;;  %4244 = vpow2.f32 %v2000_v35 }
 0x3bb   : > { %v1890_v3 = vpop.xlane.xlu0 %1889  ;;  %v5807_v41 = vpop.eup %4238  ;;  %4246 = vpow2.f32 %v2002_v30 }
 0x3bc   : > { %v5775_v48 = vmax.f32 %v5762_v44, %v1890_v3  ;;  %4248 = vpow2.f32 %v2004_v13 }
 0x3bd   : > { %4250 = vpow2.f32 %v2006_v7 }
 0x3be   : > { %3146 = vst.msk [vmem:[#allocation3 + $0xe0] sm:$0xff] %vm388_vm1, %v5775_v48  ;;  %2704 = vperm.xlu0 %4206, %v5777_v24   ;;  %2699 = vperm.xlu1 %4207, %v5772_v46   ;;  %v1960_v50 = vsub.f32 %v5762_v44, %v5775_v48 }
 0x3bf   : > { %v1893_v4 = vpop.xlane.xlu1 %1892 }
 0x3c0   : > { %v5790_v3 = vmax.f32 %v5779_v62, %v1893_v4  ;;  %v1954_v4 = vsub.f32 %v5684_v18, %v5697_v42  ;;  %v1957_v18 = vsub.f32 %v5727_v40, %v5734_v55  ;;  %v1959_v40 = vsub.f32 %v5753_v47, %v5760_v43 }
 0x3c2   : > { %3147 = vst.msk [vmem:[#allocation3 + $0xe8] sm:$0xff] %vm388_vm1, %v5790_v3  ;;  %2175 = vperm.xlu0 %4206, %v5790_v3   ;;  %2170 = vperm.xlu1 %4207, %v5775_v48   ;;  %v2008_v42 = vmul.f32 1.442695, %v1954_v4  ;;  %v5826_v30 = vpop.eup %4240  ;;  %v2014_v49 = vmul.f32 1.442695, %v1957_v18 }
 0x3c3   : > { %v1896_v36 = vpop.xlane.xlu0 %1895  ;;  %v5830_v10 = vpop.eup %4242  ;;  %v2018_v47 = vmul.f32 1.442695, %v1959_v40  ;;  %v2020_v48 = vmul.f32 1.442695, %v1960_v50 }
 0x3c4   : > { %v5805_v38 = vmax.f32 %v5792_v27, %v1896_v36  ;;  %4252 = vpow2.f32 %v2008_v42  ;;  %v5838_v13 = vpop.eup %4244 }
 0x3c5   : > { %4254 = vpow2.f32 %v2010_v0  ;;  %v5840_v7 = vpop.eup %4246 }
 0x3c6   : > { %3148 = vst.msk [vmem:[#allocation3 + $0xf0] sm:$0xff] %vm388_vm1, %v5805_v38  ;;  %2714 = vperm.xlu0 %4206, %v5807_v41   ;;  %2709 = vperm.xlu1 %4207, %v5802_v37   ;;  %4256 = vpow2.f32 %v2012_v56  ;;  %v1962_v39 = vsub.f32 %v5792_v27, %v5805_v38 }
 0x3c7   : > { %v1899_v33 = vpop.xlane.xlu1 %1898  ;;  %4258 = vpow2.f32 %v2014_v49 }
 0x3c8   : > { %v1931_v35 = vmax.f32 %v5809_v34, %v1899_v33  ;;  %v5848_v33 = vpop.eup %4248 }
 0x3ca   : > { %3149 = vst.msk [vmem:[#allocation3 + $0xf8] sm:$0xff] %vm388_vm1, %v1931_v35  ;;  %2185 = vperm.xlu0 %4206, %v1931_v35   ;;  %2180 = vperm.xlu1 %4207, %v5805_v38   ;;  %v2024_v38 = vmul.f32 1.442695, %v1962_v39 }
 0x3cd   : > { %v2031_v55 = vpop.permute.xlu0 %2030 }
 0x3ce   : > { %v2188_v21 = vsub.f32 %v5133_v53, %v2031_v55  ;;  %v2189_v36 = vsub.f32 %v5135_v54, %v2031_v55  ;;  %2724 = vperm.xlu0 %4206, %v5830_v10   ;;  %2719 = vperm.xlu1 %4207, %v5826_v30   ;;  %v1961_v53 = vsub.f32 %v5779_v62, %v5790_v3  ;;  %v5852_v62 = vpop.eup %4250 }
 0x3cf   : > { %v5859_v44 = vpop.eup %4252 }
 0x3d0   : > { %v2252_v59 = vmul.f32 1.442695, %v2188_v21  ;;  %v2254_v4 = vmul.f32 1.442695, %v2189_v36  ;;  %v2022_v3 = vmul.f32 1.442695, %v1961_v53 }
 0x3d1   : > { %v2036_v43 = vpop.permute.xlu1 %2035 }
 0x3d2   : > { %4260 = vpow2.f32 %v2252_v59  ;;  %v2190_v54 = vsub.f32 %v5235_v57, %v2036_v43  ;;  %v2191_v52 = vsub.f32 %v5237_v58, %v2036_v43  ;;  %2734 = vperm.xlu0 %4206, %v5840_v7   ;;  %2729 = vperm.xlu1 %4207, %v5838_v13   ;;  %v1963_v57 = vsub.f32 %v5809_v34, %v1931_v35  ;;  %v5863_v34 = vpop.eup %4254 }
 0x3d3   : > { %4262 = vpow2.f32 %v2254_v4  ;;  %v5865_v55 = vpop.eup %4256 }
 0x3d4   : > { %4264 = vpow2.f32 %v2016_v51  ;;  %v2256_v18 = vmul.f32 1.442695, %v2190_v54  ;;  %v2258_v42 = vmul.f32 1.442695, %v2191_v52  ;;  %v2026_v35 = vmul.f32 1.442695, %v1963_v57  ;;  %v5871_v36 = vpop.eup %4258 }
 0x3d5   : > { %4266 = vpow2.f32 %v2018_v47  ;;  %v2041_v58 = vpop.permute.xlu1 %2040 }
 0x3d6   : > { %4268 = vpow2.f32 %v2256_v18  ;;  %v2192_v0 = vsub.f32 %v5241_v60, %v2041_v58  ;;  %v2193_v56 = vsub.f32 %v5243_v61, %v2041_v58  ;;  %2744 = vperm.xlu0 %4206, %v5852_v62   ;;  %2739 = vperm.xlu1 %4207, %v5848_v33  }
 0x3d7   : > { %4270 = vpow2.f32 %v2258_v42 }
 0x3d8   : > { %v2260_v49 = vmul.f32 1.442695, %v2192_v0  ;;  %v2262_v40 = vmul.f32 1.442695, %v2193_v56  ;;  %4272 = vpow2.f32 %v2022_v3 }
 0x3d9   : > { %v2046_v60 = vpop.permute.xlu1 %2045 }
 0x3da   : > { %4274 = vpow2.f32 %v2260_v49  ;;  %v2194_v61 = vsub.f32 %v5247_v45, %v2046_v60  ;;  %v2195_v21 = vsub.f32 %v5249_v63, %v2046_v60  ;;  %2754 = vperm.xlu0 %4206, %v5863_v34   ;;  %2749 = vperm.xlu1 %4207, %v5859_v44  }
 0x3db   : > { %4276 = vpow2.f32 %v2262_v40 }
 0x3dc   : > { %v4261_v27 = vpop.eup %4260  ;;  %4278 = vpow2.f32 %v2020_v48  ;;  %v2264_v51 = vmul.f32 1.442695, %v2194_v61  ;;  %v2266_v59 = vmul.f32 1.442695, %v2195_v21 }
 0x3dd   : > { %v4263_v4 = vpop.eup %4262  ;;  %4280 = vpow2.f32 %v2026_v35  ;;  %v2051_v47 = vpop.permute.xlu1 %2050 }
 0x3de   : > { %v5873_v53 = vpop.eup %4264  ;;  %4282 = vpow2.f32 %v2264_v51  ;;  %v2196_v45 = vsub.f32 %v5253_v1, %v2051_v47  ;;  %v2197_v63 = vsub.f32 %v5255_v2, %v2051_v47  ;;  %2893 = vmatprep.mubr.f32.mxu1 %v4263_v4  ;;  %2764 = vperm.xlu0 %4206, %v5871_v36   ;;  %v5878_v43 = vadd.f32 %v4263_v4, %v4261_v27 }
 0x3df   : > { %v5880_v54 = vpop.eup %4266  ;;  %4284 = vpow2.f32 %v2266_v59  ;;  %2894 = vmatmul.mubr.f32.vlgmr.msra.gmra.mrb[32].mxu1 %v4261_v27  ;;  %2759 = vperm.xlu1 %4207, %v5865_v55  }
 0x3e0   : > { %v4269_v52 = vpop.eup %4268  ;;  %4286 = vpow2.f32 %v2024_v38  ;;  %v2268_v50 = vmul.f32 1.442695, %v2196_v45  ;;  %v2270_v18 = vmul.f32 1.442695, %v2197_v63 }
 0x3e1   : > { %v4271_v42 = vpop.eup %4270  ;;  %v2056_v3 = vpop.permute.xlu1 %2055 }
 0x3e2   : > { %4288 = vpow2.f32 %v2268_v50  ;;  %v2198_v1 = vsub.f32 %v5259_v5, %v2056_v3  ;;  %v2199_v2 = vsub.f32 %v5261_v6, %v2056_v3  ;;  %2898 = vmatprep.mubr.f32.mxu1 %v4271_v42  ;;  %2774 = vperm.xlu0 %4206, %v5880_v54   ;;  %v5886_v57 = vadd.f32 %v4271_v42, %v4269_v52  ;;  %v5888_v58 = vpop.eup %4272 }
 0x3e3   : > { %4290 = vpow2.f32 %v2270_v18  ;;  %2899 = vmatmul.mubr.f32.gmra.mrb[34].mxu1 %v4269_v52  ;;  %2769 = vperm.xlu1 %4207, %v5873_v53  }
 0x3e4   : > { %v4275_v0 = vpop.eup %4274  ;;  %v2272_v56 = vmul.f32 1.442695, %v2198_v1  ;;  %v2274_v48 = vmul.f32 1.442695, %v2199_v2 }
 0x3e5   : > { %v4277_v39 = vpop.eup %4276  ;;  %v2061_v49 = vpop.permute.xlu1 %2060 }
 0x3e6   : > { %v5891_v40 = vpop.eup %4278  ;;  %4292 = vpow2.f32 %v2272_v56  ;;  %v2200_v5 = vsub.f32 %v5265_v8, %v2061_v49  ;;  %v2201_v6 = vsub.f32 %v5267_v9, %v2061_v49  ;;  %2903 = vmatprep.mubr.f32.mxu1 %v4277_v39  ;;  %2784 = vperm.xlu0 %4206, %v5888_v58   ;;  %v5896_v35 = vadd.f32 %v4277_v39, %v4275_v0 }
 0x3e7   : > { %v5898_v60 = vpop.eup %4280  ;;  %4294 = vpow2.f32 %v2274_v48  ;;  %2904 = vmatmul.mubr.f32.gmra.mrb[36].mxu1 %v4275_v0  ;;  %2779 = vperm.xlu1 %4207, %v5891_v40  }
 0x3e8   : > { %v4283_v61 = vpop.eup %4282  ;;  %v2276_v21 = vmul.f32 1.442695, %v2200_v5  ;;  %v2278_v27 = vmul.f32 1.442695, %v2201_v6 }
 0x3e9   : > { %v4285_v38 = vpop.eup %4284  ;;  %v2066_v51 = vpop.permute.xlu1 %2065 }
 0x3ea   : > { %v5901_v59 = vpop.eup %4286  ;;  %4296 = vpow2.f32 %v2276_v21  ;;  %v2202_v8 = vsub.f32 %v5271_v11, %v2066_v51  ;;  %v2203_v9 = vsub.f32 %v5273_v12, %v2066_v51  ;;  %2908 = vmatprep.mubr.f32.mxu1 %v4285_v38  ;;  %2794 = vperm.xlu0 %4206, %v5898_v60   ;;  %v5906_v4 = vadd.f32 %v4285_v38, %v4283_v61 }
 0x3eb   : > { %4298 = vpow2.f32 %v2278_v27  ;;  %2909 = vmatmul.mubr.f32.gmra.mrb[38].mxu1 %v4283_v61  ;;  %2789 = vperm.xlu1 %4207, %v5901_v59  }
 0x3ec   : > { %v4289_v47 = vpop.eup %4288  ;;  %v2280_v45 = vmul.f32 1.442695, %v2202_v8  ;;  %v2282_v63 = vmul.f32 1.442695, %v2203_v9 }
 0x3ed   : > { %v4291_v52 = vpop.eup %4290  ;;  %v2071_v50 = vpop.permute.xlu1 %2070 }
 0x3ee   : > { %4300 = vpow2.f32 %v2280_v45  ;;  %v2204_v18 = vsub.f32 %v5277_v14, %v2071_v50  ;;  %v2205_v11 = vsub.f32 %v5279_v15, %v2071_v50  ;;  %2913 = vmatprep.mubr.f32.mxu1 %v4291_v52  ;;  %v5911_v12 = vadd.f32 %v4291_v52, %v4289_v47 }
 0x3ef   : > { %4302 = vpow2.f32 %v2282_v63  ;;  %2914 = vmatmul.mubr.f32.gmra.mrb[40].mxu1 %v4289_v47 }
 0x3f0   : > { %v4293_v42 = vpop.eup %4292  ;;  %v2284_v3 = vmul.f32 1.442695, %v2204_v18  ;;  %v2286_v1 = vmul.f32 1.442695, %v2205_v11 }
 0x3f1   : > { %v4295_v2 = vpop.eup %4294  ;;  %v2076_v0 = vpop.permute.xlu0 %2075 }
 0x3f2   : > { %4304 = vpow2.f32 %v2284_v3  ;;  %2918 = vmatprep.mubr.f32.mxu1 %v4295_v2  ;;  %v2206_v56 = vsub.f32 %v5283_v16, %v2076_v0  ;;  %v2207_v48 = vsub.f32 %v5285_v17, %v2076_v0  ;;  %v5915_v39 = vadd.f32 %v4295_v2, %v4293_v42 }
 0x3f3   : > { %4306 = vpow2.f32 %v2286_v1  ;;  %2919 = vmatmul.mubr.f32.gmra.mrb[42].mxu1 %v4293_v42 }
 0x3f4   : > { %v4297_v14 = vpop.eup %4296  ;;  %v2288_v15 = vmul.f32 1.442695, %v2206_v56  ;;  %v2290_v49 = vmul.f32 1.442695, %v2207_v48 }
 0x3f5   : > { %v4299_v5 = vpop.eup %4298  ;;  %v2081_v6 = vpop.permute.xlu1 %2080 }
 0x3f6   : > { %4308 = vpow2.f32 %v2288_v15  ;;  %v2208_v61 = vsub.f32 %v5289_v19, %v2081_v6  ;;  %v2209_v21 = vsub.f32 %v5291_v20, %v2081_v6  ;;  %2923 = vmatprep.mubr.f32.mxu1 %v4299_v5  ;;  %v5919_v27 = vadd.f32 %v4299_v5, %v4297_v14 }
 0x3f7   : > { %4310 = vpow2.f32 %v2290_v49  ;;  %2924 = vmatmul.mubr.f32.gmra.mrb[44].mxu1 %v4297_v14 }
 0x3f8   : > { %v4301_v16 = vpop.eup %4300  ;;  %v2292_v17 = vmul.f32 1.442695, %v2208_v61  ;;  %v2294_v38 = vmul.f32 1.442695, %v2209_v21 }
 0x3f9   : > { %v4303_v51 = vpop.eup %4302  ;;  %v2086_v8 = vpop.permute.xlu0 %2085 }
 0x3fa   : > { %4312 = vpow2.f32 %v2292_v17  ;;  %2928 = vmatprep.mubr.f32.mxu1 %v4303_v51  ;;  %v2210_v9 = vsub.f32 %v5295_v22, %v2086_v8  ;;  %v2211_v47 = vsub.f32 %v5297_v23, %v2086_v8  ;;  %v5923_v45 = vadd.f32 %v4303_v51, %v4301_v16  ;;  %v6486_v51 = vld [vmem:[#allocation22_spill] sm:$0xff]  ;;  %v6487_v8 = vld [vmem:[#allocation23_spill] sm:$0xff] }
 0x3fb   : > { %4314 = vpow2.f32 %v2294_v38  ;;  %2929 = vmatmul.mubr.f32.gmra.mrb[46].mxu1 %v4301_v16 }
 0x3fc   : > { %v4305_v19 = vpop.eup %4304  ;;  %v2296_v20 = vmul.f32 1.442695, %v2210_v9  ;;  %v2298_v63 = vmul.f32 1.442695, %v2211_v47 }
 0x3fd   : > { %v4307_v52 = vpop.eup %4306  ;;  %v2091_v50 = vpop.permute.xlu1 %2090 }
 0x3fe   : > { %4316 = vpow2.f32 %v2296_v20  ;;  %v2212_v18 = vsub.f32 %v5301_v25, %v2091_v50  ;;  %v2213_v11 = vsub.f32 %v5303_v26, %v2091_v50  ;;  %2933 = vmatprep.mubr.f32.mxu1 %v4307_v52  ;;  %v5927_v42 = vadd.f32 %v4307_v52, %v4305_v19  ;;  %v6488_v52 = vld [vmem:[#allocation24_spill] sm:$0xff] }
 0x3ff   : > { %4318 = vpow2.f32 %v2298_v63  ;;  %2934 = vmatmul.mubr.f32.gmra.mrb[48].mxu1 %v4305_v19 }
 0x400   : > { %v4309_v22 = vpop.eup %4308  ;;  %v2300_v23 = vmul.f32 1.442695, %v2212_v18  ;;  %v2302_v3 = vmul.f32 1.442695, %v2213_v11  ;;  %v6489_v18 = vld [vmem:[#allocation25_spill] sm:$0xff] }
 0x401   : > { %v4311_v1 = vpop.eup %4310  ;;  %v2096_v2 = vpop.permute.xlu0 %2095 }
 0x402   : > { %4320 = vpow2.f32 %v2300_v23  ;;  %2938 = vmatprep.mubr.f32.mxu1 %v4311_v1  ;;  %v2214_v0 = vsub.f32 %v5307_v28, %v2096_v2  ;;  %v2215_v56 = vsub.f32 %v5309_v29, %v2096_v2  ;;  %v5931_v48 = vadd.f32 %v4311_v1, %v4309_v22 }
 0x403   : > { %4322 = vpow2.f32 %v2302_v3  ;;  %2939 = vmatmul.mubr.f32.gmra.mrb[50].mxu1 %v4309_v22 }
 0x404   : > { %v4313_v25 = vpop.eup %4312  ;;  %v2304_v26 = vmul.f32 1.442695, %v2214_v0  ;;  %v2306_v14 = vmul.f32 1.442695, %v2215_v56  ;;  %v6491_v56 = vld [vmem:[#allocation26_spill] sm:$0xff] }
 0x405   : > { %v4315_v15 = vpop.eup %4314  ;;  %v2101_v49 = vpop.permute.xlu1 %2100 }
 0x406   : > { %4324 = vpow2.f32 %v2304_v26  ;;  %v2216_v5 = vsub.f32 %v5313_v31, %v2101_v49  ;;  %v2217_v6 = vsub.f32 %v5315_v32, %v2101_v49  ;;  %2943 = vmatprep.mubr.f32.mxu1 %v4315_v15  ;;  %v5935_v61 = vadd.f32 %v4315_v15, %v4313_v25  ;;  %v6492_v26 = vld [vmem:[#allocation27_spill] sm:$0xff] }
 0x407   : > { %4326 = vpow2.f32 %v2306_v14  ;;  %2944 = vmatmul.mubr.f32.gmra.mrb[52].mxu1 %v4313_v25 }
 0x408   : > { %v4317_v28 = vpop.eup %4316  ;;  %v2308_v29 = vmul.f32 1.442695, %v2216_v5  ;;  %v2310_v21 = vmul.f32 1.442695, %v2217_v6 }
 0x409   : > { %v4319_v16 = vpop.eup %4318  ;;  %2448 = vadd.xlane.f32.xlu0 %v5886_v57  ;;  %v2106_v17 = vpop.permute.xlu0 %2105 }
 0x40a   : > { %v5938_v38 = vpop.permute.xlu1 %2639  ;;  %4328 = vpow2.f32 %v2308_v29  ;;  %2948 = vmatprep.mubr.f32.mxu1 %v4319_v16  ;;  %v2218_v31 = vsub.f32 %v6486_v51, %v2106_v17  ;;  %v2219_v32 = vsub.f32 %v6487_v8, %v2106_v17  ;;  %v5942_v9 = vadd.f32 %v4319_v16, %v4317_v28  ;;  %v6495_v51 = vld [vmem:[#allocation30_spill] sm:$0xff] }
 0x40b   : > { %6485 = vst [vmem:[#allocation68_spill] sm:$0xff] %v5938_v38  ;;  %4330 = vpow2.f32 %v2310_v21  ;;  %2949 = vmatmul.mubr.f32.gmra.mrb[54].mxu1 %v4317_v28 }
 0x40c   : > { %v4321_v47 = vpop.eup %4320  ;;  %v2312_v19 = vmul.f32 1.442695, %v2218_v31  ;;  %v2314_v20 = vmul.f32 1.442695, %v2219_v32  ;;  %v6496_v31 = vld [vmem:[#allocation31_spill] sm:$0xff]  ;;  %v6497_v32 = vld [vmem:[#allocation28_spill] sm:$0xff] }
 0x40d   : > { %v4323_v63 = vpop.eup %4322  ;;  %2451 = vadd.xlane.f32.xlu0 %v5896_v35 }
 0x40e   : > { %v2111_v57 = vpop.permute.xlu1 %2110  ;;  %4332 = vpow2.f32 %v2312_v19  ;;  %2953 = vmatprep.mubr.f32.mxu1 %v4323_v63  ;;  %v5947_v22 = vadd.f32 %v4323_v63, %v4321_v47  ;;  %v6498_v19 = vld [vmem:[#allocation29_spill] sm:$0xff] }
 0x40f   : > { %v2220_v50 = vsub.f32 %v6488_v52, %v2111_v57  ;;  %v2221_v11 = vsub.f32 %v6489_v18, %v2111_v57  ;;  %4334 = vpow2.f32 %v2314_v20  ;;  %2954 = vmatmul.mubr.f32.gmra.mrb[56].mxu1 %v4321_v47  ;;  %2445 = vadd.xlane.f32.xlu1 %v5878_v43 }
 0x410   : > { %v4325_v23 = vpop.eup %4324 }
 0x411   : > { %v2316_v3 = vmul.f32 1.442695, %v2220_v50  ;;  %v2318_v1 = vmul.f32 1.442695, %v2221_v11  ;;  %v4327_v2 = vpop.eup %4326  ;;  %2454 = vadd.xlane.f32.xlu0 %v5906_v4  ;;  %v2116_v35 = vpop.permute.xlu0 %2115 }
 0x412   : > { %v5951_v0 = vpop.permute.xlu1 %2649  ;;  %2958 = vmatprep.mubr.f32.mxu1 %v4327_v2  ;;  %v2222_v25 = vsub.f32 %v6491_v56, %v2116_v35  ;;  %v2223_v14 = vsub.f32 %v6492_v26, %v2116_v35  ;;  %v2483_v43 = vadd.f32 %v4327_v2, %v4325_v23 }
 0x413   : > { %6490 = vst [vmem:[#allocation22_spill] sm:$0xff] %v5951_v0  ;;  %4336 = vpow2.f32 %v2316_v3  ;;  %2959 = vmatmul.mubr.f32.gmra.mrb[58].mxu1 %v4325_v23  ;;  %2457 = vadd.xlane.f32.xlu1 %v5911_v12 }
 0x414   : > { %4338 = vpow2.f32 %v2318_v1  ;;  %v4329_v15 = vpop.eup %4328  ;;  %v2320_v49 = vmul.f32 1.442695, %v2222_v25  ;;  %v2322_v5 = vmul.f32 1.442695, %v2223_v14  ;;  %v6502_v25 = vld [vmem:[#allocation35_spill] sm:$0xff]  ;;  %v6503_v14 = vld [vmem:[#allocation32_spill] sm:$0xff] }
 0x415   : > { %v4331_v6 = vpop.eup %4330  ;;  %2460 = vadd.xlane.f32.xlu0 %v5915_v39  ;;  %v5957_v4 = vpop.permute.xlu0 %2644 }
 0x416   : > { %6493 = vst [vmem:[#allocation23_spill] sm:$0xff] %v5957_v4  ;;  %v5959_v28 = vpop.permute.xlu1 %2654  ;;  %4340 = vpow2.f32 %v2320_v49  ;;  %2963 = vmatprep.mubr.f32.mxu1 %v4331_v6  ;;  %v2486_v29 = vadd.f32 %v4331_v6, %v4329_v15  ;;  %v6504_v49 = vld [vmem:[#allocation33_spill] sm:$0xff] }
 0x417   : > { %6494 = vst [vmem:[#allocation24_spill] sm:$0xff] %v5959_v28  ;;  %4342 = vpow2.f32 %v2322_v5  ;;  %2964 = vmatmul.mubr.f32.gmra.mrb[60].mxu1 %v4329_v15  ;;  %2463 = vadd.xlane.f32.xlu1 %v5919_v27  ;;  %v2384_v28 = vld [vmem:[#allocation4 + $0x20] sm:$0xff] }
 0x418   : > { %v4333_v21 = vpop.eup %4332 }
 0x419   : > { %v4335_v12 = vpop.eup %4334  ;;  %2466 = vadd.xlane.f32.xlu0 %v5923_v45  ;;  %v2126_v16 = vpop.permute.xlu0 %2125 }
 0x41a   : > { %v2121_v17 = vpop.permute.xlu1 %2120  ;;  %2968 = vmatprep.mubr.f32.mxu1 %v4335_v12  ;;  %v2226_v39 = vsub.f32 %v6495_v51, %v2126_v16  ;;  %v2227_v8 = vsub.f32 %v6496_v31, %v2126_v16  ;;  %v2489_v63 = vadd.f32 %v4335_v12, %v4333_v21 }
 0x41b   : > { %v2224_v47 = vsub.f32 %v6497_v32, %v2121_v17  ;;  %v2225_v20 = vsub.f32 %v6498_v19, %v2121_v17  ;;  %2969 = vmatmul.mubr.f32.gmra.mrb[62].mxu1 %v4333_v21  ;;  %2469 = vadd.xlane.f32.xlu1 %v5927_v42  ;;  %v6506_v32 = vld [vmem:[#allocation38_spill] sm:$0xff]  ;;  %v6507_v19 = vld [vmem:[#allocation39_spill] sm:$0xff] }
 0x41c   : > { %v2328_v57 = vmul.f32 1.442695, %v2226_v39  ;;  %v2330_v52 = vmul.f32 1.442695, %v2227_v8 }
 0x41d   : > { %v4337_v27 = vpop.eup %4336  ;;  %v2324_v50 = vmul.f32 1.442695, %v2224_v47  ;;  %v2326_v18 = vmul.f32 1.442695, %v2225_v20  ;;  %2472 = vadd.xlane.f32.xlu0 %v5931_v48  ;;  %v5969_v11 = vpop.permute.xlu0 %2664  ;;  %v6501_v48 = vld [vmem:[#allocation34_spill] sm:$0xff] }
 0x41e   : > { %v4339_v45 = vpop.eup %4338  ;;  %6499 = vst [vmem:[#allocation25_spill] sm:$0xff] %v5969_v11  ;;  %v5971_v23 = vpop.permute.xlu1 %2659  ;;  %4344 = vpow2.f32 %v2328_v57  ;;  %v6509_v57 = vld [vmem:[#allocation37_spill] sm:$0xff] }
 0x41f   : > { %6500 = vst [vmem:[#allocation26_spill] sm:$0xff] %v5971_v23  ;;  %2973 = vmatprep.mubr.f32.mxu1 %v4339_v45  ;;  %v2492_v3 = vadd.f32 %v4339_v45, %v4337_v27  ;;  %4346 = vpow2.f32 %v2330_v52  ;;  %2475 = vadd.xlane.f32.xlu1 %v5935_v61 }
 0x420   : > { %2974 = vmatmul.mubr.f32.gmra.mrb[64].mxu1 %v4337_v27  ;;  %v4341_v42 = vpop.eup %4340  ;;  %4348 = vpow2.f32 %v2324_v50 }
 0x421   : > { %v4343_v1 = vpop.eup %4342  ;;  %4350 = vpow2.f32 %v2326_v18  ;;  %2478 = vadd.xlane.f32.xlu0 %v5942_v9  ;;  %v2136_v2 = vpop.permute.xlu0 %2135 }
 0x422   : > { %v2131_v35 = vpop.permute.xlu1 %2130  ;;  %v2230_v56 = vsub.f32 %v6501_v48, %v2136_v2  ;;  %v2231_v26 = vsub.f32 %v6502_v25, %v2136_v2  ;;  %2978 = vmatprep.mubr.f32.mxu1 %v4343_v1  ;;  %v2495_v61 = vadd.f32 %v4343_v1, %v4341_v42 }
 0x423   : > { %v2228_v15 = vsub.f32 %v6503_v14, %v2131_v35  ;;  %v2229_v5 = vsub.f32 %v6504_v49, %v2131_v35  ;;  %2481 = vadd.xlane.f32.xlu1 %v5947_v22  ;;  %v6510_v14 = vld [vmem:[#allocation42_spill] sm:$0xff]  ;;  %v6511_v49 = vld [vmem:[#allocation43_spill] sm:$0xff] }
 0x424   : > { %2979 = vmatmul.mubr.f32.gmra.mrb[66].mxu1 %v4341_v42  ;;  %v2336_v6 = vmul.f32 1.442695, %v2230_v56  ;;  %v2338_v21 = vmul.f32 1.442695, %v2231_v26 }
 0x425   : > { %v2332_v12 = vmul.f32 1.442695, %v2228_v15  ;;  %v2334_v16 = vmul.f32 1.442695, %v2229_v5  ;;  %2484 = vadd.xlane.f32.xlu0 %v2483_v43  ;;  %v5980_v9 = vpop.permute.xlu0 %2674  ;;  %v6508_v43 = vld [vmem:[#allocation36_spill] sm:$0xff] }
 0x426   : > { %6505 = vst [vmem:[#allocation27_spill] sm:$0xff] %v5980_v9  ;;  %v5982_v17 = vpop.permute.xlu1 %2669  ;;  %4352 = vpow2.f32 %v2336_v6  ;;  %v6536_v9 = vld [vmem:[#allocation56_spill] sm:$0xff] }
 0x427   : > { %4354 = vpow2.f32 %v2338_v21  ;;  %2487 = vadd.xlane.f32.xlu1 %v2486_v29  ;;  %v6513_v21 = vld [vmem:[#allocation41_spill] sm:$0xff] }
 0x428   : > { %v4345_v51 = vpop.eup %4344  ;;  %4356 = vpow2.f32 %v2332_v12 }
 0x429   : > { %v4347_v39 = vpop.eup %4346  ;;  %4358 = vpow2.f32 %v2334_v16  ;;  %2490 = vadd.xlane.f32.xlu0 %v2489_v63  ;;  %v2146_v22 = vpop.permute.xlu0 %2145 }
 0x42a   : > { %v2141_v31 = vpop.permute.xlu1 %2140  ;;  %v4349_v8 = vpop.eup %4348  ;;  %v2234_v47 = vsub.f32 %v6506_v32, %v2146_v22  ;;  %v2235_v20 = vsub.f32 %v6507_v19, %v2146_v22  ;;  %v2501_v45 = vadd.f32 %v4347_v39, %v4345_v51 }
 0x42b   : > { %v2232_v27 = vsub.f32 %v6508_v43, %v2141_v31  ;;  %v2233_v52 = vsub.f32 %v6509_v57, %v2141_v31  ;;  %v4351_v50 = vpop.eup %4350  ;;  %2493 = vadd.xlane.f32.xlu1 %v2492_v3 }
 0x42c   : > { %v2344_v29 = vmul.f32 1.442695, %v2234_v47  ;;  %v2346_v18 = vmul.f32 1.442695, %v2235_v20  ;;  %2983 = vmatprep.mubr.f32.mxu1 %v4351_v50  ;;  %v2498_v1 = vadd.f32 %v4351_v50, %v4349_v8  ;;  %v6514_v50 = vld [vmem:[#allocation46_spill] sm:$0xff] }
 0x42d   : > { %v2340_v42 = vmul.f32 1.442695, %v2232_v27  ;;  %v2342_v63 = vmul.f32 1.442695, %v2233_v52  ;;  %2984 = vmatmul.mubr.f32.gmra.mrb[68].mxu1 %v4349_v8  ;;  %2496 = vadd.xlane.f32.xlu0 %v2495_v61  ;;  %v5988_v2 = vpop.permute.xlu0 %2684  ;;  %v6512_v61 = vld [vmem:[#allocation40_spill] sm:$0xff] }
 0x42e   : > { %v5990_v35 = vpop.permute.xlu1 %2679  ;;  %4360 = vpow2.f32 %v2344_v29  ;;  %2988 = vmatprep.mubr.f32.mxu1 %v4347_v39  ;;  %v6515_v29 = vld [vmem:[#allocation47_spill] sm:$0xff] }
 0x42f   : > { %4362 = vpow2.f32 %v2346_v18  ;;  %2499 = vadd.xlane.f32.xlu1 %v2498_v1 }
 0x430   : > { %v4353_v48 = vpop.eup %4352  ;;  %4364 = vpow2.f32 %v2340_v42  ;;  %v6516_v42 = vld [vmem:[#allocation44_spill] sm:$0xff] }
 0x431   : > { %v4355_v3 = vpop.eup %4354  ;;  %4366 = vpow2.f32 %v2342_v63  ;;  %2989 = vmatmul.mubr.f32.gmra.mrb[70].mxu1 %v4345_v51  ;;  %2502 = vadd.xlane.f32.xlu0 %v2501_v45  ;;  %v2156_v56 = vpop.permute.xlu0 %2155  ;;  %v6517_v63 = vld [vmem:[#allocation45_spill] sm:$0xff] }
 0x432   : > { %v2151_v25 = vpop.permute.xlu1 %2150  ;;  %v4357_v26 = vpop.eup %4356  ;;  %v2238_v15 = vsub.f32 %v6510_v14, %v2156_v56  ;;  %v2239_v5 = vsub.f32 %v6511_v49, %v2156_v56  ;;  %v2507_v39 = vadd.f32 %v4355_v3, %v4353_v48 }
 0x433   : > { %v2236_v6 = vsub.f32 %v6512_v61, %v2151_v25  ;;  %v2237_v12 = vsub.f32 %v6513_v21, %v2151_v25  ;;  %v4359_v16 = vpop.eup %4358 }
 0x434   : > { %v2352_v22 = vmul.f32 1.442695, %v2238_v15  ;;  %v2354_v31 = vmul.f32 1.442695, %v2239_v5  ;;  %2993 = vmatprep.mubr.f32.mxu1 %v4359_v16  ;;  %v2504_v32 = vadd.f32 %v4359_v16, %v4357_v26 }
 0x435   : > { %v2348_v8 = vmul.f32 1.442695, %v2236_v6  ;;  %v2350_v51 = vmul.f32 1.442695, %v2237_v12  ;;  %2994 = vmatmul.mubr.f32.gmra.mrb[72].mxu1 %v4357_v26  ;;  %2508 = vadd.xlane.f32.xlu0 %v2507_v39  ;;  %v5996_v47 = vpop.permute.xlu0 %2694 }
 0x436   : > { %v5998_v19 = vpop.permute.xlu1 %2689  ;;  %4368 = vpow2.f32 %v2352_v22  ;;  %2998 = vmatprep.mubr.f32.mxu1 %v4355_v3  ;;  %2505 = vadd.xlane.f32.xlu1 %v2504_v32  ;;  %v6518_v22 = vld [vmem:[#allocation50_spill] sm:$0xff] }
 0x437   : > { %4370 = vpow2.f32 %v2354_v31 }
 0x438   : > { %v4361_v20 = vpop.eup %4360  ;;  %4372 = vpow2.f32 %v2348_v8  ;;  %v6519_v8 = vld [vmem:[#allocation51_spill] sm:$0xff] }
 0x439   : > { %v4363_v43 = vpop.eup %4362  ;;  %4374 = vpow2.f32 %v2350_v51  ;;  %2999 = vmatmul.mubr.f32.gmra.mrb[74].mxu1 %v4353_v48  ;;  %v2166_v27 = vpop.permute.xlu0 %2165  ;;  %v6520_v51 = vld [vmem:[#allocation48_spill] sm:$0xff] }
 0x43a   : > { %v2161_v57 = vpop.permute.xlu1 %2160  ;;  %v4365_v52 = vpop.eup %4364  ;;  %v2242_v45 = vsub.f32 %v6514_v50, %v2166_v27  ;;  %v2243_v18 = vsub.f32 %v6515_v29, %v2166_v27  ;;  %v2513_v3 = vadd.f32 %v4363_v43, %v4361_v20 }
 0x43b   : > { %v2240_v1 = vsub.f32 %v6516_v42, %v2161_v57  ;;  %v2241_v56 = vsub.f32 %v6517_v63, %v2161_v57  ;;  %v4367_v25 = vpop.eup %4366  ;;  %v6521_v57 = vld [vmem:[#allocation49_spill] sm:$0xff] }
 0x43c   : > { %v2360_v26 = vmul.f32 1.442695, %v2242_v45  ;;  %v2362_v14 = vmul.f32 1.442695, %v2243_v18  ;;  %3003 = vmatprep.mubr.f32.mxu1 %v4367_v25  ;;  %v2510_v49 = vadd.f32 %v4367_v25, %v4365_v52  ;;  %2514 = vadd.xlane.f32.xlu0 %v2513_v3 }
 0x43d   : > { %v2356_v15 = vmul.f32 1.442695, %v2240_v1  ;;  %v2358_v5 = vmul.f32 1.442695, %v2241_v56  ;;  %3004 = vmatmul.mubr.f32.gmra.mrb[76].mxu1 %v4365_v52  ;;  %v6004_v48 = vpop.permute.xlu0 %2704 }
 0x43e   : > { %v6006_v61 = vpop.permute.xlu1 %2699  ;;  %4376 = vpow2.f32 %v2360_v26  ;;  %3008 = vmatprep.mubr.f32.mxu1 %v4363_v43  ;;  %2511 = vadd.xlane.f32.xlu1 %v2510_v49 }
 0x43f   : > { %4378 = vpow2.f32 %v2362_v14 }
 0x440   : > { %v4369_v6 = vpop.eup %4368  ;;  %4380 = vpow2.f32 %v2356_v15  ;;  %v6522_v15 = vld [vmem:[#allocation54_spill] sm:$0xff] }
 0x441   : > { %v4371_v21 = vpop.eup %4370  ;;  %4382 = vpow2.f32 %v2358_v5  ;;  %3009 = vmatmul.mubr.f32.gmra.mrb[78].mxu1 %v4361_v20  ;;  %v2176_v12 = vpop.permute.xlu0 %2175  ;;  %v6523_v5 = vld [vmem:[#allocation55_spill] sm:$0xff] }
 0x442   : > { %v2171_v16 = vpop.permute.xlu1 %2170  ;;  %v4373_v39 = vpop.eup %4372  ;;  %v2246_v31 = vsub.f32 %v6518_v22, %v2176_v12  ;;  %v2247_v32 = vsub.f32 %v6519_v8, %v2176_v12  ;;  %v2519_v43 = vadd.f32 %v4371_v21, %v4369_v6  ;;  %v6525_v22 = vld [vmem:[#allocation53_spill] sm:$0xff] }
 0x443   : > { %v2244_v27 = vsub.f32 %v6520_v51, %v2171_v16  ;;  %v2245_v52 = vsub.f32 %v6521_v57, %v2171_v16  ;;  %v4375_v50 = vpop.eup %4374  ;;  %v6524_v16 = vld [vmem:[#allocation52_spill] sm:$0xff] }
 0x444   : > { %v2368_v45 = vmul.f32 1.442695, %v2246_v31  ;;  %v2370_v29 = vmul.f32 1.442695, %v2247_v32  ;;  %3013 = vmatprep.mubr.f32.mxu1 %v4375_v50  ;;  %v2516_v42 = vadd.f32 %v4375_v50, %v4373_v39  ;;  %2520 = vadd.xlane.f32.xlu0 %v2519_v43 }
 0x445   : > { %v2364_v18 = vmul.f32 1.442695, %v2244_v27  ;;  %v2366_v1 = vmul.f32 1.442695, %v2245_v52  ;;  %3014 = vmatmul.mubr.f32.gmra.mrb[80].mxu1 %v4373_v39  ;;  %v6012_v20 = vpop.permute.xlu0 %2714 }
 0x446   : > { %v6014_v63 = vpop.permute.xlu1 %2709  ;;  %4384 = vpow2.f32 %v2368_v45  ;;  %3018 = vmatprep.mubr.f32.mxu1 %v4371_v21  ;;  %2517 = vadd.xlane.f32.xlu1 %v2516_v42 }
 0x447   : > { %4386 = vpow2.f32 %v2370_v29 }
 0x448   : > { %v4377_v56 = vpop.eup %4376  ;;  %4388 = vpow2.f32 %v2364_v18 }
 0x449   : > { %v4379_v25 = vpop.eup %4378  ;;  %4390 = vpow2.f32 %v2366_v1  ;;  %3019 = vmatmul.mubr.f32.gmra.mrb[82].mxu1 %v4369_v6  ;;  %v2186_v3 = vpop.permute.xlu0 %2185 }
 0x44a   : > { %v2181_v26 = vpop.permute.xlu1 %2180  ;;  %v4381_v14 = vpop.eup %4380  ;;  %v2250_v49 = vsub.f32 %v6522_v15, %v2186_v3  ;;  %v2251_v12 = vsub.f32 %v6523_v5, %v2186_v3  ;;  %v2525_v21 = vadd.f32 %v4379_v25, %v4377_v56 }
 0x44b   : > { %v2248_v39 = vsub.f32 %v6524_v16, %v2181_v26  ;;  %v2249_v31 = vsub.f32 %v6525_v22, %v2181_v26  ;;  %v4383_v8 = vpop.eup %4382 }
 0x44c   : > { %v2376_v32 = vmul.f32 1.442695, %v2250_v49  ;;  %v2378_v51 = vmul.f32 1.442695, %v2251_v12  ;;  %3023 = vmatprep.mubr.f32.mxu1 %v4383_v8  ;;  %v2522_v57 = vadd.f32 %v4383_v8, %v4381_v14  ;;  %2526 = vadd.xlane.f32.xlu0 %v2525_v21 }
 0x44d   : > { %v2372_v27 = vmul.f32 1.442695, %v2248_v39  ;;  %v2374_v52 = vmul.f32 1.442695, %v2249_v31  ;;  %3024 = vmatmul.mubr.f32.gmra.mrb[84].mxu1 %v4381_v14 }
 0x44e   : > { %4392 = vpow2.f32 %v2376_v32  ;;  %3028 = vmatprep.mubr.f32.mxu1 %v4379_v25  ;;  %2523 = vadd.xlane.f32.xlu1 %v2522_v57  ;;  %v6022_v15 = vpop.permute.xlu1 %2719 }
 0x44f   : > { %4394 = vpow2.f32 %v2378_v51 }
 0x450   : > { %v4385_v6 = vpop.eup %4384  ;;  %4396 = vpow2.f32 %v2372_v27 }
 0x451   : > { %v4387_v50 = vpop.eup %4386  ;;  %4398 = vpow2.f32 %v2374_v52  ;;  %3029 = vmatmul.mubr.f32.gmra.mrb[86].mxu1 %v4377_v56  ;;  %v6020_v56 = vpop.permute.xlu0 %2724  ;;  %v2381_v52 = vld [vmem:[#allocation4 + $0x8] sm:$0xff] }
 0x452   : > { %v4389_v43 = vpop.eup %4388  ;;  %v2531_v45 = vadd.f32 %v4387_v50, %v4385_v6  ;;  %v6026_v5 = vpop.permute.xlu1 %2729 }
 0x453   : > { %v4391_v29 = vpop.eup %4390 }
 0x454   : > { %3033 = vmatprep.mubr.f32.mxu1 %v4391_v29  ;;  %2532 = vadd.xlane.f32.xlu0 %v2531_v45  ;;  %v2528_v18 = vadd.f32 %v4391_v29, %v4389_v43  ;;  %v2382_v45 = vld [vmem:[#allocation4 + $0x10] sm:$0xff] }
 0x455   : > { %3034 = vmatmul.mubr.f32.gmra.mrb[88].mxu1 %v4389_v43  ;;  %v6024_v49 = vpop.permute.xlu0 %2734 }
 0x456   : > { %3038 = vmatprep.mubr.f32.mxu1 %v4387_v50  ;;  %2529 = vadd.xlane.f32.xlu1 %v2528_v18  ;;  %v6030_v16 = vpop.permute.xlu1 %2739 }
 0x458   : > { %v4393_v42 = vpop.eup %4392 }
 0x459   : > { %v4395_v1 = vpop.eup %4394  ;;  %3039 = vmatmul.mubr.f32.gmra.mrb[90].mxu1 %v4385_v6  ;;  %v6028_v12 = vpop.permute.xlu0 %2744  ;;  %v6533_v6 = vld [vmem:[#allocation58_spill] sm:$0xff] }
 0x45a   : > { %v4397_v25 = vpop.eup %4396  ;;  %v2537_v3 = vadd.f32 %v4395_v1, %v4393_v42  ;;  %v6034_v22 = vpop.permute.xlu1 %2749  ;;  %v2413_v50 = vmul.f32 %v6533_v6, %v2381_v52  ;;  %v6537_v6 = vld [vmem:[#allocation59_spill] sm:$0xff] }
 0x45b   : > { %v4399_v26 = vpop.eup %4398 }
 0x45c   : > { %3043 = vmatprep.mubr.f32.mxu1 %v4399_v26  ;;  %2538 = vadd.xlane.f32.xlu0 %v2537_v3  ;;  %v2534_v14 = vadd.f32 %v4399_v26, %v4397_v25  ;;  %v2383_v26 = vld [vmem:[#allocation4 + $0x18] sm:$0xff] }
 0x45d   : > { %3044 = vmatmul.mubr.f32.gmra.mrb[92].mxu1 %v4397_v25  ;;  %v6032_v39 = vpop.permute.xlu0 %2754  ;;  %v2415_v0 = vmul.f32 %v6537_v6, %v2383_v26  ;;  %v6540_v26 = vld [vmem:[#allocation62_spill] sm:$0xff] }
 0x45e   : > { %3048 = vmatprep.mubr.f32.mxu1 %v4395_v1  ;;  %2535 = vadd.xlane.f32.xlu1 %v2534_v14  ;;  %v6038_v8 = vpop.permute.xlu1 %2759  ;;  %v6535_v1 = vld [vmem:[#allocation57_spill] sm:$0xff] }
 0x45f   : > { %6527 = vst [vmem:[#allocation31_spill] sm:$0xff] %v6038_v8  ;;  %v2414_v25 = vmul.f32 %v6535_v1, %v2382_v45  ;;  %v2386_v1 = vld [vmem:[#allocation4 + $0x30] sm:$0xff] }
 0x461   : > { %3049 = vmatmul.mubr.f32.gmra.mrb[94].mxu1 %v4393_v42  ;;  %v6036_v31 = vpop.permute.xlu0 %2764  ;;  %v2380_v42 = vld [vmem:[#allocation4] sm:$0xff] }
 0x462   : > { %6526 = vst [vmem:[#allocation30_spill] sm:$0xff] %v6036_v31  ;;  %v6042_v32 = vpop.permute.xlu1 %2769  ;;  %v2412_v11 = vmul.f32 %v6536_v9, %v2380_v42  ;;  %v6539_v42 = vld [vmem:[#allocation61_spill] sm:$0xff] }
 0x463   : > { %6529 = vst [vmem:[#allocation29_spill] sm:$0xff] %v6042_v32 }
 0x465   : > { %v6040_v21 = vpop.permute.xlu0 %2774 }
 0x466   : > { %6528 = vst [vmem:[#allocation28_spill] sm:$0xff] %v6040_v21  ;;  %v6046_v27 = vpop.permute.xlu1 %2779  ;;  %v2393_v21 = vld [vmem:[#allocation4 + $0x68] sm:$0xff] }
 0x467   : > { %6531 = vst [vmem:[#allocation35_spill] sm:$0xff] %v6046_v27 }
 0x469   : > { %v6044_v51 = vpop.permute.xlu0 %2784 }
 0x46a   : > { %6530 = vst [vmem:[#allocation34_spill] sm:$0xff] %v6044_v51  ;;  %v6051_v18 = vpop.permute.xlu1 %2789 }
 0x46b   : > { %6534 = vst [vmem:[#allocation33_spill] sm:$0xff] %v6051_v18 }
 0x46d   : > { %v6048_v57 = vpop.permute.xlu0 %2794 }
 0x46e   : > { %6532 = vst [vmem:[#allocation32_spill] sm:$0xff] %v6048_v57 }
 0x496   : > { %v2449_v43 = vpop.xlane.xlu0 %2448 }
 0x497   : > { %v2541_v29 = vadd.f32 %v2449_v43, %v2413_v50  ;;  %v2385_v43 = vld [vmem:[#allocation4 + $0x28] sm:$0xff] }
 0x499   : > { %2574 = vst.msk [vmem:[#allocation4 + $0x8] sm:$0xff] %vm388_vm1, %v2541_v29  ;;  %v6538_v29 = vld [vmem:[#allocation60_spill] sm:$0xff] }
 0x49a   : > { %v2452_v3 = vpop.xlane.xlu0 %2451  ;;  %v2416_v38 = vmul.f32 %v6538_v29, %v2384_v28 }
 0x49b   : > { %v2542_v14 = vadd.f32 %v2452_v3, %v2414_v25  ;;  %v2417_v25 = vmul.f32 %v6539_v42, %v2385_v43  ;;  %v6542_v42 = vld [vmem:[#allocation64_spill] sm:$0xff] }
 0x49c   : > { %v2446_v23 = vpop.xlane.xlu1 %2445 }
 0x49d   : > { %2575 = vst.msk [vmem:[#allocation4 + $0x10] sm:$0xff] %vm388_vm1, %v2542_v14  ;;  %v2540_v52 = vadd.f32 %v2446_v23, %v2412_v11  ;;  %v2387_v11 = vld [vmem:[#allocation4 + $0x38] sm:$0xff]  ;;  %v2418_v14 = vmul.f32 %v6540_v26, %v2386_v1  ;;  %v2390_v1 = vld [vmem:[#allocation4 + $0x50] sm:$0xff] }
 0x49e   : > { %v2455_v50 = vpop.xlane.xlu0 %2454 }
 0x49f   : > { %2573 = vst.msk [vmem:[#allocation4] sm:$0xff] %vm388_vm1, %v2540_v52  ;;  %v2543_v4 = vadd.f32 %v2455_v50, %v2415_v0  ;;  %v2388_v0 = vld [vmem:[#allocation4 + $0x40] sm:$0xff]  ;;  %v6541_v50 = vld [vmem:[#allocation63_spill] sm:$0xff] }
 0x4a0   : > { %v2458_v45 = vpop.xlane.xlu1 %2457  ;;  %v3154_v57 = vld [vmem:[#allocation4 + $0x8] sm:$0xff]  ;;  %v2419_v29 = vmul.f32 %v6541_v50, %v2387_v11 }
 0x4a1   : > { %2576 = vst.msk [vmem:[#allocation4 + $0x18] sm:$0xff] %vm388_vm1, %v2543_v4  ;;  %v2544_v9 = vadd.f32 %v2458_v45, %v2416_v38  ;;  %4400 = vrcp.f32 %v3154_v57  ;;  %v2389_v4 = vld [vmem:[#allocation4 + $0x48] sm:$0xff] }
 0x4a2   : > { %v2461_v3 = vpop.xlane.xlu0 %2460 }
 0x4a3   : > { %2577 = vst.msk [vmem:[#allocation4 + $0x20] sm:$0xff] %vm388_vm1, %v2544_v9  ;;  %v2545_v23 = vadd.f32 %v2461_v3, %v2417_v25  ;;  %v2420_v9 = vmul.f32 %v6542_v42, %v2388_v0  ;;  %v2392_v42 = vld [vmem:[#allocation4 + $0x60] sm:$0xff] }
 0x4a4   : > { %v2464_v52 = vpop.xlane.xlu1 %2463  ;;  %v3155_v6 = vld [vmem:[#allocation4 + $0x10] sm:$0xff] }
 0x4a5   : > { %2578 = vst.msk [vmem:[#allocation4 + $0x28] sm:$0xff] %vm388_vm1, %v2545_v23  ;;  %v2546_v28 = vadd.f32 %v2464_v52, %v2418_v14  ;;  %4402 = vrcp.f32 %v3155_v6  ;;  %v6543_v23 = vld [vmem:[#allocation65_spill] sm:$0xff]  ;;  %v2391_v52 = vld [vmem:[#allocation4 + $0x58] sm:$0xff] }
 0x4a6   : > { %v2467_v38 = vpop.xlane.xlu0 %2466  ;;  %v3153_v43 = vld [vmem:[#allocation4] sm:$0xff]  ;;  %v2421_v14 = vmul.f32 %v6543_v23, %v2389_v4  ;;  %v6545_v4 = vld [vmem:[#allocation67_spill] sm:$0xff] }
 0x4a7   : > { %2579 = vst.msk [vmem:[#allocation4 + $0x30] sm:$0xff] %vm388_vm1, %v2546_v28  ;;  %v2547_v45 = vadd.f32 %v2467_v38, %v2419_v29  ;;  %4404 = vrcp.f32 %v3153_v43  ;;  %v6544_v29 = vld [vmem:[#allocation66_spill] sm:$0xff] }
 0x4a8   : > { %v2470_v25 = vpop.xlane.xlu1 %2469  ;;  %v3156_v3 = vld [vmem:[#allocation4 + $0x18] sm:$0xff]  ;;  %v2422_v38 = vmul.f32 %v6544_v29, %v2390_v1  ;;  %v2394_v29 = vld [vmem:[#allocation4 + $0x70] sm:$0xff] }
 0x4a9   : > { %2580 = vst.msk [vmem:[#allocation4 + $0x38] sm:$0xff] %vm388_vm1, %v2547_v45  ;;  %v2548_v26 = vadd.f32 %v2470_v25, %v2420_v9  ;;  %4406 = vrcp.f32 %v3156_v3  ;;  %v2423_v9 = vmul.f32 %v6545_v4, %v2391_v52 }
 0x4aa   : > { %v2473_v11 = vpop.xlane.xlu0 %2472  ;;  %v3157_v50 = vld [vmem:[#allocation4 + $0x20] sm:$0xff] }
 0x4ab   : > { %v4401_v18 = vpop.eup %4400  ;;  %2581 = vst.msk [vmem:[#allocation4 + $0x40] sm:$0xff] %vm388_vm1, %v2548_v26  ;;  %v2549_v28 = vadd.f32 %v2473_v11, %v2421_v14  ;;  %4408 = vrcp.f32 %v3157_v50 }
 0x4ac   : > { %v2476_v0 = vpop.xlane.xlu1 %2475  ;;  %v3218_v51 = vmul.f32 %v4401_v18, %v3154_v57  ;;  %v6072_v27 = vld [vmem:[#allocation4 + $0x28] sm:$0xff]  ;;  %v2424_v57 = vmul.f32 %v5772_v46, %v2392_v42  ;;  %v2395_v46 = vld [vmem:[#allocation4 + $0x78] sm:$0xff] }
 0x4ad   : > { %2582 = vst.msk [vmem:[#allocation4 + $0x48] sm:$0xff] %vm388_vm1, %v2549_v28  ;;  %v2550_v45 = vadd.f32 %v2476_v0, %v2422_v38  ;;  %4410 = vrcp.f32 %v6072_v27  ;;  %v2425_v0 = vmul.f32 %v5777_v24, %v2393_v21  ;;  %v2396_v21 = vld [vmem:[#allocation4 + $0x80] sm:$0xff]  ;;  %v2427_v32 = vmul.f32 %v5807_v41, %v2395_v46 }
 0x4ae   : > { %v2479_v25 = vpop.xlane.xlu0 %2478  ;;  %v3250_v23 = vsub.f32 2.0, %v3218_v51  ;;  %v6077_v26 = vld [vmem:[#allocation4 + $0x30] sm:$0xff] }
 0x4af   : > { %v6079_v14 = vpop.eup %4402  ;;  %2583 = vst.msk [vmem:[#allocation4 + $0x50] sm:$0xff] %vm388_vm1, %v2550_v45  ;;  %v2551_v1 = vadd.f32 %v2479_v25, %v2423_v9  ;;  %4412 = vrcp.f32 %v6077_v26 }
 0x4b0   : > { %v2482_v11 = vpop.xlane.xlu1 %2481  ;;  %v3282_v28 = vmul.f32 %v4401_v18, %v3250_v23  ;;  %v6084_v52 = vld [vmem:[#allocation4 + $0x38] sm:$0xff]  ;;  %v3219_v9 = vmul.f32 %v6079_v14, %v3155_v6 }
 0x4b1   : > { %v4405_v38 = vpop.eup %4404  ;;  %2584 = vst.msk [vmem:[#allocation4 + $0x58] sm:$0xff] %vm388_vm1, %v2551_v1  ;;  %v2552_v51 = vadd.f32 %v2482_v11, %v2424_v57  ;;  %4414 = vrcp.f32 %v6084_v52  ;;  %v2426_v57 = vmul.f32 %v5802_v37, %v2394_v29 }
 0x4b2   : > { %v6089_v4 = vpop.f32.mrb[32].mxu1  ;;  %3352 = vperm.xlu0 %4206, %v3282_v28   ;;  %v2485_v45 = vpop.xlane.xlu0 %2484  ;;  %v3217_v42 = vmul.f32 %v4405_v38, %v3153_v43  ;;  %v6092_v18 = vld [vmem:[#allocation4 + $0x40] sm:$0xff] }
 0x4b3   : > { %6546 = vst [vmem:[#allocation38_spill] sm:$0xff] %v6089_v4  ;;  %v4407_v25 = vpop.eup %4406  ;;  %2585 = vst.msk [vmem:[#allocation4 + $0x60] sm:$0xff] %vm388_vm1, %v2552_v51  ;;  %v2897_v23 = vpop.f32.mrb[33].mxu1  ;;  %v2553_v1 = vadd.f32 %v2485_v45, %v2425_v0  ;;  %4416 = vrcp.f32 %v6092_v18  ;;  %v2397_v45 = vld [vmem:[#allocation4 + $0x88] sm:$0xff] }
 0x4b4   : > { %v2488_v24 = vpop.xlane.xlu1 %2487  ;;  %v3249_v11 = vsub.f32 2.0, %v3217_v42  ;;  %v3220_v28 = vmul.f32 %v4407_v25, %v3156_v3  ;;  %v6097_v4 = vld [vmem:[#allocation4 + $0x48] sm:$0xff]  ;;  %v3251_v23 = vsub.f32 2.0, %v3219_v9 }
 0x4b5   : > { %v4409_v43 = vpop.eup %4408  ;;  %2586 = vst.msk [vmem:[#allocation4 + $0x68] sm:$0xff] %vm388_vm1, %v2553_v1  ;;  %v2554_v6 = vadd.f32 %v2488_v24, %v2426_v57  ;;  %4418 = vrcp.f32 %v6097_v4  ;;  %v2428_v57 = vmul.f32 %v5826_v30, %v2396_v21  ;;  %v2398_v24 = vld [vmem:[#allocation4 + $0x90] sm:$0xff]  ;;  %v2399_v21 = vld [vmem:[#allocation4 + $0x98] sm:$0xff] }
 0x4b6   : > { %v6102_v51 = vpop.f32.mrb[34].mxu1  ;;  %v2491_v0 = vpop.xlane.xlu0 %2490  ;;  %v3281_v37 = vmul.f32 %v4405_v38, %v3249_v11  ;;  %v3252_v29 = vsub.f32 2.0, %v3220_v28  ;;  %v3221_v31 = vmul.f32 %v4409_v43, %v3157_v50  ;;  %v6104_v42 = vld [vmem:[#allocation4 + $0x50] sm:$0xff]  ;;  %v2429_v28 = vmul.f32 %v5830_v10, %v2397_v45 }
 0x4b7   : > { %v4411_v3 = vpop.eup %4410  ;;  %2587 = vst.msk [vmem:[#allocation4 + $0x70] sm:$0xff] %vm388_vm1, %v2554_v6  ;;  %v2902_v8 = vpop.f32.mrb[35].mxu1  ;;  %v2555_v1 = vadd.f32 %v2491_v0, %v2427_v32  ;;  %4420 = vrcp.f32 %v6104_v42  ;;  %v3283_v32 = vmul.f32 %v6079_v14, %v3251_v23  ;;  %v2430_v45 = vmul.f32 %v5838_v13, %v2398_v24 }
 0x4b8   : > { %v2494_v41 = vpop.xlane.xlu1 %2493  ;;  %3347 = vperm.xlu1 %4207, %v3281_v37   ;;  %v3284_v46 = vmul.f32 %v4407_v25, %v3252_v29  ;;  %v3222_v38 = vmul.f32 %v4411_v3, %v6072_v27  ;;  %v6110_v11 = vld [vmem:[#allocation4 + $0x58] sm:$0xff]  ;;  %v3253_v6 = vsub.f32 2.0, %v3221_v31 }
 0x4b9   : > { %v4413_v50 = vpop.eup %4412  ;;  %2588 = vst.msk [vmem:[#allocation4 + $0x78] sm:$0xff] %vm388_vm1, %v2555_v1  ;;  %v2556_v9 = vadd.f32 %v2494_v41, %v2428_v57  ;;  %4422 = vrcp.f32 %v6110_v11  ;;  %v2431_v41 = vmul.f32 %v5840_v7, %v2399_v21 }
 0x4ba   : > { %v6115_v8 = vpop.f32.mrb[36].mxu1  ;;  %3362 = vperm.xlu0 %4206, %v3284_v46   ;;  %v2497_v30 = vpop.xlane.xlu0 %2496  ;;  %v3254_v25 = vsub.f32 2.0, %v3222_v38  ;;  %v3223_v27 = vmul.f32 %v4413_v50, %v6077_v26  ;;  %v6119_v0 = vld [vmem:[#allocation4 + $0x60] sm:$0xff]  ;;  %v3285_v24 = vmul.f32 %v4409_v43, %v3253_v6 }
 0x4bb   : > { %v4415_v37 = vpop.eup %4414  ;;  %2589 = vst.msk [vmem:[#allocation4 + $0x80] sm:$0xff] %vm388_vm1, %v2556_v9  ;;  %v2907_v29 = vpop.f32.mrb[37].mxu1  ;;  %v2557_v10 = vadd.f32 %v2497_v30, %v2429_v28  ;;  %4424 = vrcp.f32 %v6119_v0  ;;  %v2400_v38 = vld [vmem:[#allocation4 + $0xa0] sm:$0xff] }
 0x4bc   : > { %v2500_v1 = vpop.xlane.xlu1 %2499  ;;  %3357 = vperm.xlu1 %4207, %v3283_v32   ;;  %v3286_v57 = vmul.f32 %v4411_v3, %v3254_v25  ;;  %v3224_v14 = vmul.f32 %v4415_v37, %v6084_v52  ;;  %v6125_v23 = vld [vmem:[#allocation4 + $0x68] sm:$0xff]  ;;  %v3255_v28 = vsub.f32 2.0, %v3223_v27 }
 0x4bd   : > { %v4417_v31 = vpop.eup %4416  ;;  %2590 = vst.msk [vmem:[#allocation4 + $0x88] sm:$0xff] %vm388_vm1, %v2557_v10  ;;  %v2558_v26 = vadd.f32 %v2500_v1, %v2430_v45  ;;  %4426 = vrcp.f32 %v6125_v23  ;;  %v2401_v3 = vld [vmem:[#allocation4 + $0xa8] sm:$0xff] }
 0x4be   : > { %v6130_v46 = vpop.f32.mrb[38].mxu1  ;;  %3372 = vperm.xlu0 %4206, %v3286_v57   ;;  %v2503_v13 = vpop.xlane.xlu0 %2502  ;;  %v3256_v9 = vsub.f32 2.0, %v3224_v14  ;;  %v3225_v52 = vmul.f32 %v4417_v31, %v6092_v18  ;;  %v6133_v30 = vld [vmem:[#allocation4 + $0x70] sm:$0xff]  ;;  %v2432_v18 = vmul.f32 %v5848_v33, %v2400_v38  ;;  %v2433_v27 = vmul.f32 %v5852_v62, %v2401_v3 }
 0x4bf   : > { %v4419_v32 = vpop.eup %4418  ;;  %2591 = vst.msk [vmem:[#allocation4 + $0x90] sm:$0xff] %vm388_vm1, %v2558_v26  ;;  %v2912_v25 = vpop.f32.mrb[39].mxu1  ;;  %v2559_v7 = vadd.f32 %v2503_v13, %v2431_v41  ;;  %4428 = vrcp.f32 %v6133_v30  ;;  %v3287_v1 = vmul.f32 %v4413_v50, %v3255_v28  ;;  %v2403_v28 = vld [vmem:[#allocation4 + $0xb8] sm:$0xff] }
 0x4c0   : > { %3367 = vperm.xlu1 %4207, %v3285_v24   ;;  %v3288_v21 = vmul.f32 %v4415_v37, %v3256_v9  ;;  %v3226_v29 = vmul.f32 %v4419_v32, %v6097_v4  ;;  %v6138_v43 = vld [vmem:[#allocation4 + $0x78] sm:$0xff]  ;;  %v3257_v37 = vsub.f32 2.0, %v3225_v52 }
 0x4c1   : > { %v4421_v6 = vpop.eup %4420  ;;  %2592 = vst.msk [vmem:[#allocation4 + $0x98] sm:$0xff] %vm388_vm1, %v2559_v7  ;;  %4430 = vrcp.f32 %v6138_v43 }
 0x4c2   : > { %v6144_v10 = vpop.f32.mrb[40].mxu1  ;;  %3382 = vperm.xlu0 %4206, %v3288_v21   ;;  %v2509_v45 = vpop.xlane.xlu0 %2508  ;;  %v3258_v57 = vsub.f32 2.0, %v3226_v29  ;;  %v3227_v4 = vmul.f32 %v4421_v6, %v6104_v42  ;;  %v6147_v14 = vld [vmem:[#allocation4 + $0x80] sm:$0xff]  ;;  %v3289_v50 = vmul.f32 %v4417_v31, %v3257_v37  ;;  %v2435_v31 = vmul.f32 %v5863_v34, %v2403_v28 }
 0x4c3   : > { %v4423_v26 = vpop.eup %4422  ;;  %v2506_v41 = vpop.xlane.xlu1 %2505  ;;  %v2561_v24 = vadd.f32 %v2509_v45, %v2433_v27  ;;  %4432 = vrcp.f32 %v6147_v14 }
 0x4c4   : > { %v2917_v13 = vpop.f32.mrb[41].mxu1  ;;  %v2560_v33 = vadd.f32 %v2506_v41, %v2432_v18  ;;  %3377 = vperm.xlu1 %4207, %v3287_v1   ;;  %v3290_v62 = vmul.f32 %v4419_v32, %v3258_v57  ;;  %v3228_v38 = vmul.f32 %v4423_v26, %v6110_v11  ;;  %v3170_v9 = vld [vmem:[#allocation4 + $0x88] sm:$0xff]  ;;  %v3259_v25 = vsub.f32 2.0, %v3227_v4  ;;  %v2402_v11 = vld [vmem:[#allocation4 + $0xb0] sm:$0xff] }
 0x4c5   : > { %v4425_v3 = vpop.eup %4424  ;;  %2594 = vst.msk [vmem:[#allocation4 + $0xa8] sm:$0xff] %vm388_vm1, %v2561_v24  ;;  %4434 = vrcp.f32 %v3170_v9  ;;  %v2803_v57 = vmul.f32 0.0, %v5982_v17 }
 0x4c6   : > { %2593 = vst.msk [vmem:[#allocation4 + $0xa0] sm:$0xff] %vm388_vm1, %v2560_v33  ;;  %v6153_v42 = vpop.f32.mrb[42].mxu1  ;;  %3392 = vperm.xlu0 %4206, %v3290_v62   ;;  %v3260_v52 = vsub.f32 2.0, %v3228_v38  ;;  %v3229_v7 = vmul.f32 %v4425_v3, %v6119_v0  ;;  %v3171_v21 = vld [vmem:[#allocation4 + $0x90] sm:$0xff]  ;;  %v2434_v0 = vmul.f32 %v5859_v44, %v2402_v11  ;;  %v3291_v13 = vmul.f32 %v4421_v6, %v3259_v25  ;;  %v2405_v25 = vld [vmem:[#allocation4 + $0xc8] sm:$0xff] }
 0x4c7   : > { %v4427_v32 = vpop.eup %4426  ;;  %v2922_v29 = vpop.f32.mrb[43].mxu1  ;;  %4436 = vrcp.f32 %v3171_v21 }
 0x4c8   : > { %3387 = vperm.xlu1 %4207, %v3289_v50   ;;  %v3292_v18 = vmul.f32 %v4423_v26, %v3260_v52  ;;  %v3230_v27 = vmul.f32 %v4427_v32, %v6125_v23  ;;  %v3172_v45 = vld [vmem:[#allocation4 + $0x98] sm:$0xff]  ;;  %v3261_v37 = vsub.f32 2.0, %v3229_v7  ;;  %v2404_v29 = vld [vmem:[#allocation4 + $0xc0] sm:$0xff] }
 0x4c9   : > { %v4429_v1 = vpop.eup %4428  ;;  %4438 = vrcp.f32 %v3172_v45  ;;  %v2515_v4 = vpop.xlane.xlu0 %2514 }
 0x4ca   : > { %v2925_v41 = vpop.f32.mrb[44].mxu1  ;;  %3402 = vperm.xlu0 %4206, %v3292_v18   ;;  %v3262_v24 = vsub.f32 2.0, %v3230_v27  ;;  %v3231_v33 = vmul.f32 %v4429_v1, %v6133_v30  ;;  %v2563_v62 = vadd.f32 %v2515_v4, %v2435_v31  ;;  %v3293_v44 = vmul.f32 %v4425_v3, %v3261_v37 }
 0x4cb   : > { %v4431_v26 = vpop.eup %4430  ;;  %v2512_v23 = vpop.xlane.xlu1 %2511  ;;  %v6161_v38 = vadd.f32 %v2925_v41, %v2803_v57  ;;  %v2805_v37 = vmul.f32 0.0, %v5990_v35  ;;  %v2437_v4 = vmul.f32 %v5871_v36, %v2405_v25  ;;  %v2407_v25 = vld [vmem:[#allocation4 + $0xd8] sm:$0xff] }
 0x4cc   : > { %v2927_v50 = vpop.f32.mrb[45].mxu1  ;;  %v2562_v17 = vadd.f32 %v2512_v23, %v2434_v0  ;;  %3397 = vperm.xlu1 %4207, %v3291_v13   ;;  %v3294_v34 = vmul.f32 %v4427_v32, %v3262_v24  ;;  %v3232_v28 = vmul.f32 %v4431_v26, %v6138_v43  ;;  %v3174_v52 = vld [vmem:[#allocation4 + $0xa8] sm:$0xff]  ;;  %2596 = vst.msk [vmem:[#allocation4 + $0xb8] sm:$0xff] %vm388_vm1, %v2563_v62  ;;  %v3263_v18 = vsub.f32 2.0, %v3231_v33 }
 0x4cd   : > { %v4433_v7 = vpop.eup %4432  ;;  %4440 = vrcp.f32 %v3174_v52  ;;  %v3173_v6 = vld [vmem:[#allocation4 + $0xa0] sm:$0xff]  ;;  %v2436_v0 = vmul.f32 %v5865_v55, %v2404_v29  ;;  %v2806_v55 = vmul.f32 0.0, %v5988_v2 }
 0x4ce   : > { %2595 = vst.msk [vmem:[#allocation4 + $0xb0] sm:$0xff] %vm388_vm1, %v2562_v17  ;;  %v6166_v30 = vpop.f32.mrb[46].mxu1  ;;  %3412 = vperm.xlu0 %4206, %v3294_v34   ;;  %v3264_v11 = vsub.f32 2.0, %v3232_v28  ;;  %v3233_v32 = vmul.f32 %v4433_v7, %v6147_v14  ;;  %4442 = vrcp.f32 %v3173_v6  ;;  %v3295_v24 = vmul.f32 %v4429_v1, %v3263_v18 }
 0x4cf   : > { %v4435_v43 = vpop.eup %4434  ;;  %v2932_v27 = vpop.f32.mrb[47].mxu1 }
 0x4d0   : > { %3407 = vperm.xlu1 %4207, %v3293_v44   ;;  %v3296_v57 = vmul.f32 %v4431_v26, %v3264_v11  ;;  %v3234_v31 = vmul.f32 %v4435_v43, %v3170_v9  ;;  %v3265_v62 = vsub.f32 2.0, %v3233_v32 }
 0x4d1   : > { %v4437_v3 = vpop.eup %4436  ;;  %v2521_v41 = vpop.xlane.xlu0 %2520 }
 0x4d2   : > { %v2935_v13 = vpop.f32.mrb[48].mxu1  ;;  %3422 = vperm.xlu0 %4206, %v3296_v57   ;;  %v3266_v33 = vsub.f32 2.0, %v3234_v31  ;;  %v3235_v14 = vmul.f32 %v4437_v3, %v3171_v21  ;;  %v2565_v50 = vadd.f32 %v2521_v41, %v2437_v4  ;;  %v3297_v44 = vmul.f32 %v4433_v7, %v3265_v62 }
 0x4d3   : > { %v4439_v23 = vpop.eup %4438  ;;  %v2518_v17 = vpop.xlane.xlu1 %2517  ;;  %v6172_v34 = vadd.f32 %v2935_v13, %v2805_v37  ;;  %v3176_v36 = vld [vmem:[#allocation4 + $0xb8] sm:$0xff]  ;;  %v2807_v31 = vmul.f32 0.0, %v5998_v19  ;;  %v2439_v37 = vmul.f32 %v5880_v54, %v2407_v25  ;;  %v2808_v54 = vmul.f32 0.0, %v5996_v47 }
 0x4d4   : > { %v2937_v9 = vpop.f32.mrb[49].mxu1  ;;  %v2564_v26 = vadd.f32 %v2518_v17, %v2436_v0  ;;  %3417 = vperm.xlu1 %4207, %v3295_v24   ;;  %v3298_v35 = vmul.f32 %v4435_v43, %v3266_v33  ;;  %v3236_v28 = vmul.f32 %v4439_v23, %v3172_v45  ;;  %2598 = vst.msk [vmem:[#allocation4 + $0xc8] sm:$0xff] %vm388_vm1, %v2565_v50  ;;  %4444 = vrcp.f32 %v3176_v36  ;;  %v2406_v43 = vld [vmem:[#allocation4 + $0xd0] sm:$0xff] }
 0x4d5   : > { %v3175_v1 = vld [vmem:[#allocation4 + $0xb0] sm:$0xff]  ;;  %v3267_v11 = vsub.f32 2.0, %v3235_v14  ;;  %v2438_v7 = vmul.f32 %v5873_v53, %v2406_v43  ;;  %v2809_v25 = vmul.f32 0.0, %v6006_v61 }
 0x4d6   : > { %2597 = vst.msk [vmem:[#allocation4 + $0xc0] sm:$0xff] %vm388_vm1, %v2564_v26  ;;  %v2940_v21 = vpop.f32.mrb[50].mxu1  ;;  %3432 = vperm.xlu0 %4206, %v3298_v35   ;;  %v3268_v29 = vsub.f32 2.0, %v3236_v28  ;;  %4446 = vrcp.f32 %v3175_v1 }
 0x4d7   : > { %v4441_v18 = vpop.eup %4440  ;;  %v6177_v32 = vadd.f32 %v2940_v21, %v2806_v55  ;;  %v2942_v45 = vpop.f32.mrb[51].mxu1  ;;  %v3299_v13 = vmul.f32 %v4437_v3, %v3267_v11  ;;  %v2408_v55 = vld [vmem:[#allocation4 + $0xe0] sm:$0xff] }
 0x4d8   : > { %v4443_v27 = vpop.eup %4442  ;;  %3427 = vperm.xlu1 %4207, %v3297_v44   ;;  %v3300_v2 = vmul.f32 %v4439_v23, %v3268_v29  ;;  %v3238_v57 = vmul.f32 %v4441_v18, %v3174_v52  ;;  %v2440_v45 = vmul.f32 %v5891_v40, %v2408_v55 }
 0x4d9   : > { %v3237_v4 = vmul.f32 %v4443_v27, %v3173_v6  ;;  %v2527_v0 = vpop.xlane.xlu0 %2526  ;;  %v2409_v6 = vld [vmem:[#allocation4 + $0xe8] sm:$0xff] }
 0x4da   : > { %v2945_v41 = vpop.f32.mrb[52].mxu1  ;;  %3442 = vperm.xlu0 %4206, %v3300_v2   ;;  %v3270_v24 = vsub.f32 2.0, %v3238_v57  ;;  %v2567_v33 = vadd.f32 %v2527_v0, %v2439_v37  ;;  %v2441_v47 = vmul.f32 %v5888_v58, %v2409_v6 }
 0x4db   : > { %v2524_v62 = vpop.xlane.xlu1 %2523  ;;  %v6182_v14 = vadd.f32 %v2945_v41, %v2807_v31  ;;  %v2947_v50 = vpop.f32.mrb[53].mxu1  ;;  %v3269_v17 = vsub.f32 2.0, %v3237_v4  ;;  %v3178_v19 = vld [vmem:[#allocation4 + $0xc8] sm:$0xff] }
 0x4dc   : > { %v2566_v23 = vadd.f32 %v2524_v62, %v2438_v7  ;;  %3437 = vperm.xlu1 %4207, %v3299_v13   ;;  %v3302_v52 = vmul.f32 %v4441_v18, %v3270_v24  ;;  %2600 = vst.msk [vmem:[#allocation4 + $0xd8] sm:$0xff] %vm388_vm1, %v2567_v33  ;;  %4448 = vrcp.f32 %v3178_v19  ;;  %v2411_v7 = vld [vmem:[#allocation4 + $0xf8] sm:$0xff]  ;;  %v2410_v33 = vld [vmem:[#allocation4 + $0xf0] sm:$0xff] }
 0x4dd   : > { %v3177_v53 = vld [vmem:[#allocation4 + $0xc0] sm:$0xff]  ;;  %v3301_v9 = vmul.f32 %v4443_v27, %v3269_v17  ;;  %v2443_v50 = vmul.f32 %v5898_v60, %v2411_v7  ;;  %v2442_v6 = vmul.f32 %v5901_v59, %v2410_v33 }
 0x4de   : > { %2599 = vst.msk [vmem:[#allocation4 + $0xd0] sm:$0xff] %vm388_vm1, %v2566_v23  ;;  %v2950_v3 = vpop.f32.mrb[54].mxu1  ;;  %3452 = vperm.xlu0 %4206, %v3302_v52   ;;  %4450 = vrcp.f32 %v3177_v53  ;;  %v4445_v26 = vpop.eup %4444 }
 0x4df   : > { %v6187_v35 = vadd.f32 %v2950_v3, %v2808_v54  ;;  %v2952_v28 = vpop.f32.mrb[55].mxu1  ;;  %v3240_v44 = vmul.f32 %v4445_v26, %v3176_v36  ;;  %v2810_v36 = vmul.f32 0.0, %v6004_v48  ;;  %v2811_v48 = vmul.f32 0.0, %v6014_v63 }
 0x4e0   : > { %v4447_v21 = vpop.eup %4446  ;;  %3447 = vperm.xlu1 %4207, %v3301_v9   ;;  %v2812_v63 = vmul.f32 0.0, %v6012_v20 }
 0x4e1   : > { %v2533_v29 = vpop.xlane.xlu0 %2532  ;;  %v3239_v11 = vmul.f32 %v4447_v21, %v3175_v1  ;;  %v3272_v27 = vsub.f32 2.0, %v3240_v44 }
 0x4e2   : > { %v2569_v18 = vadd.f32 %v2533_v29, %v2441_v47  ;;  %v2955_v43 = vpop.f32.mrb[56].mxu1 }
 0x4e3   : > { %v2530_v2 = vpop.xlane.xlu1 %2529  ;;  %v6192_v57 = vadd.f32 %v2955_v43, %v2809_v25  ;;  %v2957_v31 = vpop.f32.mrb[57].mxu1  ;;  %v3271_v37 = vsub.f32 2.0, %v3239_v11  ;;  %v3304_v0 = vmul.f32 %v4445_v26, %v3272_v27  ;;  %v3180_v58 = vld [vmem:[#allocation4 + $0xd8] sm:$0xff]  ;;  %v2813_v43 = vmul.f32 0.0, %v6022_v15 }
 0x4e4   : > { %2602 = vst.msk [vmem:[#allocation4 + $0xe8] sm:$0xff] %vm388_vm1, %v2569_v18  ;;  %v2568_v4 = vadd.f32 %v2530_v2, %v2440_v45  ;;  %4452 = vrcp.f32 %v3180_v58 }
 0x4e5   : > { %v3303_v61 = vmul.f32 %v4447_v21, %v3271_v37  ;;  %v3179_v1 = vld [vmem:[#allocation4 + $0xd0] sm:$0xff]  ;;  %3462 = vperm.xlu0 %4206, %v3304_v0  }
 0x4e6   : > { %2601 = vst.msk [vmem:[#allocation4 + $0xe0] sm:$0xff] %vm388_vm1, %v2568_v4  ;;  %v2960_v40 = vpop.f32.mrb[58].mxu1  ;;  %4454 = vrcp.f32 %v3179_v1  ;;  %v4449_v41 = vpop.eup %4448 }
 0x4e7   : > { %3457 = vperm.xlu1 %4207, %v3303_v61   ;;  %v6197_v13 = vadd.f32 %v2960_v40, %v2810_v36  ;;  %v2962_v24 = vpop.f32.mrb[59].mxu1  ;;  %v3242_v17 = vmul.f32 %v4449_v41, %v3178_v19  ;;  %v2814_v61 = vmul.f32 0.0, %v6020_v56  ;;  %v2815_v56 = vmul.f32 0.0, %v6026_v5 }
 0x4e8   : > { %v4451_v62 = vpop.eup %4450  ;;  %v2817_v5 = vmul.f32 0.0, %v6030_v16 }
 0x4e9   : > { %v2539_v23 = vpop.xlane.xlu0 %2538  ;;  %v3241_v52 = vmul.f32 %v4451_v62, %v3177_v53  ;;  %v3274_v9 = vsub.f32 2.0, %v3242_v17 }
 0x4ea   : > { %v2571_v54 = vadd.f32 %v2539_v23, %v2443_v50  ;;  %v2965_v3 = vpop.f32.mrb[60].mxu1 }
 0x4eb   : > { %v2536_v26 = vpop.xlane.xlu1 %2535  ;;  %v6202_v28 = vadd.f32 %v2965_v3, %v2811_v48  ;;  %v2967_v55 = vpop.f32.mrb[61].mxu1  ;;  %v3273_v21 = vsub.f32 2.0, %v3241_v52  ;;  %v3182_v47 = vld [vmem:[#allocation4 + $0xe8] sm:$0xff]  ;;  %v3306_v60 = vmul.f32 %v4449_v41, %v3274_v9 }
 0x4ec   : > { %2604 = vst.msk [vmem:[#allocation4 + $0xf8] sm:$0xff] %vm388_vm1, %v2571_v54  ;;  %v2570_v44 = vadd.f32 %v2536_v26, %v2442_v6  ;;  %4456 = vrcp.f32 %v3182_v47 }
 0x4ed   : > { %v3305_v19 = vmul.f32 %v4451_v62, %v3273_v21  ;;  %v3181_v53 = vld [vmem:[#allocation4 + $0xe0] sm:$0xff]  ;;  %3472 = vperm.xlu0 %4206, %v3306_v60  }
 0x4ee   : > { %2603 = vst.msk [vmem:[#allocation4 + $0xf0] sm:$0xff] %vm388_vm1, %v2570_v44  ;;  %v2970_v59 = vpop.f32.mrb[62].mxu1  ;;  %4458 = vrcp.f32 %v3181_v53  ;;  %v4453_v25 = vpop.eup %4452 }
 0x4ef   : > { %3467 = vperm.xlu1 %4207, %v3305_v19   ;;  %v6207_v29 = vadd.f32 %v2970_v59, %v2812_v63  ;;  %v2972_v11 = vpop.f32.mrb[63].mxu1  ;;  %v3244_v45 = vmul.f32 %v4453_v25, %v3180_v58 }
 0x4f0   : > { %v4455_v18 = vpop.eup %4454 }
 0x4f1   : > { %v3243_v27 = vmul.f32 %v4455_v18, %v3179_v1  ;;  %v3276_v31 = vsub.f32 2.0, %v3244_v45  ;;  %v2818_v45 = vmul.f32 0.0, %v6028_v12 }
 0x4f3   : > { %v2975_v2 = vpop.f32.mrb[64].mxu1  ;;  %v3275_v4 = vsub.f32 2.0, %v3243_v27  ;;  %v3184_v0 = vld [vmem:[#allocation4 + $0xf8] sm:$0xff]  ;;  %v3308_v36 = vmul.f32 %v4453_v25, %v3276_v31 }
 0x4f4   : > { %v6210_v20 = vadd.f32 %v2975_v2, %v2813_v43  ;;  %v2977_v37 = vpop.f32.mrb[65].mxu1  ;;  %4460 = vrcp.f32 %v3184_v0  ;;  %v2819_v2 = vmul.f32 0.0, %v6034_v22 }
 0x4f5   : > { %v3307_v7 = vmul.f32 %v4455_v18, %v3275_v4  ;;  %v3183_v40 = vld [vmem:[#allocation4 + $0xf0] sm:$0xff]  ;;  %3482 = vperm.xlu0 %4206, %v3308_v36  }
 0x4f6   : > { %v4457_v41 = vpop.eup %4456  ;;  %4462 = vrcp.f32 %v3183_v40 }
 0x4f7   : > { %v2980_v24 = vpop.f32.mrb[66].mxu1  ;;  %3477 = vperm.xlu1 %4207, %v3307_v7   ;;  %v3246_v1 = vmul.f32 %v4457_v41, %v3182_v47  ;;  %v2816_v47 = vmul.f32 0.0, %v6024_v49  ;;  %v6547_v7 = vld [vmem:[#allocation31_spill] sm:$0xff] }
 0x4f8   : > { %v6213_v15 = vadd.f32 %v2980_v24, %v2814_v61  ;;  %v2982_v58 = vpop.f32.mrb[67].mxu1  ;;  %v4459_v33 = vpop.eup %4458 }
 0x4f9   : > { %v3278_v62 = vsub.f32 2.0, %v3246_v1  ;;  %v3245_v50 = vmul.f32 %v4459_v33, %v3181_v53  ;;  %v6548_v58 = vld [vmem:[#allocation30_spill] sm:$0xff] }
 0x4fa   : > { %v2822_v1 = vmul.f32 0.0, %v6548_v58 }
 0x4fb   : > { %v3310_v17 = vmul.f32 %v4457_v41, %v3278_v62  ;;  %v3277_v48 = vsub.f32 2.0, %v3245_v50  ;;  %v6549_v50 = vld [vmem:[#allocation29_spill] sm:$0xff] }
 0x4fd   : > { %3492 = vperm.xlu0 %4206, %v3310_v17   ;;  %v3309_v23 = vmul.f32 %v4459_v33, %v3277_v48  ;;  %v2823_v17 = vmul.f32 0.0, %v6549_v50 }
 0x4fe   : > { %v4461_v52 = vpop.eup %4460 }
 0x4ff   : > { %3487 = vperm.xlu1 %4207, %v3309_v23   ;;  %v3248_v54 = vmul.f32 %v4461_v52, %v3184_v0  ;;  %v2820_v0 = vmul.f32 0.0, %v6032_v39 }
 0x500   : > { %v4463_v6 = vpop.eup %4462  ;;  %v2985_v3 = vpop.f32.mrb[68].mxu1 }
 0x501   : > { %v6216_v9 = vadd.f32 %v2985_v3, %v2815_v56  ;;  %v2987_v26 = vpop.f32.mrb[69].mxu1  ;;  %v3280_v55 = vsub.f32 2.0, %v3248_v54  ;;  %v3247_v21 = vmul.f32 %v4463_v6, %v3183_v40  ;;  %v2821_v40 = vmul.f32 0.0, %v6547_v7 }
 0x502   : > { %v6551_v26 = vld [vmem:[#allocation35_spill] sm:$0xff] }
 0x503   : > { %v3312_v44 = vmul.f32 %v4461_v52, %v3280_v55  ;;  %v3279_v60 = vsub.f32 2.0, %v3247_v21  ;;  %v6550_v52 = vld [vmem:[#allocation28_spill] sm:$0xff]  ;;  %v2825_v55 = vmul.f32 0.0, %v6551_v26 }
 0x504   : > { %v2990_v63 = vpop.f32.mrb[70].mxu1  ;;  %v2824_v56 = vmul.f32 0.0, %v6550_v52 }
 0x505   : > { %v6219_v19 = vadd.f32 %v2990_v63, %v2816_v47  ;;  %v2992_v53 = vpop.f32.mrb[71].mxu1  ;;  %3502 = vperm.xlu0 %4206, %v3312_v44   ;;  %v3311_v59 = vmul.f32 %v4463_v6, %v3279_v60  ;;  %v6552_v60 = vld [vmem:[#allocation34_spill] sm:$0xff] }
 0x506   : > { %v2826_v63 = vmul.f32 0.0, %v6552_v60 }
 0x507   : > { %3497 = vperm.xlu1 %4207, %v3311_v59  }
 0x508   : > { %v2995_v25 = vpop.f32.mrb[72].mxu1 }
 0x509   : > { %v6222_v11 = vadd.f32 %v2995_v25, %v2817_v5  ;;  %v2997_v18 = vpop.f32.mrb[73].mxu1  ;;  %v6553_v25 = vld [vmem:[#allocation33_spill] sm:$0xff] }
 0x50a   : > { %v2827_v18 = vmul.f32 0.0, %v6553_v25 }
 0x50c   : > { %v3000_v43 = vpop.f32.mrb[74].mxu1 }
 0x50d   : > { %v6225_v27 = vadd.f32 %v3000_v43, %v2818_v45  ;;  %v3002_v49 = vpop.f32.mrb[75].mxu1 }
 0x510   : > { %v3005_v31 = vpop.f32.mrb[76].mxu1 }
 0x511   : > { %v6228_v37 = vadd.f32 %v3005_v31, %v2819_v2  ;;  %v3007_v4 = vpop.f32.mrb[77].mxu1  ;;  %v6554_v2 = vld [vmem:[#allocation32_spill] sm:$0xff] }
 0x512   : > { %v2828_v31 = vmul.f32 0.0, %v6554_v2  ;;  %v6555_v4 = vld [vmem:[#allocation68_spill] sm:$0xff]  ;;  %v6561_v2 = vld [vmem:[#allocation25_spill] sm:$0xff] }
 0x514   : > { %v3010_v16 = vpop.f32.mrb[78].mxu1 }
 0x515   : > { %v6231_v36 = vadd.f32 %v3010_v16, %v2820_v0  ;;  %v3012_v61 = vpop.f32.mrb[79].mxu1  ;;  %v2797_v0 = vmul.f32 0.0, %v6555_v4 }
 0x518   : > { %v3015_v41 = vpop.f32.mrb[80].mxu1 }
 0x519   : > { %v6234_v12 = vadd.f32 %v3015_v41, %v2821_v40  ;;  %v3017_v24 = vpop.f32.mrb[81].mxu1  ;;  %v6556_v41 = vld [vmem:[#allocation38_spill] sm:$0xff] }
 0x51a   : > { %v3054_v24 = vadd.f32 %v6556_v41, %v2797_v0  ;;  %v6562_v41 = vld [vmem:[#allocation27_spill] sm:$0xff] }
 0x51c   : > { %v3020_v33 = vpop.f32.mrb[82].mxu1 }
 0x51d   : > { %v6237_v22 = vadd.f32 %v3020_v33, %v2822_v1  ;;  %v3022_v62 = vpop.f32.mrb[83].mxu1  ;;  %v6557_v1 = vld [vmem:[#allocation23_spill] sm:$0xff] }
 0x51e   : > { %v2798_v33 = vmul.f32 0.0, %v6557_v1 }
 0x520   : > { %v3025_v48 = vpop.f32.mrb[84].mxu1 }
 0x521   : > { %v6240_v39 = vadd.f32 %v3025_v48, %v2823_v17  ;;  %v3027_v23 = vpop.f32.mrb[85].mxu1  ;;  %v3055_v17 = vadd.f32 %v6102_v51, %v2798_v33 }
 0x522   : > { %v6558_v23 = vld [vmem:[#allocation22_spill] sm:$0xff] }
 0x523   : > { %v2799_v52 = vmul.f32 0.0, %v6558_v23 }
 0x524   : > { %v3030_v54 = vpop.f32.mrb[86].mxu1 }
 0x525   : > { %v6243_v6 = vadd.f32 %v3030_v54, %v2824_v56  ;;  %v3032_v3 = vpop.f32.mrb[87].mxu1 }
 0x526   : > { %v3056_v3 = vadd.f32 %v6115_v8, %v2799_v52  ;;  %v2802_v8 = vmul.f32 0.0, %v6561_v2 }
 0x528   : > { %v3035_v21 = vpop.f32.mrb[88].mxu1  ;;  %v3059_v0 = vadd.f32 %v6153_v42, %v2802_v8 }
 0x529   : > { %v6246_v47 = vadd.f32 %v3035_v21, %v2825_v55  ;;  %v3037_v44 = vpop.f32.mrb[89].mxu1  ;;  %v6559_v55 = vld [vmem:[#allocation24_spill] sm:$0xff] }
 0x52a   : > { %v2800_v21 = vmul.f32 0.0, %v6559_v55 }
 0x52c   : > { %v3040_v53 = vpop.f32.mrb[90].mxu1 }
 0x52d   : > { %v6249_v59 = vadd.f32 %v3040_v53, %v2826_v63  ;;  %v3042_v5 = vpop.f32.mrb[91].mxu1  ;;  %v3057_v63 = vadd.f32 %v6130_v46, %v2800_v21 }
 0x52e   : > { %v6560_v5 = vld [vmem:[#allocation26_spill] sm:$0xff] }
 0x52f   : > { %v2801_v51 = vmul.f32 0.0, %v6560_v5 }
 0x530   : > { %v3045_v45 = vpop.f32.mrb[92].mxu1 }
 0x531   : > { %v6252_v43 = vadd.f32 %v3045_v45, %v2827_v18  ;;  %v3047_v49 = vpop.f32.mrb[93].mxu1  ;;  %v3353_v61 = vpop.permute.xlu0 %3352  ;;  %v3058_v45 = vadd.f32 %v6144_v10, %v2801_v51 }
 0x532   : > { %v3506_v56 = vmul.f32 %v3353_v61, %v3055_v17 }
 0x534   : > { %v3050_v16 = vpop.f32.mrb[94].mxu1 }
 0x535   : > { %v6256_v7 = vadd.f32 %v3050_v16, %v2828_v31  ;;  %v3052_v40 = vpop.f32.mrb[95].mxu1 }
 0x537   : > { %v3348_v58 = vpop.permute.xlu1 %3347 }
 0x538   : > { %v3505_v62 = vmul.f32 %v3348_v58, %v3054_v24  ;;  %v2804_v24 = vmul.f32 0.0, %v6562_v41 }
 0x539   : > { %v3363_v50 = vpop.permute.xlu0 %3362 }
 0x53a   : > { %3537 = vxpose.xlu1.b32.start [1/16] (narrow) %v3505_v62, 16  ;;  %v3508_v25 = vmul.f32 %v3363_v50, %v3057_v63  ;;  %v3061_v10 = vadd.f32 %v6166_v30, %v2804_v24 }
 0x53b   : > { %v3358_v48 = vpop.permute.xlu1 %3357 }
 0x53c   : > { %v3507_v44 = vmul.f32 %v3358_v48, %v3056_v3 }
 0x53d   : > { %v3373_v54 = vpop.permute.xlu0 %3372 }
 0x53e   : > { %3538 = vxpose.xlu1.b32.cont [2/16] (narrow) %v3506_v56, 16  ;;  %v3510_v61 = vmul.f32 %v3373_v54, %v3059_v0 }
 0x53f   : > { %v3368_v26 = vpop.permute.xlu1 %3367 }
 0x540   : > { %v3509_v31 = vmul.f32 %v3368_v26, %v3058_v45 }
 0x541   : > { %v3383_v60 = vpop.permute.xlu0 %3382 }
 0x542   : > { %3539 = vxpose.xlu1.b32.cont [3/16] (narrow) %v3507_v44, 16  ;;  %v3512_v62 = vmul.f32 %v3383_v60, %v3061_v10 }
 0x543   : > { %v3378_v53 = vpop.permute.xlu1 %3377 }
 0x544   : > { %v3511_v58 = vmul.f32 %v3378_v53, %v6161_v38 }
 0x545   : > { %v3393_v18 = vpop.permute.xlu0 %3392 }
 0x546   : > { %3540 = vxpose.xlu1.b32.cont [4/16] (narrow) %v3508_v25, 16  ;;  %v3514_v23 = vmul.f32 %v3393_v18, %v6177_v32  ;;  %v3602_v25 = vstv %s3601_s16  ;;  %v3607_v18 = vld [vmem:[%s4904_s17] sm:$0xff] }
 0x547   : > { %v3388_v49 = vpop.permute.xlu1 %3387 }
 0x548   : > { %v3513_v42 = vmul.f32 %v3388_v49, %v6172_v34 }
 0x549   : > { %v3403_v4 = vpop.permute.xlu0 %3402 }
 0x54a   : > { %3541 = vxpose.xlu1.b32.cont [5/16] (narrow) %v3509_v31, 16  ;;  %v3516_v34 = vmul.f32 %v3403_v4, %v6187_v35  ;;  %v3608_v31 = vld [vmem:[%s4904_s17 + $0x8] sm:$0xff] }
 0x54b   : > { %v3398_v16 = vpop.permute.xlu1 %3397 }
 0x54c   : > { %v3515_v30 = vmul.f32 %v3398_v16, %v6182_v14  ;;  %v3610_v16 = vld [vmem:[%s4904_s17 + $0x18] sm:$0xff] }
 0x54d   : > { %v3413_v46 = vpop.permute.xlu0 %3412 }
 0x54e   : > { %3542 = vxpose.xlu1.b32.cont [6/16] (narrow) %v3510_v61, 16  ;;  %v3518_v14 = vmul.f32 %v3413_v46, %v6197_v13 }
 0x54f   : > { %v3408_v40 = vpop.permute.xlu1 %3407 }
 0x550   : > { %v3517_v32 = vmul.f32 %v3408_v40, %v6192_v57 }
 0x551   : > { %v3423_v1 = vpop.permute.xlu0 %3422 }
 0x552   : > { %3543 = vxpose.xlu1.b32.cont [7/16] (narrow) %v3511_v58, 16  ;;  %v3520_v57 = vmul.f32 %v3423_v1, %v6207_v29 }
 0x553   : > { %v3418_v33 = vpop.permute.xlu1 %3417 }
 0x554   : > { %v3519_v35 = vmul.f32 %v3418_v33, %v6202_v28 }
 0x555   : > { %v3433_v48 = vpop.permute.xlu0 %3432 }
 0x556   : > { %3544 = vxpose.xlu1.b32.cont [8/16] (narrow) %v3512_v62, 16  ;;  %v3522_v52 = vmul.f32 %v3433_v48, %v6213_v15 }
 0x557   : > { %v3428_v50 = vpop.permute.xlu1 %3427 }
 0x558   : > { %v3521_v17 = vmul.f32 %v3428_v50, %v6210_v20 }
 0x559   : > { %v3443_v54 = vpop.permute.xlu0 %3442 }
 0x55a   : > { %3545 = vxpose.xlu1.b32.cont [9/16] (narrow) %v3513_v42, 16  ;;  %3569 = vxpose.xlu0.b32.start [1/16] (narrow) %v3521_v17, 16  ;;  %v3524_v20 = vmul.f32 %v3443_v54, %v6219_v19 }
 0x55b   : > { %v3438_v38 = vpop.permute.xlu1 %3437 }
 0x55c   : > { %v3523_v56 = vmul.f32 %v3438_v38, %v6216_v9 }
 0x55d   : > { %v3453_v26 = vpop.permute.xlu0 %3452 }
 0x55e   : > { %3546 = vxpose.xlu1.b32.cont [10/16] (narrow) %v3514_v23, 16  ;;  %3570 = vxpose.xlu0.b32.cont [2/16] (narrow) %v3522_v52, 16  ;;  %v3526_v9 = vmul.f32 %v3453_v26, %v6225_v27 }
 0x55f   : > { %v3448_v3 = vpop.permute.xlu1 %3447 }
 0x560   : > { %v3525_v15 = vmul.f32 %v3448_v3, %v6222_v11 }
 0x562   : > { %3547 = vxpose.xlu1.b32.cont [11/16] (narrow) %v3515_v30, 16  ;;  %3571 = vxpose.xlu0.b32.cont [3/16] (narrow) %v3523_v56, 16 }
 0x564   : > { %v3463_v21 = vpop.permute.xlu0 %3462 }
 0x565   : > { %v3528_v11 = vmul.f32 %v3463_v21, %v6231_v36 }
 0x566   : > { %3548 = vxpose.xlu1.b32.cont [12/16] (narrow) %v3516_v34, 16  ;;  %3572 = vxpose.xlu0.b32.cont [4/16] (narrow) %v3524_v20, 16  ;;  %v3458_v55 = vpop.permute.xlu1 %3457 }
 0x567   : > { %v3527_v19 = vmul.f32 %v3458_v55, %v6228_v37 }
 0x56a   : > { %3549 = vxpose.xlu1.b32.cont [13/16] (narrow) %v3517_v32, 16  ;;  %3573 = vxpose.xlu0.b32.cont [5/16] (narrow) %v3525_v15, 16 }
 0x56c   : > { %v3473_v27 = vpop.permute.xlu0 %3472 }
 0x56d   : > { %v3530_v60 = vmul.f32 %v3473_v27, %v6237_v22 }
 0x56e   : > { %3550 = vxpose.xlu1.b32.cont [14/16] (narrow) %v3518_v14, 16  ;;  %3574 = vxpose.xlu0.b32.cont [6/16] (narrow) %v3526_v9, 16  ;;  %v3468_v44 = vpop.permute.xlu1 %3467 }
 0x56f   : > { %v3529_v13 = vmul.f32 %v3468_v44, %v6234_v12 }
 0x572   : > { %3551 = vxpose.xlu1.b32.cont [15/16] (narrow) %v3519_v35, 16  ;;  %3575 = vxpose.xlu0.b32.cont [7/16] (narrow) %v3527_v19, 16 }
 0x574   : > { %v3483_v37 = vpop.permute.xlu0 %3482 }
 0x575   : > { %v3532_v53 = vmul.f32 %v3483_v37, %v6243_v6 }
 0x576   : > { %3552 = vxpose.xlu1.b32.end [16/16] (narrow) %v3520_v57, 16  ;;  %3576 = vxpose.xlu0.b32.cont [8/16] (narrow) %v3528_v11, 16  ;;  %v3478_v63 = vpop.permute.xlu1 %3477 }
 0x577   : > { %v3531_v28 = vmul.f32 %v3478_v63, %v6240_v39 }
 0x57a   : > { %3577 = vxpose.xlu0.b32.cont [9/16] (narrow) %v3529_v13, 16 }
 0x57c   : > { %v3493_v5 = vpop.permute.xlu0 %3492 }
 0x57d   : > { %v3534_v12 = vmul.f32 %v3493_v5, %v6249_v59  ;;  %v3609_v59 = vld [vmem:[%s4904_s17 + $0x10] sm:$0xff]  ;;  %s4556_s17 = sshll.u32 %s4655_s29, 4  ;;  %s4557_s17 = int_to_ptr.vmem [resolvable:$false] %s4556_s17 }
 0x57e   : > { %3578 = vxpose.xlu0.b32.cont [10/16] (narrow) %v3530_v60, 16  ;;  %v3488_v29 = vpop.permute.xlu1 %3487  ;;  %s4558_s6 = scalar_lea.vmem %s4557_s17, 1024  ;;  %p4559_p2 = scmp.lt.s32.totalorder %s6302_s25, %s4557_s17 }
 0x57f   : > { %v3533_v36 = vmul.f32 %v3488_v29, %v6246_v47  ;;  %p4560_p7 = scmp.lt.s32.totalorder %s4558_s6, %s4552_s22 }
 0x581   : > { %p4561_p4 = por %p4560_p7, %p4559_p2 }
 0x582   : > { %3579 = vxpose.xlu0.b32.cont [11/16] (narrow) %v3531_v28, 16 }
 0x583   : > { %p4562_p8 = pnand %p4561_p4, %p4555_p1 }
 0x584   : > { %v3503_v39 = vpop.permute.xlu0 %3502 }
 0x585   : > { %v3536_v6 = vmul.f32 %v3503_v39, %v6256_v7 }
 0x586   : > { %3580 = vxpose.xlu0.b32.cont [12/16] (narrow) %v3532_v53, 16  ;;  %v3498_v22 = vpop.permute.xlu1 %3497 }
 0x587   : > { %v3535_v51 = vmul.f32 %v3498_v22, %v6252_v43 }
 0x58a   : > { %3581 = vxpose.xlu0.b32.cont [13/16] (narrow) %v3533_v36, 16 }
 0x58e   : > { %3582 = vxpose.xlu0.b32.cont [14/16] (narrow) %v3534_v12, 16 }
 0x592   : > { %3583 = vxpose.xlu0.b32.cont [15/16] (narrow) %v3535_v51, 16 }
 0x596   : > { %3584 = vxpose.xlu0.b32.end [16/16] (narrow) %v3536_v6, 16 }
 0x5ba   : > { %v3553_v47 = vpop.trf.xlu1 }
 0x5bb   : > { %v3603_v45 = vmul.f32 %v3602_v25, %v3553_v47 }
 0x5bd   : > { %v3611_v49 = vadd.f32 %v3607_v18, %v3603_v45 }
 0x5be   : > { %v3554_v2 = vpop.trf.xlu1 }
 0x5bf   : > { %3615 = vst [vmem:[%s380_s21] sm:$0xff] %v3611_v49  ;;  %v3605_v8 = vmul.f32 %v3602_v25, %v3554_v2 }
 0x5c1   : > { %v3613_v43 = vadd.f32 %v3609_v59, %v3605_v8 }
 0x5c3   : > { %3617 = vst [vmem:[%s380_s21 + $0x10] sm:$0xff] %v3613_v43 }
 0x5da   : > { %v3585_v4 = vpop.trf.xlu0 }
 0x5db   : > { %v3604_v7 = vmul.f32 %v3602_v25, %v3585_v4 }
 0x5dd   : > { %v3612_v0 = vadd.f32 %v3608_v31, %v3604_v7 }
 0x5de   : > { %v3586_v61 = vpop.trf.xlu0 }
 0x5df   : > { %3616 = vst [vmem:[%s380_s21 + $0x8] sm:$0xff] %v3612_v0  ;;  %v3606_v46 = vmul.f32 %v3602_v25, %v3586_v61 }
 0x5e1   : > { %v3614_v40 = vadd.f32 %v3610_v16, %v3606_v46 }
 0x5e3   : > { %3618 = vst [vmem:[%s380_s21 + $0x18] sm:$0xff] %v3614_v40 }
 0x5e4   : > { %4565 = shalt.err (!%p4562_p8)
}
 0x5e5   : > { %s4566_s10 = scalar_lea.hbm %s6307_s0, 512  ;;  %s4570_s13 = scalar_lea.hbm %s6363_s7, 1024 }
 0x5e6   : > { %p4567_p12 = scmp.ne.s32.totalorder %s6307_s0, %s4566_s10  ;;  %p4571_p6 = scmp.lt.u32.totalorder %s6307_s0, %s6363_s7 }
 0x5e7   : > { %p4572_p13 = scmp.lt.u32.totalorder %s4570_s13, %s4566_s10  ;;  %p4574_p5 = scmp.lt.u32.totalorder %s4566_s10, %s6307_s0 }
 0x5e8   : > { %p4568_p11 = pnand %p4567_p12, %p4793_p10 }
 0x5e9   : > { %p4573_p0 = por %p4572_p13, %p4571_p6 }
 0x5ea   : > { %p4569_p3 = pneg %p4568_p11 }
 0x5eb   : > { %p4575_p9 = por %p4574_p5, %p4573_p0 }
 0x5ed   : > { %p4576_p1 = pnand %p4575_p9, %p4569_p3 }
 0x5ef   : > { %4579 = shalt.err (!%p4576_p1)
}
 0x5f0   : > { %s4656_s14 = smov 256   ;;  %s4657_s16 = smov 16  }
 0x5f1   : > { %4126 = dma.vmem_to_hbm [thread:$0]  (%p4793_p10), %s6302_s25, 512, %s6307_s0, %s3620_s12, %s4656_s14, %s4656_s14, %s4657_s16  }
 0x5f2 PF: > { %s3650_s21 = sand.u32 1, %s4622_s26   ;;  %p6563_p2 = scmp.ne.s32.totalorder %s6422_s11, 0 }
 0x5f3   : > { %p6564_p7 = scmp.ge.s32.totalorder %s4642_s8, 2  ;;  %s3651_s2 = scalar_lea.sflag [#allocation10], %s3650_s21 }
 0x5f5   : > { %p4140_p4 = pnand %p6564_p7, %p6563_p2 }
 0x5f7   : > { %4617 = dma.done.wait (!%p4140_p4), %s3651_s2, 512  }
 0x5f8   : > { %4619 = vsyncadd (!%p4140_p4), %s3651_s2, 4294966784  ;;  %s27_s8 = sadd.s32 1, %s4642_s8   ;;  %s6565_s9 = sld [smem:[#allocation19_spill]] }
 0x5f9   : > { %p24_p8 = scmp.ge.s32.totalorder %s27_s8, 4   ;;  %s6566_s28 = sld [smem:[#allocation21_spill]] }
 0x5fa   : > { %s6567_s15 = sld [smem:[#allocation20_spill]]  ;;  %s6568_s26 = smov %s4626_s27 }
 0x5fb   : > { %s6570_s29 = smov %s4638_s30  ;;  %26 = sbr.rel (!%p24_p8) target bundleno = 12 (0xc), region = 124 }
 0x5fe   : > { %s6569_s27 = smov %s6565_s9 }
 0x600   : > { %s6571_s30 = smov %s6567_s15 }
 0x602   :  { %3656 = vsyncpa [#allocation9], 1 }
 0x603   :  { %3658 = vsyncpa [#allocation9 + $0x1], 1 }
 0x604   :  { %3659 = vsyncpa [#allocation12], 1 }
 0x605   :  { %3661 = vsyncpa [#allocation12 + $0x1], 1 }
 0x606   :  { %3662 = vsyncpa [#allocation10], 1 }
 0x607   :  { %3664 = vsyncpa [#allocation10 + $0x1], 1 }

</bundles_post_ra>
